<compile_context>
chip_gen: v6e
topology: v6e:2x2x1
jax: 0.10.0
libtpu: 0.0.40
codegen_flags: <defaults>
</compile_context>

<pallas_src>
import functools
import math

import jax
import jax.numpy as jnp
from jax.experimental import pallas as pl
from jax.experimental.pallas import tpu as pltpu


def _round_up(x: int, m: int) -> int:
    return ((x + m - 1) // m) * m


_VMEM_LIMIT = 48 * 1024 * 1024  # above scoped defaults, below v7x physical 64 MiB


# ----------------------------------------------------------------------------
# Pallas kernel: single-pass  out = relu?(x @ w + b)
#   x: (tm, K) bf16, w: (K, N) bf16 (resident), b: (1, N) f32.
#   Full K in one block -> no K loop, no accumulator scratch.
# ----------------------------------------------------------------------------
def _matmul_bias_kernel(x_ref, w_ref, b_ref, o_ref, *, relu: bool):
    acc = jnp.dot(x_ref[...], w_ref[...], preferred_element_type=jnp.float32)
    acc = acc + b_ref[...]
    if relu:
        acc = jnp.maximum(acc, 0.0)
    o_ref[...] = acc.astype(o_ref.dtype)


def linear_pallas(x, w, b, *, relu: bool, out_dtype, tm_cap: int = 512):
    """out = relu?(x @ w + b). x:(M,K) bf16, w:(K,N) bf16, b:(1,N) f32."""
    M, K = x.shape
    Kw, N = w.shape
    assert Kw == K and b.shape == (1, N)

    Mp = _round_up(M, 16)               # bf16 sublane packing
    if Mp <= tm_cap:
        tm = Mp
    else:
        tm = tm_cap
        Mp = _round_up(Mp, tm)
    xp = x if Mp == M else jnp.zeros((Mp, K), x.dtype).at[:M].set(x)

    kernel = functools.partial(_matmul_bias_kernel, relu=relu)
    out = pl.pallas_call(
        kernel,
        out_shape=jax.ShapeDtypeStruct((Mp, N), out_dtype),
        grid_spec=pltpu.PrefetchScalarGridSpec(
            num_scalar_prefetch=0,
            grid=(Mp // tm,),
            in_specs=[
                pl.BlockSpec((tm, K), lambda m: (m, 0)),
                pl.BlockSpec((K, N), lambda m: (0, 0)),   # weight stays resident
                pl.BlockSpec((1, N), lambda m: (0, 0)),
            ],
            out_specs=pl.BlockSpec((tm, N), lambda m: (m, 0)),
        ),
        compiler_params=pltpu.CompilerParams(
            dimension_semantics=("parallel",),
            vmem_limit_bytes=_VMEM_LIMIT,
        ),
    )(xp, w, b)
    return out if Mp == M else out[:M]


# ----------------------------------------------------------------------------
# Pallas kernel: fused head  out = relu(x @ w4 + b4) @ w5 + b5
#   All weights VMEM-resident; both matmuls on the MXU, bf16 in / f32 acc.
# ----------------------------------------------------------------------------
def _head_kernel(x_ref, w4_ref, b4_ref, w5_ref, b5_ref, o_ref):
    h = jnp.dot(x_ref[...], w4_ref[...], preferred_element_type=jnp.float32)
    h = jnp.maximum(h + b4_ref[...], 0.0)
    o = jnp.dot(h.astype(jnp.bfloat16), w5_ref[...],
                preferred_element_type=jnp.float32)
    o_ref[...] = (o + b5_ref[...]).astype(o_ref.dtype)


def head_pallas(x, w4, b4, w5, b5, *, tm_cap: int = 128):
    """x:(M,3136) bf16, w4:(3136,512) bf16, w5:(512,Np) bf16 -> (Mp,Np) f32."""
    M, K = x.shape
    Kw, H = w4.shape
    Hw, N = w5.shape
    assert Kw == K and Hw == H and b4.shape == (1, H) and b5.shape == (1, N)

    Mp = _round_up(M, 16)
    if Mp <= tm_cap:
        tm = Mp
    else:
        tm = tm_cap
        Mp = _round_up(Mp, tm)
    xp = x if Mp == M else jnp.zeros((Mp, K), x.dtype).at[:M].set(x)

    return pl.pallas_call(
        _head_kernel,
        out_shape=jax.ShapeDtypeStruct((Mp, N), jnp.float32),
        grid_spec=pltpu.PrefetchScalarGridSpec(
            num_scalar_prefetch=0,
            grid=(Mp // tm,),
            in_specs=[
                pl.BlockSpec((tm, K), lambda m: (m, 0)),
                pl.BlockSpec((K, H), lambda m: (0, 0)),
                pl.BlockSpec((1, H), lambda m: (0, 0)),
                pl.BlockSpec((H, N), lambda m: (0, 0)),
                pl.BlockSpec((1, N), lambda m: (0, 0)),
            ],
            out_specs=pl.BlockSpec((tm, N), lambda m: (m, 0)),
        ),
        compiler_params=pltpu.CompilerParams(
            dimension_semantics=("parallel",),
            vmem_limit_bytes=_VMEM_LIMIT,
        ),
    )(xp, w4, b4, w5, b5)


# ----------------------------------------------------------------------------
# Glue: patch extraction on NHWC input (strided slices + lane-axis concat).
# Feature order is (kh, kw, cin); the prepared conv weights match that order.
# ----------------------------------------------------------------------------
# TODO(synk): patch extraction still runs as XLA strided-slice/concat glue;
# fusing it into the Pallas kernel (Element BlockSpec / in-kernel strided
# loads) would remove this HBM round trip entirely.
def extract_patches(x, kh, kw, stride):
    B, H, W, C = x.shape
    Ho = (H - kh) // stride + 1
    Wo = (W - kw) // stride + 1
    cols = []
    for i in range(kh):
        for j in range(kw):
            cols.append(
                x[:, i: i + stride * (Ho - 1) + 1: stride,
                     j: j + stride * (Wo - 1) + 1: stride, :]
            )
    p = jnp.concatenate(cols, axis=-1)          # (B, Ho, Wo, kh*kw*C)
    return p.reshape(B * Ho * Wo, kh * kw * C), Ho, Wo


# ----------------------------------------------------------------------------
# Parameters (kaiming_normal_ fan_in, gain=sqrt(2); biases = 0) in PyTorch
# layout, plus a one-time preparation pass into kernel-ready layout.
# ----------------------------------------------------------------------------
def init_params(key, output_dim=5):
    ks = jax.random.split(key, 5)

    def kaiming(k, shape, fan_in):
        return jax.random.normal(k, shape, jnp.float32) * math.sqrt(2.0 / fan_in)

    return {
        "w1": kaiming(ks[0], (32, 1, 8, 8), 1 * 8 * 8),
        "b1": jnp.zeros((32,), jnp.float32),
        "w2": kaiming(ks[1], (64, 32, 4, 4), 32 * 4 * 4),
        "b2": jnp.zeros((64,), jnp.float32),
        "w3": kaiming(ks[2], (64, 64, 3, 3), 64 * 3 * 3),
        "b3": jnp.zeros((64,), jnp.float32),
        "w4": kaiming(ks[3], (512, 3136), 3136),   # PyTorch Linear layout (out, in)
        "b4": jnp.zeros((512,), jnp.float32),
        "w5": kaiming(ks[4], (output_dim, 512), 512),
        "b5": jnp.zeros((output_dim,), jnp.float32),
    }


def prepare_params(params):
    """One-time: transpose / permute / pad / cast weights to kernel layout."""
    def prep_conv(w, b):
        cout, cin, kh, kw = w.shape
        # (cout, cin, kh, kw) -> (kh, kw, cin, cout) -> (kh*kw*cin, cout)
        wm = w.transpose(2, 3, 1, 0).reshape(kh * kw * cin, cout)
        return wm.astype(jnp.bfloat16), b.reshape(1, cout).astype(jnp.float32)

    w1p, b1p = prep_conv(params["w1"], params["b1"])
    w2p, b2p = prep_conv(params["w2"], params["b2"])
    w3p, b3p = prep_conv(params["w3"], params["b3"])

    # FC1: PyTorch columns are the NCHW flatten (c, h, w); internally we flatten
    # NHWC (h, w, c) -> permute columns once here, then (K, N) transpose.
    w4 = params["w4"].reshape(512, 64, 7, 7).transpose(0, 2, 3, 1).reshape(512, 3136)
    w4p = w4.T.astype(jnp.bfloat16)                               # (3136, 512)
    b4p = params["b4"].reshape(1, 512).astype(jnp.float32)

    # FC2: pad N to 128 for a lane-dense output tile (sliced after the kernel).
    out_dim = params["w5"].shape[0]
    n5 = _round_up(out_dim, 128)
    w5p = jnp.zeros((512, n5), jnp.bfloat16).at[:, :out_dim].set(
        params["w5"].T.astype(jnp.bfloat16))
    b5p = jnp.zeros((1, n5), jnp.float32).at[0, :out_dim].set(params["b5"])

    return {"w1p": w1p, "b1p": b1p, "w2p": w2p, "b2p": b2p,
            "w3p": w3p, "b3p": b3p, "w4p": w4p, "b4p": b4p,
            "w5p": w5p, "b5p": b5p}


# ----------------------------------------------------------------------------
# Forward pass: 3 conv kernels + 1 fused FC1+FC2 kernel (4 pallas_calls total),
# activations kept in NHWC / (rows, C) bf16 the whole way.
# ----------------------------------------------------------------------------
@functools.partial(jax.jit, static_argnames=("output_dim",))
def dqn_forward(x, prep, *, output_dim=5):
    B = x.shape[0]
    y = x.transpose(0, 2, 3, 1).astype(jnp.bfloat16)              # NCHW -> NHWC

    p, Ho, Wo = extract_patches(y, 8, 8, 4)                       # (B*20*20, 64)
    y = linear_pallas(p, prep["w1p"], prep["b1p"], relu=True,
                      out_dtype=jnp.bfloat16).reshape(B, Ho, Wo, 32)

    p, Ho, Wo = extract_patches(y, 4, 4, 2)                       # (B*9*9, 512)
    y = linear_pallas(p, prep["w2p"], prep["b2p"], relu=True,
                      out_dtype=jnp.bfloat16).reshape(B, Ho, Wo, 64)

    p, Ho, Wo = extract_patches(y, 3, 3, 1)                       # (B*7*7, 576)
    y = linear_pallas(p, prep["w3p"], prep["b3p"], relu=True,
                      out_dtype=jnp.bfloat16).reshape(B, Ho * Wo * 64)  # (B, 3136)

    out = head_pallas(y, prep["w4p"], prep["b4p"], prep["w5p"], prep["b5p"])
    return out[:B, :output_dim]


# ----------------------------------------------------------------------------
# Pure-JAX f32 reference (PyTorch layout / NCHW) for the correctness check.
# ----------------------------------------------------------------------------
def dqn_forward_ref(x, params):
    def conv(x, w, b, s):
        y = jax.lax.conv_general_dilated(
            x, w, window_strides=(s, s), padding="VALID",
            dimension_numbers=("NCHW", "OIHW", "NCHW"),
        )
        return jnp.maximum(y + b[None, :, None, None], 0.0)

    B = x.shape[0]
    y = conv(x, params["w1"], params["b1"], 4)
    y = conv(y, params["w2"], params["b2"], 2)
    y = conv(y, params["w3"], params["b3"], 1)
    flat = y.reshape(B, -1)
    y = jnp.maximum(flat @ params["w4"].T + params["b4"], 0.0)
    return y @ params["w5"].T + params["b5"]


if __name__ == "__main__":
    key = jax.random.PRNGKey(0)
    pkey, xkey = jax.random.split(key)

    params = init_params(pkey, output_dim=5)
    prep = prepare_params(params)        # one-time weight layout prep
    # batch=2; spatial 84x84 is dictated by Linear(3136, 512).
    x = jax.random.normal(xkey, (2, 1, 84, 84), jnp.float32)

    out = jax.block_until_ready(dqn_forward(x, prep, output_dim=5))
    assert out.shape == (2, 5), out.shape
    assert bool(jnp.all(jnp.isfinite(out)))

    ref = jax.block_until_ready(dqn_forward_ref(x, params))
    # bf16 MXU inputs (f32 accumulation) -> ~1e-2 relative error vs f32 ref.
    assert bool(jnp.allclose(out, ref, rtol=5e-2, atol=5e-2)), (out, ref)

    print("KERNEL_OK")
</pallas_src>

<mosaic_0001>
module attributes {stable_mosaic.version = 11 : i64} {
  func.func @_matmul_bias_kernel(%arg0: i32, %arg1: memref<512x64xbf16, #tpu.memory_space<vmem>>, %arg2: memref<64x32xbf16, #tpu.memory_space<vmem>>, %arg3: memref<1x32xf32, #tpu.memory_space<vmem>>, %arg4: memref<512x32xbf16, #tpu.memory_space<vmem>>) attributes {dimension_semantics = [#tpu.dimension_semantics<parallel>], iteration_bounds = array<i64: 2>, scalar_prefetch = 0 : i64, scratch_operands = 0 : i64, tpu.core_type = #tpu.core_type<tc>, window_params = [{transform_indices = @transform_0, window_bounds = array<i64: 512, 64>}, {pipeline_mode = #tpu.pipeline_mode<synchronous>, transform_indices = @transform_1, window_bounds = array<i64: 64, 32>}, {pipeline_mode = #tpu.pipeline_mode<synchronous>, transform_indices = @transform_2, window_bounds = array<i64: 1, 32>}, {transform_indices = @transform_3, window_bounds = array<i64: 512, 32>}]} {
    %c0 = arith.constant 0 : index
    %c0_0 = arith.constant 0 : index
    %0 = vector.load %arg1[%c0, %c0_0] : memref<512x64xbf16, #tpu.memory_space<vmem>>, vector<512x64xbf16>
    %c0_1 = arith.constant 0 : index
    %c0_2 = arith.constant 0 : index
    %1 = vector.load %arg2[%c0_1, %c0_2] : memref<64x32xbf16, #tpu.memory_space<vmem>>, vector<64x32xbf16>
    %cst = arith.constant dense<0.000000e+00> : vector<512x32xf32>
    %2 = tpu.matmul %0, %1, %cst {dimension_numbers = #tpu.dot_dimension_numbers<[1], [0], [0], [1], [0, 0, 1, 1], [], []>} : vector<512x64xbf16>, vector<64x32xbf16>, vector<512x32xf32> -> vector<512x32xf32>
    %c0_3 = arith.constant 0 : index
    %c0_4 = arith.constant 0 : index
    %3 = vector.load %arg3[%c0_3, %c0_4] : memref<1x32xf32, #tpu.memory_space<vmem>>, vector<1x32xf32>
    %4 = vector.broadcast %3 : vector<1x32xf32> to vector<512x32xf32>
    %5 = arith.addf %2, %4 : vector<512x32xf32>
    %cst_5 = arith.constant 0.000000e+00 : f32
    %6 = vector.broadcast %cst_5 : f32 to vector<512x32xf32>
    %7 = arith.maximumf %5, %6 : vector<512x32xf32>
    %8 = arith.truncf %7 : vector<512x32xf32> to vector<512x32xbf16>
    %c0_6 = arith.constant 0 : index
    %c0_7 = arith.constant 0 : index
    %9 = vector.load %arg4[%c0_6, %c0_7] : memref<512x32xbf16, #tpu.memory_space<vmem>>, vector<512x32xbf16>
    tpu.vector_store %arg4[%c0_6, %c0_7], %8 {strides = array<i32>} : memref<512x32xbf16, #tpu.memory_space<vmem>>, vector<512x32xbf16>,
    return
  }
  func.func @transform_0(%arg0: i32) -> (i32, i32) {
    %c0_i32 = arith.constant 0 : i32
    %c0_i32_0 = arith.constant 0 : i32
    return %arg0, %c0_i32 : i32, i32
  }
  func.func @transform_1(%arg0: i32) -> (i32, i32) {
    %c0_i32 = arith.constant 0 : i32
    %c0_i32_0 = arith.constant 0 : i32
    %c0_i32_1 = arith.constant 0 : i32
    return %c0_i32, %c0_i32_0 : i32, i32
  }
  func.func @transform_2(%arg0: i32) -> (i32, i32) {
    %c0_i32 = arith.constant 0 : i32
    %c0_i32_0 = arith.constant 0 : i32
    %c0_i32_1 = arith.constant 0 : i32
    return %c0_i32, %c0_i32_0 : i32, i32
  }
  func.func @transform_3(%arg0: i32) -> (i32, i32) {
    %c0_i32 = arith.constant 0 : i32
    %c0_i32_0 = arith.constant 0 : i32
    return %arg0, %c0_i32 : i32, i32
  }
}

module attributes {stable_mosaic.version = 11 : i64} {
  func.func @_matmul_bias_kernel(%arg0: i32, %arg1: memref<176x512xbf16, #tpu.memory_space<vmem>>, %arg2: memref<512x64xbf16, #tpu.memory_space<vmem>>, %arg3: memref<1x64xf32, #tpu.memory_space<vmem>>, %arg4: memref<176x64xbf16, #tpu.memory_space<vmem>>) attributes {dimension_semantics = [#tpu.dimension_semantics<parallel>], iteration_bounds = array<i64: 1>, scalar_prefetch = 0 : i64, scratch_operands = 0 : i64, tpu.core_type = #tpu.core_type<tc>, window_params = [{transform_indices = @transform_0, window_bounds = array<i64: 176, 512>}, {pipeline_mode = #tpu.pipeline_mode<synchronous>, transform_indices = @transform_1, window_bounds = array<i64: 512, 64>}, {pipeline_mode = #tpu.pipeline_mode<synchronous>, transform_indices = @transform_2, window_bounds = array<i64: 1, 64>}, {transform_indices = @transform_3, window_bounds = array<i64: 176, 64>}]} {
    %c0 = arith.constant 0 : index
    %c0_0 = arith.constant 0 : index
    %0 = vector.load %arg1[%c0, %c0_0] : memref<176x512xbf16, #tpu.memory_space<vmem>>, vector<176x512xbf16>
    %c0_1 = arith.constant 0 : index
    %c0_2 = arith.constant 0 : index
    %1 = vector.load %arg2[%c0_1, %c0_2] : memref<512x64xbf16, #tpu.memory_space<vmem>>, vector<512x64xbf16>
    %cst = arith.constant dense<0.000000e+00> : vector<176x64xf32>
    %2 = tpu.matmul %0, %1, %cst {dimension_numbers = #tpu.dot_dimension_numbers<[1], [0], [0], [1], [0, 0, 1, 1], [], []>} : vector<176x512xbf16>, vector<512x64xbf16>, vector<176x64xf32> -> vector<176x64xf32>
    %c0_3 = arith.constant 0 : index
    %c0_4 = arith.constant 0 : index
    %3 = vector.load %arg3[%c0_3, %c0_4] : memref<1x64xf32, #tpu.memory_space<vmem>>, vector<1x64xf32>
    %4 = vector.broadcast %3 : vector<1x64xf32> to vector<176x64xf32>
    %5 = arith.addf %2, %4 : vector<176x64xf32>
    %cst_5 = arith.constant 0.000000e+00 : f32
    %6 = vector.broadcast %cst_5 : f32 to vector<176x64xf32>
    %7 = arith.maximumf %5, %6 : vector<176x64xf32>
    %8 = arith.truncf %7 : vector<176x64xf32> to vector<176x64xbf16>
    %c0_6 = arith.constant 0 : index
    %c0_7 = arith.constant 0 : index
    %9 = vector.load %arg4[%c0_6, %c0_7] : memref<176x64xbf16, #tpu.memory_space<vmem>>, vector<176x64xbf16>
    tpu.vector_store %arg4[%c0_6, %c0_7], %8 {strides = array<i32>} : memref<176x64xbf16, #tpu.memory_space<vmem>>, vector<176x64xbf16>,
    return
  }
  func.func @transform_0(%arg0: i32) -> (i32, i32) {
    %c0_i32 = arith.constant 0 : i32
    %c0_i32_0 = arith.constant 0 : i32
    return %arg0, %c0_i32 : i32, i32
  }
  func.func @transform_1(%arg0: i32) -> (i32, i32) {
    %c0_i32 = arith.constant 0 : i32
    %c0_i32_0 = arith.constant 0 : i32
    %c0_i32_1 = arith.constant 0 : i32
    return %c0_i32, %c0_i32_0 : i32, i32
  }
  func.func @transform_2(%arg0: i32) -> (i32, i32) {
    %c0_i32 = arith.constant 0 : i32
    %c0_i32_0 = arith.constant 0 : i32
    %c0_i32_1 = arith.constant 0 : i32
    return %c0_i32, %c0_i32_0 : i32, i32
  }
  func.func @transform_3(%arg0: i32) -> (i32, i32) {
    %c0_i32 = arith.constant 0 : i32
    %c0_i32_0 = arith.constant 0 : i32
    return %arg0, %c0_i32 : i32, i32
  }
}

module attributes {stable_mosaic.version = 11 : i64} {
  func.func @_matmul_bias_kernel(%arg0: i32, %arg1: memref<112x576xbf16, #tpu.memory_space<vmem>>, %arg2: memref<576x64xbf16, #tpu.memory_space<vmem>>, %arg3: memref<1x64xf32, #tpu.memory_space<vmem>>, %arg4: memref<112x64xbf16, #tpu.memory_space<vmem>>) attributes {dimension_semantics = [#tpu.dimension_semantics<parallel>], iteration_bounds = array<i64: 1>, scalar_prefetch = 0 : i64, scratch_operands = 0 : i64, tpu.core_type = #tpu.core_type<tc>, window_params = [{transform_indices = @transform_0, window_bounds = array<i64: 112, 576>}, {pipeline_mode = #tpu.pipeline_mode<synchronous>, transform_indices = @transform_1, window_bounds = array<i64: 576, 64>}, {pipeline_mode = #tpu.pipeline_mode<synchronous>, transform_indices = @transform_2, window_bounds = array<i64: 1, 64>}, {transform_indices = @transform_3, window_bounds = array<i64: 112, 64>}]} {
    %c0 = arith.constant 0 : index
    %c0_0 = arith.constant 0 : index
    %0 = vector.load %arg1[%c0, %c0_0] : memref<112x576xbf16, #tpu.memory_space<vmem>>, vector<112x576xbf16>
    %c0_1 = arith.constant 0 : index
    %c0_2 = arith.constant 0 : index
    %1 = vector.load %arg2[%c0_1, %c0_2] : memref<576x64xbf16, #tpu.memory_space<vmem>>, vector<576x64xbf16>
    %cst = arith.constant dense<0.000000e+00> : vector<112x64xf32>
    %2 = tpu.matmul %0, %1, %cst {dimension_numbers = #tpu.dot_dimension_numbers<[1], [0], [0], [1], [0, 0, 1, 1], [], []>} : vector<112x576xbf16>, vector<576x64xbf16>, vector<112x64xf32> -> vector<112x64xf32>
    %c0_3 = arith.constant 0 : index
    %c0_4 = arith.constant 0 : index
    %3 = vector.load %arg3[%c0_3, %c0_4] : memref<1x64xf32, #tpu.memory_space<vmem>>, vector<1x64xf32>
    %4 = vector.broadcast %3 : vector<1x64xf32> to vector<112x64xf32>
    %5 = arith.addf %2, %4 : vector<112x64xf32>
    %cst_5 = arith.constant 0.000000e+00 : f32
    %6 = vector.broadcast %cst_5 : f32 to vector<112x64xf32>
    %7 = arith.maximumf %5, %6 : vector<112x64xf32>
    %8 = arith.truncf %7 : vector<112x64xf32> to vector<112x64xbf16>
    %c0_6 = arith.constant 0 : index
    %c0_7 = arith.constant 0 : index
    %9 = vector.load %arg4[%c0_6, %c0_7] : memref<112x64xbf16, #tpu.memory_space<vmem>>, vector<112x64xbf16>
    tpu.vector_store %arg4[%c0_6, %c0_7], %8 {strides = array<i32>} : memref<112x64xbf16, #tpu.memory_space<vmem>>, vector<112x64xbf16>,
    return
  }
  func.func @transform_0(%arg0: i32) -> (i32, i32) {
    %c0_i32 = arith.constant 0 : i32
    %c0_i32_0 = arith.constant 0 : i32
    return %arg0, %c0_i32 : i32, i32
  }
  func.func @transform_1(%arg0: i32) -> (i32, i32) {
    %c0_i32 = arith.constant 0 : i32
    %c0_i32_0 = arith.constant 0 : i32
    %c0_i32_1 = arith.constant 0 : i32
    return %c0_i32, %c0_i32_0 : i32, i32
  }
  func.func @transform_2(%arg0: i32) -> (i32, i32) {
    %c0_i32 = arith.constant 0 : i32
    %c0_i32_0 = arith.constant 0 : i32
    %c0_i32_1 = arith.constant 0 : i32
    return %c0_i32, %c0_i32_0 : i32, i32
  }
  func.func @transform_3(%arg0: i32) -> (i32, i32) {
    %c0_i32 = arith.constant 0 : i32
    %c0_i32_0 = arith.constant 0 : i32
    return %arg0, %c0_i32 : i32, i32
  }
}

module attributes {stable_mosaic.version = 11 : i64} {
  func.func @_head_kernel(%arg0: i32, %arg1: memref<16x3136xbf16, #tpu.memory_space<vmem>>, %arg2: memref<3136x512xbf16, #tpu.memory_space<vmem>>, %arg3: memref<1x512xf32, #tpu.memory_space<vmem>>, %arg4: memref<512x128xbf16, #tpu.memory_space<vmem>>, %arg5: memref<1x128xf32, #tpu.memory_space<vmem>>, %arg6: memref<16x128xf32, #tpu.memory_space<vmem>>) attributes {dimension_semantics = [#tpu.dimension_semantics<parallel>], iteration_bounds = array<i64: 1>, scalar_prefetch = 0 : i64, scratch_operands = 0 : i64, tpu.core_type = #tpu.core_type<tc>, window_params = [{transform_indices = @transform_0, window_bounds = array<i64: 16, 3136>}, {pipeline_mode = #tpu.pipeline_mode<synchronous>, transform_indices = @transform_1, window_bounds = array<i64: 3136, 512>}, {pipeline_mode = #tpu.pipeline_mode<synchronous>, transform_indices = @transform_2, window_bounds = array<i64: 1, 512>}, {pipeline_mode = #tpu.pipeline_mode<synchronous>, transform_indices = @transform_3, window_bounds = array<i64: 512, 128>}, {pipeline_mode = #tpu.pipeline_mode<synchronous>, transform_indices = @transform_4, window_bounds = array<i64: 1, 128>}, {transform_indices = @transform_5, window_bounds = array<i64: 16, 128>}]} {
    %c0 = arith.constant 0 : index
    %c0_0 = arith.constant 0 : index
    %0 = vector.load %arg1[%c0, %c0_0] : memref<16x3136xbf16, #tpu.memory_space<vmem>>, vector<16x3136xbf16>
    %c0_1 = arith.constant 0 : index
    %c0_2 = arith.constant 0 : index
    %1 = vector.load %arg2[%c0_1, %c0_2] : memref<3136x512xbf16, #tpu.memory_space<vmem>>, vector<3136x512xbf16>
    %cst = arith.constant dense<0.000000e+00> : vector<16x512xf32>
    %2 = tpu.matmul %0, %1, %cst {dimension_numbers = #tpu.dot_dimension_numbers<[1], [0], [0], [1], [0, 0, 1, 1], [], []>} : vector<16x3136xbf16>, vector<3136x512xbf16>, vector<16x512xf32> -> vector<16x512xf32>
    %c0_3 = arith.constant 0 : index
    %c0_4 = arith.constant 0 : index
    %3 = vector.load %arg3[%c0_3, %c0_4] : memref<1x512xf32, #tpu.memory_space<vmem>>, vector<1x512xf32>
    %4 = vector.broadcast %3 : vector<1x512xf32> to vector<16x512xf32>
    %5 = arith.addf %2, %4 : vector<16x512xf32>
    %cst_5 = arith.constant 0.000000e+00 : f32
    %6 = vector.broadcast %cst_5 : f32 to vector<16x512xf32>
    %7 = arith.maximumf %5, %6 : vector<16x512xf32>
    %8 = arith.truncf %7 : vector<16x512xf32> to vector<16x512xbf16>
    %c0_6 = arith.constant 0 : index
    %c0_7 = arith.constant 0 : index
    %9 = vector.load %arg4[%c0_6, %c0_7] : memref<512x128xbf16, #tpu.memory_space<vmem>>, vector<512x128xbf16>
    %cst_8 = arith.constant dense<0.000000e+00> : vector<16x128xf32>
    %10 = tpu.matmul %8, %9, %cst_8 {dimension_numbers = #tpu.dot_dimension_numbers<[1], [0], [0], [1], [0, 0, 1, 1], [], []>} : vector<16x512xbf16>, vector<512x128xbf16>, vector<16x128xf32> -> vector<16x128xf32>
    %c0_9 = arith.constant 0 : index
    %c0_10 = arith.constant 0 : index
    %11 = vector.load %arg5[%c0_9, %c0_10] : memref<1x128xf32, #tpu.memory_space<vmem>>, vector<1x128xf32>
    %12 = vector.broadcast %11 : vector<1x128xf32> to vector<16x128xf32>
    %13 = arith.addf %10, %12 : vector<16x128xf32>
    %c0_11 = arith.constant 0 : index
    %c0_12 = arith.constant 0 : index
    %14 = vector.load %arg6[%c0_11, %c0_12] : memref<16x128xf32, #tpu.memory_space<vmem>>, vector<16x128xf32>
    tpu.vector_store %arg6[%c0_11, %c0_12], %13 {strides = array<i32>} : memref<16x128xf32, #tpu.memory_space<vmem>>, vector<16x128xf32>,
    return
  }
  func.func @transform_0(%arg0: i32) -> (i32, i32) {
    %c0_i32 = arith.constant 0 : i32
    %c0_i32_0 = arith.constant 0 : i32
    return %arg0, %c0_i32 : i32, i32
  }
  func.func @transform_1(%arg0: i32) -> (i32, i32) {
    %c0_i32 = arith.constant 0 : i32
    %c0_i32_0 = arith.constant 0 : i32
    %c0_i32_1 = arith.constant 0 : i32
    return %c0_i32, %c0_i32_0 : i32, i32
  }
  func.func @transform_2(%arg0: i32) -> (i32, i32) {
    %c0_i32 = arith.constant 0 : i32
    %c0_i32_0 = arith.constant 0 : i32
    %c0_i32_1 = arith.constant 0 : i32
    return %c0_i32, %c0_i32_0 : i32, i32
  }
  func.func @transform_3(%arg0: i32) -> (i32, i32) {
    %c0_i32 = arith.constant 0 : i32
    %c0_i32_0 = arith.constant 0 : i32
    %c0_i32_1 = arith.constant 0 : i32
    return %c0_i32, %c0_i32_0 : i32, i32
  }
  func.func @transform_4(%arg0: i32) -> (i32, i32) {
    %c0_i32 = arith.constant 0 : i32
    %c0_i32_0 = arith.constant 0 : i32
    %c0_i32_1 = arith.constant 0 : i32
    return %c0_i32, %c0_i32_0 : i32, i32
  }
  func.func @transform_5(%arg0: i32) -> (i32, i32) {
    %c0_i32 = arith.constant 0 : i32
    %c0_i32_0 = arith.constant 0 : i32
    return %arg0, %c0_i32 : i32, i32
  }
}

</mosaic_0001>

<bundles_post_ra>
// kernel: dqn_forward.4
= control target key start
LH: loop header
LB: loop body
LE: loop exit
PB: predicated region body
PF: predicated region fallthrough
CT: control target
= control target key end

     0   :  { %s1661_s12 = smov 0   ;;  %s1962_s0 = inlined_call_operand.vmem [shape: bf16[1024,64], index: 0, kind: input, shape index: {}]   ;;  %s1963_s1 = inlined_call_operand.vmem [shape: bf16[64,32], index: 1, kind: input, shape index: {}]   ;;  %s1964_s2 = inlined_call_operand.vmem [shape: f32[1,32], index: 2, kind: input, shape index: {}]   ;;  %s1965_s3 = inlined_call_operand.vmem [shape: bf16[1024,32], index: 3, kind: output, shape index: {}]  }
   0x1 LB: > { %s1265_s13 = sadd.s32 4294967295, %s1639_s12   ;;  %p1269_p0 = scmp.ge.s32.totalorder %s1639_s12, 1  ;;  %s1639_s12 = sphi %s1661_s12, %s13_s12  }
   0x2   : > { %p138_p1 = scmp.lt.s32.totalorder %s1639_s12, 3 }
   0x4   : > { %p139_p2 = pnand %p1269_p0, %p138_p1 }
   0x5   : > { %s1270_s16 = sshll.u32 (!%p139_p2), %s1265_s13, 6 }
   0x6   : > { %142 = sbr.rel (%p139_p2) target bundleno = 290 (0x122), region = 32  ;;  %p163_p3 = scmp.lt.s32.totalorder (!%p139_p2), %s1270_s16, 127 }
   0xb   : > { %v1597_v0 = vld [vmem:[%s1963_s1 + $0x18] sm:$0xff]   ;;  %v1598_v1 = vld [vmem:[%s1963_s1 + $0x10] sm:$0xff]   ;;  %s1967_s16 = smov (!%p163_p3, %s1270_s16), 127  ;;  %v1599_v2 = vld [vmem:[%s1963_s1 + $0x8] sm:$0xff]   ;;  %vm438_vm0 = vcmask 523264   ;;  %vm1144_vm1 = vcmask 257024  }
   0xc   : > { %1509 = vmatprep.subr.bf16.mxu0 %v1597_v0  ;;  %1581 = vmatprep.subr.bf16.mxu1 %v1597_v0  ;;  %s1271_s21 = sshll.u32 %s1967_s16, 2  ;;  %v1600_v3 = vld [vmem:[%s1963_s1] sm:$0xff]  }
   0xd   : > { %1510 = vmatpush3.bf16.msra.mxu0 %v1597_v0  ;;  %1585 = vmatpush3.bf16.msra.mxu1 %v1597_v0  ;;  %s1689_s26 = scalar_lea.vmem %s1962_s0, %s1271_s21  ;;  %v1758_v36 = vld [vmem:[%s1964_s2] ss:$0 sm:$0xff]  ;;  %s1769_s4 = scalar_lea.vmem %s1965_s3, %s1271_s21 }
   0xe   : > { %1511 = vmatprep.subr.bf16.mxu0 %v1598_v1  ;;  %1582 = vmatprep.subr.bf16.mxu1 %v1598_v1  ;;  %v1601_v4 = vld [vmem:[%s1689_s26] sm:$0xff]   ;;  %v1603_v6 = vld [vmem:[%s1689_s26 + $0x8] sm:$0xff]   ;;  %v1605_v8 = vld [vmem:[%s1689_s26 + $0x10] sm:$0xff]  }
   0xf   : > { %v1602_v5 = vld [vmem:[%s1689_s26 + $0x80] sm:$0xff]   ;;  %1517 = vmatprep.mubr.msk.bf16.mxu0 %vm438_vm0, %v1601_v4  ;;  %v1604_v7 = vld [vmem:[%s1689_s26 + $0x88] sm:$0xff]   ;;  %v1606_v9 = vld [vmem:[%s1689_s26 + $0x90] sm:$0xff]  }
  0x10   : > { %1549 = vmatprep.mubr.msk.bf16.mxu1 %vm438_vm0, %v1602_v5  ;;  %v1607_v10 = vld [vmem:[%s1689_s26 + $0x18] sm:$0xff]   ;;  %v1609_v12 = vld [vmem:[%s1689_s26 + $0x20] sm:$0xff]   ;;  %v1611_v14 = vld [vmem:[%s1689_s26 + $0x28] sm:$0xff]  }
  0x11   : > { %1512 = vmatpush3.bf16.msra.mxu0 %v1598_v1  ;;  %1586 = vmatpush3.bf16.msra.mxu1 %v1598_v1  ;;  %v1608_v11 = vld [vmem:[%s1689_s26 + $0x98] sm:$0xff]   ;;  %v1610_v13 = vld [vmem:[%s1689_s26 + $0xa0] sm:$0xff]   ;;  %v1612_v15 = vld [vmem:[%s1689_s26 + $0xa8] sm:$0xff]  }
  0x12   : > { %1513 = vmatprep.subr.bf16.mxu0 %v1599_v2  ;;  %1583 = vmatprep.subr.bf16.mxu1 %v1599_v2  ;;  %v1613_v16 = vld [vmem:[%s1689_s26 + $0x30] sm:$0xff]   ;;  %v1615_v18 = vld [vmem:[%s1689_s26 + $0x38] sm:$0xff]   ;;  %v1617_v20 = vld [vmem:[%s1689_s26 + $0x40] sm:$0xff]  }
  0x13   : > { %v1614_v17 = vld [vmem:[%s1689_s26 + $0xb0] sm:$0xff]   ;;  %v1616_v19 = vld [vmem:[%s1689_s26 + $0xb8] sm:$0xff]   ;;  %v1618_v21 = vld [vmem:[%s1689_s26 + $0xc0] sm:$0xff]  }
  0x14   : > { %v1619_v22 = vld [vmem:[%s1689_s26 + $0x48] sm:$0xff]   ;;  %v1621_v24 = vld [vmem:[%s1689_s26 + $0x50] sm:$0xff]   ;;  %v1623_v26 = vld [vmem:[%s1689_s26 + $0x58] sm:$0xff]  }
  0x15   : > { %1514 = vmatpush3.bf16.msra.mxu0 %v1599_v2  ;;  %1587 = vmatpush3.bf16.msra.mxu1 %v1599_v2  ;;  %v1620_v23 = vld [vmem:[%s1689_s26 + $0xc8] sm:$0xff]   ;;  %v1622_v25 = vld [vmem:[%s1689_s26 + $0xd0] sm:$0xff]   ;;  %v1624_v27 = vld [vmem:[%s1689_s26 + $0xd8] sm:$0xff]  }
  0x16   : > { %1515 = vmatprep.subr.bf16.mxu0 %v1600_v3  ;;  %1584 = vmatprep.subr.bf16.mxu1 %v1600_v3  ;;  %v1625_v28 = vld [vmem:[%s1689_s26 + $0x60] sm:$0xff]   ;;  %v1627_v30 = vld [vmem:[%s1689_s26 + $0x68] sm:$0xff]   ;;  %v1629_v32 = vld [vmem:[%s1689_s26 + $0x70] sm:$0xff]  }
  0x17   : > { %v1626_v29 = vld [vmem:[%s1689_s26 + $0xe0] sm:$0xff]   ;;  %v1628_v31 = vld [vmem:[%s1689_s26 + $0xe8] sm:$0xff]   ;;  %v1630_v33 = vld [vmem:[%s1689_s26 + $0xf0] sm:$0xff]  }
  0x18   : > { %v1631_v34 = vld [vmem:[%s1689_s26 + $0x78] sm:$0xff]  }
  0x19   : > { %1516 = vmatpush3.bf16.msra.mxu0 %v1600_v3  ;;  %1588 = vmatpush3.bf16.msra.mxu1 %v1600_v3  ;;  %v1632_v35 = vld [vmem:[%s1689_s26 + $0xf8] sm:$0xff]  }
  0x1c   : > { %1518 = vmatmul.mubr.msk.bf16.vlgmr.msra.gmra.mxu0 %vm438_vm0, %v1603_v6  ;;  %1550 = vmatmul.mubr.msk.bf16.vlgmr.msra.gmra.mxu1 %vm438_vm0, %v1604_v7 }
  0x1d   : > { %1521 = vmatprep.mubr.msk.bf16.mxu0 %vm438_vm0, %v1605_v8  ;;  %1553 = vmatprep.mubr.msk.bf16.mxu1 %vm438_vm0, %v1606_v9 }
  0x24   : > { %1522 = vmatmul.mubr.msk.bf16.gmra.mxu0 %vm438_vm0, %v1607_v10  ;;  %1554 = vmatmul.mubr.msk.bf16.gmra.mxu1 %vm438_vm0, %v1608_v11 }
  0x25   : > { %1525 = vmatprep.mubr.msk.bf16.mxu0 %vm438_vm0, %v1609_v12  ;;  %1557 = vmatprep.mubr.msk.bf16.mxu1 %vm438_vm0, %v1610_v13 }
  0x2c   : > { %1526 = vmatmul.mubr.msk.bf16.gmra.mxu0 %vm438_vm0, %v1611_v14  ;;  %1558 = vmatmul.mubr.msk.bf16.gmra.mxu1 %vm438_vm0, %v1612_v15 }
  0x2d   : > { %1529 = vmatprep.mubr.msk.bf16.mxu0 %vm438_vm0, %v1613_v16  ;;  %1561 = vmatprep.mubr.msk.bf16.mxu1 %vm438_vm0, %v1614_v17 }
  0x34   : > { %1530 = vmatmul.mubr.msk.bf16.gmra.mxu0 %vm438_vm0, %v1615_v18  ;;  %1562 = vmatmul.mubr.msk.bf16.gmra.mxu1 %vm438_vm0, %v1616_v19 }
  0x35   : > { %1533 = vmatprep.mubr.msk.bf16.mxu0 %vm438_vm0, %v1617_v20  ;;  %1565 = vmatprep.mubr.msk.bf16.mxu1 %vm438_vm0, %v1618_v21 }
  0x3c   : > { %1534 = vmatmul.mubr.msk.bf16.gmra.mxu0 %vm438_vm0, %v1619_v22  ;;  %1566 = vmatmul.mubr.msk.bf16.gmra.mxu1 %vm438_vm0, %v1620_v23 }
  0x3d   : > { %1537 = vmatprep.mubr.msk.bf16.mxu0 %vm438_vm0, %v1621_v24  ;;  %1569 = vmatprep.mubr.msk.bf16.mxu1 %vm438_vm0, %v1622_v25 }
  0x44   : > { %1538 = vmatmul.mubr.msk.bf16.gmra.mxu0 %vm438_vm0, %v1623_v26  ;;  %1570 = vmatmul.mubr.msk.bf16.gmra.mxu1 %vm438_vm0, %v1624_v27 }
  0x45   : > { %1541 = vmatprep.mubr.msk.bf16.mxu0 %vm438_vm0, %v1625_v28  ;;  %1573 = vmatprep.mubr.msk.bf16.mxu1 %vm438_vm0, %v1626_v29 }
  0x4c   : > { %1542 = vmatmul.mubr.msk.bf16.gmra.mxu0 %vm438_vm0, %v1627_v30  ;;  %1574 = vmatmul.mubr.msk.bf16.gmra.mxu1 %vm438_vm0, %v1628_v31 }
  0x4d   : > { %1545 = vmatprep.mubr.msk.bf16.mxu0 %vm438_vm0, %v1629_v32  ;;  %1577 = vmatprep.mubr.msk.bf16.mxu1 %vm438_vm0, %v1630_v33 }
  0x54   : > { %1546 = vmatmul.mubr.msk.bf16.gmra.mxu0 %vm438_vm0, %v1631_v34  ;;  %1578 = vmatmul.mubr.msk.bf16.gmra.mxu1 %vm438_vm0, %v1632_v35 }
  0xdc   : > { %v1519_v37 = vpop.f32.mrf.mxu0  ;;  %v1551_v38 = vpop.f32.mrf.mxu1 }
  0xdd   : > { %v578_v39 = vadd.f32 %v1519_v37, %v1758_v36  ;;  %v706_v40 = vadd.f32 %v1551_v38, %v1758_v36 }
  0xde   : > { %v569_v41 = vpop.f32.mrf.mxu0  ;;  %v697_v42 = vpop.f32.mrf.mxu1 }
  0xdf   : > { %v826_v43 = vmax.f32 %v578_v39, 0.0  ;;  %v858_v44 = vmax.f32 %v706_v40, 0.0  ;;  %v570_v45 = vadd.f32 %v1758_v36, %v569_v41  ;;  %v698_v46 = vadd.f32 %v1758_v36, %v697_v42 }
  0xe0   : > { %v1520_v47 = vpop.f32.mrf.mxu0  ;;  %v1552_v48 = vpop.f32.mrf.mxu1 }
  0xe1   : > { %v1411_v49 = vpack.c.bf16 %v826_v43, %v826_v43  ;;  %v1443_v50 = vpack.c.bf16 %v858_v44, %v858_v44  ;;  %v824_v51 = vmax.f32 %v570_v45, 0.0  ;;  %v856_v52 = vmax.f32 %v698_v46, 0.0 }
  0xe2   : > { %v581_v53 = vadd.f32 %v1520_v47, %v1758_v36  ;;  %v709_v54 = vadd.f32 %v1552_v48, %v1758_v36  ;;  %v572_v55 = vpop.f32.mrf.mxu0  ;;  %v700_v56 = vpop.f32.mrf.mxu1 }
  0xe3   : > { %1147 = vst.msk [vmem:[%s1769_s4 + $0x8] sm:$0xf] %vm1144_vm1, %v1411_v49  ;;  %1179 = vst.msk [vmem:[%s1769_s4 + $0x88] sm:$0xf] %vm1144_vm1, %v1443_v50  ;;  %v1409_v57 = vpack.c.bf16 %v824_v51, %v824_v51  ;;  %v1441_v58 = vpack.c.bf16 %v856_v52, %v856_v52  ;;  %v573_v59 = vadd.f32 %v1758_v36, %v572_v55 }
  0xe4   : > { %v701_v60 = vadd.f32 %v1758_v36, %v700_v56  ;;  %v827_v61 = vmax.f32 %v581_v53, 0.0  ;;  %v859_v62 = vmax.f32 %v709_v54, 0.0  ;;  %v1523_v63 = vpop.f32.mrf.mxu0  ;;  %v1555_v0 = vpop.f32.mrf.mxu1 }
  0xe5   : > { %1145 = vst.msk [vmem:[%s1769_s4] sm:$0xf] %vm1144_vm1, %v1409_v57  ;;  %1177 = vst.msk [vmem:[%s1769_s4 + $0x80] sm:$0xf] %vm1144_vm1, %v1441_v58  ;;  %v825_v1 = vmax.f32 %v573_v59, 0.0  ;;  %v594_v3 = vadd.f32 %v1523_v63, %v1758_v36  ;;  %v722_v4 = vadd.f32 %v1555_v0, %v1758_v36 }
  0xe6   : > { %v857_v2 = vmax.f32 %v701_v60, 0.0  ;;  %v1412_v5 = vpack.c.bf16 %v827_v61, %v827_v61  ;;  %v1444_v6 = vpack.c.bf16 %v859_v62, %v859_v62  ;;  %v585_v7 = vpop.f32.mrf.mxu0  ;;  %v713_v8 = vpop.f32.mrf.mxu1 }
  0xe7   : > { %v1410_v9 = vpack.c.bf16 %v825_v1, %v825_v1  ;;  %v830_v11 = vmax.f32 %v594_v3, 0.0  ;;  %v862_v12 = vmax.f32 %v722_v4, 0.0  ;;  %v586_v13 = vadd.f32 %v1758_v36, %v585_v7 }
  0xe8   : > { %v1442_v10 = vpack.c.bf16 %v857_v2, %v857_v2  ;;  %1148 = vst.msk [vmem:[%s1769_s4 + $0xc] sm:$0xf] %vm1144_vm1, %v1412_v5  ;;  %1180 = vst.msk [vmem:[%s1769_s4 + $0x8c] sm:$0xf] %vm1144_vm1, %v1444_v6  ;;  %v714_v14 = vadd.f32 %v1758_v36, %v713_v8  ;;  %v1524_v15 = vpop.f32.mrf.mxu0  ;;  %v1556_v16 = vpop.f32.mrf.mxu1 }
  0xe9   : > { %1146 = vst.msk [vmem:[%s1769_s4 + $0x4] sm:$0xf] %vm1144_vm1, %v1410_v9  ;;  %v1415_v17 = vpack.c.bf16 %v830_v11, %v830_v11  ;;  %v1447_v18 = vpack.c.bf16 %v862_v12, %v862_v12  ;;  %v597_v19 = vadd.f32 %v1524_v15, %v1758_v36  ;;  %v725_v20 = vadd.f32 %v1556_v16, %v1758_v36 }
  0xea   : > { %1178 = vst.msk [vmem:[%s1769_s4 + $0x84] sm:$0xf] %vm1144_vm1, %v1442_v10  ;;  %v828_v21 = vmax.f32 %v586_v13, 0.0  ;;  %v860_v22 = vmax.f32 %v714_v14, 0.0  ;;  %v588_v23 = vpop.f32.mrf.mxu0  ;;  %v716_v24 = vpop.f32.mrf.mxu1 }
  0xeb   : > { %1151 = vst.msk [vmem:[%s1769_s4 + $0x18] sm:$0xf] %vm1144_vm1, %v1415_v17  ;;  %1183 = vst.msk [vmem:[%s1769_s4 + $0x98] sm:$0xf] %vm1144_vm1, %v1447_v18  ;;  %v831_v25 = vmax.f32 %v597_v19, 0.0  ;;  %v863_v26 = vmax.f32 %v725_v20, 0.0  ;;  %v589_v27 = vadd.f32 %v1758_v36, %v588_v23  ;;  %v717_v28 = vadd.f32 %v1758_v36, %v716_v24 }
  0xec   : > { %v1413_v29 = vpack.c.bf16 %v828_v21, %v828_v21  ;;  %v1445_v30 = vpack.c.bf16 %v860_v22, %v860_v22  ;;  %v1527_v31 = vpop.f32.mrf.mxu0  ;;  %v1559_v32 = vpop.f32.mrf.mxu1 }
  0xed   : > { %v1416_v33 = vpack.c.bf16 %v831_v25, %v831_v25  ;;  %v1448_v34 = vpack.c.bf16 %v863_v26, %v863_v26  ;;  %v829_v35 = vmax.f32 %v589_v27, 0.0  ;;  %v861_v37 = vmax.f32 %v717_v28, 0.0 }
  0xee   : > { %1149 = vst.msk [vmem:[%s1769_s4 + $0x10] sm:$0xf] %vm1144_vm1, %v1413_v29  ;;  %1181 = vst.msk [vmem:[%s1769_s4 + $0x90] sm:$0xf] %vm1144_vm1, %v1445_v30  ;;  %v610_v38 = vadd.f32 %v1527_v31, %v1758_v36  ;;  %v738_v39 = vadd.f32 %v1559_v32, %v1758_v36  ;;  %v601_v40 = vpop.f32.mrf.mxu0  ;;  %v729_v41 = vpop.f32.mrf.mxu1 }
  0xef   : > { %1152 = vst.msk [vmem:[%s1769_s4 + $0x1c] sm:$0xf] %vm1144_vm1, %v1416_v33  ;;  %1184 = vst.msk [vmem:[%s1769_s4 + $0x9c] sm:$0xf] %vm1144_vm1, %v1448_v34  ;;  %v1414_v42 = vpack.c.bf16 %v829_v35, %v829_v35  ;;  %v1446_v43 = vpack.c.bf16 %v861_v37, %v861_v37  ;;  %v602_v44 = vadd.f32 %v1758_v36, %v601_v40 }
  0xf0   : > { %v730_v45 = vadd.f32 %v1758_v36, %v729_v41  ;;  %v834_v46 = vmax.f32 %v610_v38, 0.0  ;;  %v866_v47 = vmax.f32 %v738_v39, 0.0  ;;  %v1528_v48 = vpop.f32.mrf.mxu0  ;;  %v1560_v49 = vpop.f32.mrf.mxu1 }
  0xf1   : > { %1150 = vst.msk [vmem:[%s1769_s4 + $0x14] sm:$0xf] %vm1144_vm1, %v1414_v42  ;;  %1182 = vst.msk [vmem:[%s1769_s4 + $0x94] sm:$0xf] %vm1144_vm1, %v1446_v43  ;;  %v832_v50 = vmax.f32 %v602_v44, 0.0  ;;  %v613_v52 = vadd.f32 %v1528_v48, %v1758_v36  ;;  %v741_v53 = vadd.f32 %v1560_v49, %v1758_v36 }
  0xf2   : > { %v864_v51 = vmax.f32 %v730_v45, 0.0  ;;  %v1419_v54 = vpack.c.bf16 %v834_v46, %v834_v46  ;;  %v1451_v55 = vpack.c.bf16 %v866_v47, %v866_v47  ;;  %v604_v56 = vpop.f32.mrf.mxu0  ;;  %v732_v57 = vpop.f32.mrf.mxu1 }
  0xf3   : > { %v1417_v58 = vpack.c.bf16 %v832_v50, %v832_v50  ;;  %v835_v60 = vmax.f32 %v613_v52, 0.0  ;;  %v867_v61 = vmax.f32 %v741_v53, 0.0  ;;  %v605_v62 = vadd.f32 %v1758_v36, %v604_v56 }
  0xf4   : > { %v1449_v59 = vpack.c.bf16 %v864_v51, %v864_v51  ;;  %1155 = vst.msk [vmem:[%s1769_s4 + $0x28] sm:$0xf] %vm1144_vm1, %v1419_v54  ;;  %1187 = vst.msk [vmem:[%s1769_s4 + $0xa8] sm:$0xf] %vm1144_vm1, %v1451_v55  ;;  %v733_v63 = vadd.f32 %v1758_v36, %v732_v57  ;;  %v1531_v0 = vpop.f32.mrf.mxu0  ;;  %v1563_v1 = vpop.f32.mrf.mxu1 }
  0xf5   : > { %1153 = vst.msk [vmem:[%s1769_s4 + $0x20] sm:$0xf] %vm1144_vm1, %v1417_v58  ;;  %v1420_v2 = vpack.c.bf16 %v835_v60, %v835_v60  ;;  %v1452_v3 = vpack.c.bf16 %v867_v61, %v867_v61  ;;  %v626_v4 = vadd.f32 %v1531_v0, %v1758_v36  ;;  %v754_v5 = vadd.f32 %v1563_v1, %v1758_v36 }
  0xf6   : > { %1185 = vst.msk [vmem:[%s1769_s4 + $0xa0] sm:$0xf] %vm1144_vm1, %v1449_v59  ;;  %v833_v6 = vmax.f32 %v605_v62, 0.0  ;;  %v865_v7 = vmax.f32 %v733_v63, 0.0  ;;  %v617_v8 = vpop.f32.mrf.mxu0  ;;  %v745_v9 = vpop.f32.mrf.mxu1 }
  0xf7   : > { %1156 = vst.msk [vmem:[%s1769_s4 + $0x2c] sm:$0xf] %vm1144_vm1, %v1420_v2  ;;  %1188 = vst.msk [vmem:[%s1769_s4 + $0xac] sm:$0xf] %vm1144_vm1, %v1452_v3  ;;  %v838_v10 = vmax.f32 %v626_v4, 0.0  ;;  %v870_v11 = vmax.f32 %v754_v5, 0.0  ;;  %v618_v12 = vadd.f32 %v1758_v36, %v617_v8  ;;  %v746_v13 = vadd.f32 %v1758_v36, %v745_v9 }
  0xf8   : > { %v1418_v14 = vpack.c.bf16 %v833_v6, %v833_v6  ;;  %v1450_v15 = vpack.c.bf16 %v865_v7, %v865_v7  ;;  %v1532_v16 = vpop.f32.mrf.mxu0  ;;  %v1564_v17 = vpop.f32.mrf.mxu1 }
  0xf9   : > { %v1423_v18 = vpack.c.bf16 %v838_v10, %v838_v10  ;;  %v1455_v19 = vpack.c.bf16 %v870_v11, %v870_v11  ;;  %v836_v20 = vmax.f32 %v618_v12, 0.0  ;;  %v868_v21 = vmax.f32 %v746_v13, 0.0 }
  0xfa   : > { %1154 = vst.msk [vmem:[%s1769_s4 + $0x24] sm:$0xf] %vm1144_vm1, %v1418_v14  ;;  %1186 = vst.msk [vmem:[%s1769_s4 + $0xa4] sm:$0xf] %vm1144_vm1, %v1450_v15  ;;  %v629_v22 = vadd.f32 %v1532_v16, %v1758_v36  ;;  %v757_v23 = vadd.f32 %v1564_v17, %v1758_v36  ;;  %v620_v24 = vpop.f32.mrf.mxu0  ;;  %v748_v25 = vpop.f32.mrf.mxu1 }
  0xfb   : > { %1159 = vst.msk [vmem:[%s1769_s4 + $0x38] sm:$0xf] %vm1144_vm1, %v1423_v18  ;;  %1191 = vst.msk [vmem:[%s1769_s4 + $0xb8] sm:$0xf] %vm1144_vm1, %v1455_v19  ;;  %v1421_v26 = vpack.c.bf16 %v836_v20, %v836_v20  ;;  %v1453_v27 = vpack.c.bf16 %v868_v21, %v868_v21  ;;  %v621_v28 = vadd.f32 %v1758_v36, %v620_v24 }
  0xfc   : > { %v749_v29 = vadd.f32 %v1758_v36, %v748_v25  ;;  %v839_v30 = vmax.f32 %v629_v22, 0.0  ;;  %v871_v31 = vmax.f32 %v757_v23, 0.0  ;;  %v1535_v32 = vpop.f32.mrf.mxu0  ;;  %v1567_v33 = vpop.f32.mrf.mxu1 }
  0xfd   : > { %1157 = vst.msk [vmem:[%s1769_s4 + $0x30] sm:$0xf] %vm1144_vm1, %v1421_v26  ;;  %1189 = vst.msk [vmem:[%s1769_s4 + $0xb0] sm:$0xf] %vm1144_vm1, %v1453_v27  ;;  %v837_v34 = vmax.f32 %v621_v28, 0.0  ;;  %v642_v37 = vadd.f32 %v1535_v32, %v1758_v36  ;;  %v770_v38 = vadd.f32 %v1567_v33, %v1758_v36 }
  0xfe   : > { %v869_v35 = vmax.f32 %v749_v29, 0.0  ;;  %v1424_v39 = vpack.c.bf16 %v839_v30, %v839_v30  ;;  %v1456_v40 = vpack.c.bf16 %v871_v31, %v871_v31  ;;  %v633_v41 = vpop.f32.mrf.mxu0  ;;  %v761_v42 = vpop.f32.mrf.mxu1 }
  0xff   : > { %v1422_v43 = vpack.c.bf16 %v837_v34, %v837_v34  ;;  %v842_v45 = vmax.f32 %v642_v37, 0.0  ;;  %v874_v46 = vmax.f32 %v770_v38, 0.0  ;;  %v634_v47 = vadd.f32 %v1758_v36, %v633_v41 }
 0x100   : > { %v1454_v44 = vpack.c.bf16 %v869_v35, %v869_v35  ;;  %1160 = vst.msk [vmem:[%s1769_s4 + $0x3c] sm:$0xf] %vm1144_vm1, %v1424_v39  ;;  %1192 = vst.msk [vmem:[%s1769_s4 + $0xbc] sm:$0xf] %vm1144_vm1, %v1456_v40  ;;  %v762_v48 = vadd.f32 %v1758_v36, %v761_v42  ;;  %v1536_v49 = vpop.f32.mrf.mxu0  ;;  %v1568_v50 = vpop.f32.mrf.mxu1 }
 0x101   : > { %1158 = vst.msk [vmem:[%s1769_s4 + $0x34] sm:$0xf] %vm1144_vm1, %v1422_v43  ;;  %v1427_v51 = vpack.c.bf16 %v842_v45, %v842_v45  ;;  %v1459_v52 = vpack.c.bf16 %v874_v46, %v874_v46  ;;  %v645_v53 = vadd.f32 %v1536_v49, %v1758_v36  ;;  %v773_v54 = vadd.f32 %v1568_v50, %v1758_v36 }
 0x102   : > { %1190 = vst.msk [vmem:[%s1769_s4 + $0xb4] sm:$0xf] %vm1144_vm1, %v1454_v44  ;;  %v840_v55 = vmax.f32 %v634_v47, 0.0  ;;  %v872_v56 = vmax.f32 %v762_v48, 0.0  ;;  %v636_v57 = vpop.f32.mrf.mxu0  ;;  %v764_v58 = vpop.f32.mrf.mxu1 }
 0x103   : > { %1163 = vst.msk [vmem:[%s1769_s4 + $0x48] sm:$0xf] %vm1144_vm1, %v1427_v51  ;;  %1195 = vst.msk [vmem:[%s1769_s4 + $0xc8] sm:$0xf] %vm1144_vm1, %v1459_v52  ;;  %v843_v59 = vmax.f32 %v645_v53, 0.0  ;;  %v875_v60 = vmax.f32 %v773_v54, 0.0  ;;  %v637_v61 = vadd.f32 %v1758_v36, %v636_v57  ;;  %v765_v62 = vadd.f32 %v1758_v36, %v764_v58 }
 0x104   : > { %v1425_v63 = vpack.c.bf16 %v840_v55, %v840_v55  ;;  %v1457_v0 = vpack.c.bf16 %v872_v56, %v872_v56  ;;  %v1539_v1 = vpop.f32.mrf.mxu0  ;;  %v1571_v2 = vpop.f32.mrf.mxu1 }
 0x105   : > { %v1428_v3 = vpack.c.bf16 %v843_v59, %v843_v59  ;;  %v1460_v4 = vpack.c.bf16 %v875_v60, %v875_v60  ;;  %v841_v5 = vmax.f32 %v637_v61, 0.0  ;;  %v873_v6 = vmax.f32 %v765_v62, 0.0 }
 0x106   : > { %1161 = vst.msk [vmem:[%s1769_s4 + $0x40] sm:$0xf] %vm1144_vm1, %v1425_v63  ;;  %1193 = vst.msk [vmem:[%s1769_s4 + $0xc0] sm:$0xf] %vm1144_vm1, %v1457_v0  ;;  %v658_v7 = vadd.f32 %v1539_v1, %v1758_v36  ;;  %v786_v8 = vadd.f32 %v1571_v2, %v1758_v36  ;;  %v649_v9 = vpop.f32.mrf.mxu0  ;;  %v777_v10 = vpop.f32.mrf.mxu1 }
 0x107   : > { %1164 = vst.msk [vmem:[%s1769_s4 + $0x4c] sm:$0xf] %vm1144_vm1, %v1428_v3  ;;  %1196 = vst.msk [vmem:[%s1769_s4 + $0xcc] sm:$0xf] %vm1144_vm1, %v1460_v4  ;;  %v1426_v11 = vpack.c.bf16 %v841_v5, %v841_v5  ;;  %v1458_v12 = vpack.c.bf16 %v873_v6, %v873_v6  ;;  %v650_v13 = vadd.f32 %v1758_v36, %v649_v9 }
 0x108   : > { %v778_v14 = vadd.f32 %v1758_v36, %v777_v10  ;;  %v846_v15 = vmax.f32 %v658_v7, 0.0  ;;  %v878_v16 = vmax.f32 %v786_v8, 0.0  ;;  %v1540_v17 = vpop.f32.mrf.mxu0  ;;  %v1572_v18 = vpop.f32.mrf.mxu1 }
 0x109   : > { %1162 = vst.msk [vmem:[%s1769_s4 + $0x44] sm:$0xf] %vm1144_vm1, %v1426_v11  ;;  %1194 = vst.msk [vmem:[%s1769_s4 + $0xc4] sm:$0xf] %vm1144_vm1, %v1458_v12  ;;  %v844_v19 = vmax.f32 %v650_v13, 0.0  ;;  %v661_v21 = vadd.f32 %v1540_v17, %v1758_v36  ;;  %v789_v22 = vadd.f32 %v1572_v18, %v1758_v36 }
 0x10a   : > { %v876_v20 = vmax.f32 %v778_v14, 0.0  ;;  %v1431_v23 = vpack.c.bf16 %v846_v15, %v846_v15  ;;  %v1463_v24 = vpack.c.bf16 %v878_v16, %v878_v16  ;;  %v652_v25 = vpop.f32.mrf.mxu0  ;;  %v780_v26 = vpop.f32.mrf.mxu1 }
 0x10b   : > { %v1429_v27 = vpack.c.bf16 %v844_v19, %v844_v19  ;;  %v847_v29 = vmax.f32 %v661_v21, 0.0  ;;  %v879_v30 = vmax.f32 %v789_v22, 0.0  ;;  %v653_v31 = vadd.f32 %v1758_v36, %v652_v25 }
 0x10c   : > { %v1461_v28 = vpack.c.bf16 %v876_v20, %v876_v20  ;;  %1167 = vst.msk [vmem:[%s1769_s4 + $0x58] sm:$0xf] %vm1144_vm1, %v1431_v23  ;;  %1199 = vst.msk [vmem:[%s1769_s4 + $0xd8] sm:$0xf] %vm1144_vm1, %v1463_v24  ;;  %v781_v32 = vadd.f32 %v1758_v36, %v780_v26  ;;  %v1543_v33 = vpop.f32.mrf.mxu0  ;;  %v1575_v34 = vpop.f32.mrf.mxu1 }
 0x10d   : > { %1165 = vst.msk [vmem:[%s1769_s4 + $0x50] sm:$0xf] %vm1144_vm1, %v1429_v27  ;;  %v1432_v35 = vpack.c.bf16 %v847_v29, %v847_v29  ;;  %v1464_v37 = vpack.c.bf16 %v879_v30, %v879_v30  ;;  %v674_v38 = vadd.f32 %v1543_v33, %v1758_v36  ;;  %v802_v39 = vadd.f32 %v1575_v34, %v1758_v36 }
 0x10e   : > { %1197 = vst.msk [vmem:[%s1769_s4 + $0xd0] sm:$0xf] %vm1144_vm1, %v1461_v28  ;;  %v845_v40 = vmax.f32 %v653_v31, 0.0  ;;  %v877_v41 = vmax.f32 %v781_v32, 0.0  ;;  %v665_v42 = vpop.f32.mrf.mxu0  ;;  %v793_v43 = vpop.f32.mrf.mxu1 }
 0x10f   : > { %1168 = vst.msk [vmem:[%s1769_s4 + $0x5c] sm:$0xf] %vm1144_vm1, %v1432_v35  ;;  %1200 = vst.msk [vmem:[%s1769_s4 + $0xdc] sm:$0xf] %vm1144_vm1, %v1464_v37  ;;  %v850_v44 = vmax.f32 %v674_v38, 0.0  ;;  %v882_v45 = vmax.f32 %v802_v39, 0.0  ;;  %v666_v46 = vadd.f32 %v1758_v36, %v665_v42  ;;  %v794_v47 = vadd.f32 %v1758_v36, %v793_v43 }
 0x110   : > { %v1430_v48 = vpack.c.bf16 %v845_v40, %v845_v40  ;;  %v1462_v49 = vpack.c.bf16 %v877_v41, %v877_v41  ;;  %v1544_v50 = vpop.f32.mrf.mxu0  ;;  %v1576_v51 = vpop.f32.mrf.mxu1 }
 0x111   : > { %v1435_v52 = vpack.c.bf16 %v850_v44, %v850_v44  ;;  %v1467_v53 = vpack.c.bf16 %v882_v45, %v882_v45  ;;  %v848_v54 = vmax.f32 %v666_v46, 0.0  ;;  %v880_v55 = vmax.f32 %v794_v47, 0.0 }
 0x112   : > { %1166 = vst.msk [vmem:[%s1769_s4 + $0x54] sm:$0xf] %vm1144_vm1, %v1430_v48  ;;  %1198 = vst.msk [vmem:[%s1769_s4 + $0xd4] sm:$0xf] %vm1144_vm1, %v1462_v49  ;;  %v677_v56 = vadd.f32 %v1544_v50, %v1758_v36  ;;  %v805_v57 = vadd.f32 %v1576_v51, %v1758_v36  ;;  %v668_v58 = vpop.f32.mrf.mxu0  ;;  %v796_v59 = vpop.f32.mrf.mxu1 }
 0x113   : > { %1171 = vst.msk [vmem:[%s1769_s4 + $0x68] sm:$0xf] %vm1144_vm1, %v1435_v52  ;;  %1203 = vst.msk [vmem:[%s1769_s4 + $0xe8] sm:$0xf] %vm1144_vm1, %v1467_v53  ;;  %v1433_v60 = vpack.c.bf16 %v848_v54, %v848_v54  ;;  %v1465_v61 = vpack.c.bf16 %v880_v55, %v880_v55  ;;  %v669_v62 = vadd.f32 %v1758_v36, %v668_v58 }
 0x114   : > { %v797_v63 = vadd.f32 %v1758_v36, %v796_v59  ;;  %v851_v0 = vmax.f32 %v677_v56, 0.0  ;;  %v883_v1 = vmax.f32 %v805_v57, 0.0  ;;  %v1547_v2 = vpop.f32.mrf.mxu0  ;;  %v1579_v3 = vpop.f32.mrf.mxu1 }
 0x115   : > { %1169 = vst.msk [vmem:[%s1769_s4 + $0x60] sm:$0xf] %vm1144_vm1, %v1433_v60  ;;  %1201 = vst.msk [vmem:[%s1769_s4 + $0xe0] sm:$0xf] %vm1144_vm1, %v1465_v61  ;;  %v849_v4 = vmax.f32 %v669_v62, 0.0  ;;  %v690_v6 = vadd.f32 %v1547_v2, %v1758_v36  ;;  %v818_v7 = vadd.f32 %v1579_v3, %v1758_v36 }
 0x116   : > { %v881_v5 = vmax.f32 %v797_v63, 0.0  ;;  %v1436_v8 = vpack.c.bf16 %v851_v0, %v851_v0  ;;  %v1468_v9 = vpack.c.bf16 %v883_v1, %v883_v1  ;;  %v681_v10 = vpop.f32.mrf.mxu0  ;;  %v809_v11 = vpop.f32.mrf.mxu1 }
 0x117   : > { %v1434_v12 = vpack.c.bf16 %v849_v4, %v849_v4  ;;  %v854_v14 = vmax.f32 %v690_v6, 0.0  ;;  %v886_v15 = vmax.f32 %v818_v7, 0.0  ;;  %v682_v16 = vadd.f32 %v1758_v36, %v681_v10 }
 0x118   : > { %v1466_v13 = vpack.c.bf16 %v881_v5, %v881_v5  ;;  %1172 = vst.msk [vmem:[%s1769_s4 + $0x6c] sm:$0xf] %vm1144_vm1, %v1436_v8  ;;  %1204 = vst.msk [vmem:[%s1769_s4 + $0xec] sm:$0xf] %vm1144_vm1, %v1468_v9  ;;  %v810_v17 = vadd.f32 %v1758_v36, %v809_v11  ;;  %v1548_v18 = vpop.f32.mrf.mxu0  ;;  %v1580_v19 = vpop.f32.mrf.mxu1 }
 0x119   : > { %1170 = vst.msk [vmem:[%s1769_s4 + $0x64] sm:$0xf] %vm1144_vm1, %v1434_v12  ;;  %v1439_v20 = vpack.c.bf16 %v854_v14, %v854_v14  ;;  %v1471_v21 = vpack.c.bf16 %v886_v15, %v886_v15  ;;  %v693_v22 = vadd.f32 %v1548_v18, %v1758_v36  ;;  %v821_v23 = vadd.f32 %v1580_v19, %v1758_v36 }
 0x11a   : > { %1202 = vst.msk [vmem:[%s1769_s4 + $0xe4] sm:$0xf] %vm1144_vm1, %v1466_v13  ;;  %v852_v24 = vmax.f32 %v682_v16, 0.0  ;;  %v884_v25 = vmax.f32 %v810_v17, 0.0  ;;  %v684_v26 = vpop.f32.mrf.mxu0  ;;  %v812_v27 = vpop.f32.mrf.mxu1 }
 0x11b   : > { %1175 = vst.msk [vmem:[%s1769_s4 + $0x78] sm:$0xf] %vm1144_vm1, %v1439_v20  ;;  %1207 = vst.msk [vmem:[%s1769_s4 + $0xf8] sm:$0xf] %vm1144_vm1, %v1471_v21  ;;  %v855_v28 = vmax.f32 %v693_v22, 0.0  ;;  %v887_v29 = vmax.f32 %v821_v23, 0.0  ;;  %v685_v30 = vadd.f32 %v1758_v36, %v684_v26  ;;  %v813_v31 = vadd.f32 %v1758_v36, %v812_v27 }
 0x11c   : > { %v1437_v32 = vpack.c.bf16 %v852_v24, %v852_v24  ;;  %v1469_v33 = vpack.c.bf16 %v884_v25, %v884_v25 }
 0x11d   : > { %v1440_v34 = vpack.c.bf16 %v855_v28, %v855_v28  ;;  %v1472_v35 = vpack.c.bf16 %v887_v29, %v887_v29  ;;  %v853_v37 = vmax.f32 %v685_v30, 0.0  ;;  %v885_v38 = vmax.f32 %v813_v31, 0.0 }
 0x11e   : > { %1173 = vst.msk [vmem:[%s1769_s4 + $0x70] sm:$0xf] %vm1144_vm1, %v1437_v32  ;;  %1205 = vst.msk [vmem:[%s1769_s4 + $0xf0] sm:$0xf] %vm1144_vm1, %v1469_v33 }
 0x11f   : > { %1176 = vst.msk [vmem:[%s1769_s4 + $0x7c] sm:$0xf] %vm1144_vm1, %v1440_v34  ;;  %1208 = vst.msk [vmem:[%s1769_s4 + $0xfc] sm:$0xf] %vm1144_vm1, %v1472_v35  ;;  %v1438_v39 = vpack.c.bf16 %v853_v37, %v853_v37  ;;  %v1470_v40 = vpack.c.bf16 %v885_v38, %v885_v38 }
 0x121   : > { %1174 = vst.msk [vmem:[%s1769_s4 + $0x74] sm:$0xf] %vm1144_vm1, %v1438_v39  ;;  %1206 = vst.msk [vmem:[%s1769_s4 + $0xf4] sm:$0xf] %vm1144_vm1, %v1470_v40 }
 0x122 PF: > { %s13_s12 = sadd.s32 1, %s1639_s12  }
 0x123   : > { %p10_p4 = scmp.ge.s32.totalorder %s13_s12, 4  }
 0x125   :  { %12 = sbr.rel (!%p10_p4) target bundleno = 1 (0x1), region = 62 }

// kernel: dqn_forward.5
= control target key start
LH: loop header
LB: loop body
LE: loop exit
PB: predicated region body
PF: predicated region fallthrough
CT: control target
= control target key end

     0   :  { %vm894_vm0 = vcmask 519168   ;;  %s1667_s1 = inlined_call_operand.vmem [shape: bf16[512,64], index: 1, kind: input, shape index: {}]   ;;  %s1668_s0 = inlined_call_operand.vmem [shape: bf16[176,512], index: 0, kind: input, shape index: {}]   ;;  %s1669_s2 = inlined_call_operand.vmem [shape: f32[1,64], index: 2, kind: input, shape index: {}]   ;;  %s1670_s3 = inlined_call_operand.vmem [shape: bf16[176,64], index: 3, kind: output, shape index: {}]  }
   0x1   :  { %v1206_v0 = vld [vmem:[%s1667_s1 + $0x78] sm:$0xff]   ;;  %v1210_v4 = vld [vmem:[%s1667_s1 + $0x70] sm:$0xff]   ;;  %v1214_v8 = vld [vmem:[%s1667_s1 + $0x68] sm:$0xff]  }
   0x2   :  { %v1207_v1 = vld [vmem:[%s1667_s1 + $0xf8] sm:$0xff]   ;;  %1042 = vmatprep.subr.bf16.mxu0 %v1206_v0  ;;  %v1211_v5 = vld [vmem:[%s1667_s1 + $0xf0] sm:$0xff]   ;;  %v1215_v9 = vld [vmem:[%s1667_s1 + $0xe8] sm:$0xff]  }
   0x3   :  { %v1208_v2 = vld [vmem:[%s1667_s1 + $0x38] sm:$0xff]   ;;  %1124 = vmatprep.subr.bf16.mxu1 %v1207_v1  ;;  %v1212_v6 = vld [vmem:[%s1667_s1 + $0x30] sm:$0xff]   ;;  %v1216_v10 = vld [vmem:[%s1667_s1 + $0x28] sm:$0xff]  }
   0x4   :  { %v1209_v3 = vld [vmem:[%s1667_s1 + $0xb8] sm:$0xff]   ;;  %1043 = vmatpush3.bf16.msra.mxu0 %v1208_v2  ;;  %v1213_v7 = vld [vmem:[%s1667_s1 + $0xb0] sm:$0xff]   ;;  %v1217_v11 = vld [vmem:[%s1667_s1 + $0xa8] sm:$0xff]  }
   0x5   :  { %1125 = vmatpush3.bf16.msra.mxu1 %v1209_v3  ;;  %1044 = vmatprep.subr.bf16.mxu0 %v1210_v4  ;;  %v1218_v12 = vld [vmem:[%s1667_s1 + $0x60] sm:$0xff]   ;;  %v1222_v16 = vld [vmem:[%s1667_s1 + $0x58] sm:$0xff]   ;;  %v1226_v20 = vld [vmem:[%s1667_s1 + $0x50] sm:$0xff]  }
   0x6   :  { %1126 = vmatprep.subr.bf16.mxu1 %v1211_v5  ;;  %v1219_v13 = vld [vmem:[%s1667_s1 + $0xe0] sm:$0xff]   ;;  %v1223_v17 = vld [vmem:[%s1667_s1 + $0xd8] sm:$0xff]   ;;  %v1227_v21 = vld [vmem:[%s1667_s1 + $0xd0] sm:$0xff]  }
   0x7   :  { %v1220_v14 = vld [vmem:[%s1667_s1 + $0x20] sm:$0xff]   ;;  %v1224_v18 = vld [vmem:[%s1667_s1 + $0x18] sm:$0xff]   ;;  %v1228_v22 = vld [vmem:[%s1667_s1 + $0x10] sm:$0xff]  }
   0x8   :  { %1045 = vmatpush3.bf16.msra.mxu0 %v1212_v6  ;;  %v1221_v15 = vld [vmem:[%s1667_s1 + $0xa0] sm:$0xff]   ;;  %v1225_v19 = vld [vmem:[%s1667_s1 + $0x98] sm:$0xff]   ;;  %v1229_v23 = vld [vmem:[%s1667_s1 + $0x90] sm:$0xff]  }
   0x9   :  { %1127 = vmatpush3.bf16.msra.mxu1 %v1213_v7  ;;  %1046 = vmatprep.subr.bf16.mxu0 %v1214_v8  ;;  %v1230_v24 = vld [vmem:[%s1667_s1 + $0x48] sm:$0xff]   ;;  %v1234_v28 = vld [vmem:[%s1667_s1 + $0x40] sm:$0xff]  }
   0xa   :  { %1128 = vmatprep.subr.bf16.mxu1 %v1215_v9  ;;  %v1231_v25 = vld [vmem:[%s1667_s1 + $0xc8] sm:$0xff]   ;;  %v1235_v29 = vld [vmem:[%s1667_s1 + $0xc0] sm:$0xff]  }
   0xb   :  { %v1232_v26 = vld [vmem:[%s1667_s1 + $0x8] sm:$0xff]   ;;  %v1236_v30 = vld [vmem:[%s1667_s1] sm:$0xff]  }
   0xc   :  { %1047 = vmatpush3.bf16.msra.mxu0 %v1216_v10  ;;  %v1233_v27 = vld [vmem:[%s1667_s1 + $0x88] sm:$0xff]   ;;  %v1237_v31 = vld [vmem:[%s1667_s1 + $0x80] sm:$0xff]  }
   0xd   :  { %1129 = vmatpush3.bf16.msra.mxu1 %v1217_v11  ;;  %1048 = vmatprep.subr.bf16.mxu0 %v1218_v12  ;;  %v1238_v32 = vld [vmem:[%s1668_s0] ss:$16 sps:$4 sm:$0xff]   ;;  %v1240_v33 = vld [vmem:[%s1668_s0 + $0x4] ss:$16 sps:$4 sm:$0xff]   ;;  %v1241_v34 = vld [vmem:[%s1668_s0 + $0x8] ss:$16 sps:$4 sm:$0xff]  }
   0xe   :  { %1130 = vmatprep.subr.bf16.mxu1 %v1219_v13  ;;  %v1243_v35 = vld [vmem:[%s1668_s0 + $0xc] ss:$16 sps:$4 sm:$0xff]   ;;  %574 = vmatprep.mubr.bf16.mxu0 %v1240_v33  ;;  %v1244_v36 = vld [vmem:[%s1668_s0 + $0x24] ss:$16 sps:$4 sm:$0xff]   ;;  %v1248_v38 = vld [vmem:[%s1668_s0 + $0x20] ss:$16 sps:$4 sm:$0xff]  }
   0xf   :  { %695 = vmatprep.mubr.bf16.mxu1 %v1243_v35  ;;  %v1246_v37 = vld [vmem:[%s1668_s0 + $0x2c] ss:$16 sps:$4 sm:$0xff]   ;;  %v1249_v39 = vld [vmem:[%s1668_s0 + $0x28] ss:$16 sps:$4 sm:$0xff]   ;;  %v1250_v40 = vld [vmem:[%s1668_s0 + $0x44] ss:$16 sps:$4 sm:$0xff]  }
  0x10   :  { %1049 = vmatpush3.bf16.msra.mxu0 %v1220_v14  ;;  %v1252_v41 = vld [vmem:[%s1668_s0 + $0x4c] ss:$16 sps:$4 sm:$0xff]   ;;  %v1254_v42 = vld [vmem:[%s1668_s0 + $0x40] ss:$16 sps:$4 sm:$0xff]   ;;  %v1255_v43 = vld [vmem:[%s1668_s0 + $0x48] ss:$16 sps:$4 sm:$0xff]  }
  0x11   :  { %1131 = vmatpush3.bf16.msra.mxu1 %v1221_v15  ;;  %1050 = vmatprep.subr.bf16.mxu0 %v1222_v16  ;;  %v1256_v44 = vld [vmem:[%s1668_s0 + $0x64] ss:$16 sps:$4 sm:$0xff]   ;;  %v1258_v45 = vld [vmem:[%s1668_s0 + $0x6c] ss:$16 sps:$4 sm:$0xff]   ;;  %v1260_v46 = vld [vmem:[%s1668_s0 + $0x60] ss:$16 sps:$4 sm:$0xff]  }
  0x12   :  { %1132 = vmatprep.subr.bf16.mxu1 %v1223_v17  ;;  %v1261_v47 = vld [vmem:[%s1668_s0 + $0x68] ss:$16 sps:$4 sm:$0xff]   ;;  %v1262_v48 = vld [vmem:[%s1668_s0 + $0x84] ss:$16 sps:$4 sm:$0xff]   ;;  %v1264_v49 = vld [vmem:[%s1668_s0 + $0x8c] ss:$16 sps:$4 sm:$0xff]  }
  0x13   :  { %v1266_v50 = vld [vmem:[%s1668_s0 + $0x80] ss:$16 sps:$4 sm:$0xff]   ;;  %v1267_v51 = vld [vmem:[%s1668_s0 + $0x88] ss:$16 sps:$4 sm:$0xff]   ;;  %v1268_v52 = vld [vmem:[%s1668_s0 + $0xa4] ss:$16 sps:$4 sm:$0xff]  }
  0x14   :  { %1051 = vmatpush3.bf16.msra.mxu0 %v1224_v18  ;;  %v1270_v53 = vld [vmem:[%s1668_s0 + $0xac] ss:$16 sps:$4 sm:$0xff]   ;;  %v1272_v54 = vld [vmem:[%s1668_s0 + $0xa0] ss:$16 sps:$4 sm:$0xff]   ;;  %v1273_v55 = vld [vmem:[%s1668_s0 + $0xa8] ss:$16 sps:$4 sm:$0xff]  }
  0x15   :  { %1133 = vmatpush3.bf16.msra.mxu1 %v1225_v19  ;;  %1052 = vmatprep.subr.bf16.mxu0 %v1226_v20  ;;  %v1274_v56 = vld [vmem:[%s1668_s0 + $0xc4] ss:$16 sps:$4 sm:$0xff]   ;;  %v1276_v57 = vld [vmem:[%s1668_s0 + $0xcc] ss:$16 sps:$4 sm:$0xff]   ;;  %v1278_v58 = vld [vmem:[%s1668_s0 + $0xc0] ss:$16 sps:$4 sm:$0xff]  }
  0x16   :  { %1134 = vmatprep.subr.bf16.mxu1 %v1227_v21  ;;  %v1279_v59 = vld [vmem:[%s1668_s0 + $0xc8] ss:$16 sps:$4 sm:$0xff]   ;;  %v1280_v60 = vld [vmem:[%s1668_s0 + $0xe4] ss:$16 sps:$4 sm:$0xff]   ;;  %v1282_v61 = vld [vmem:[%s1668_s0 + $0xec] ss:$16 sps:$4 sm:$0xff]  }
  0x17   :  { %v1284_v62 = vld [vmem:[%s1668_s0 + $0xe0] ss:$16 sps:$4 sm:$0xff]   ;;  %v1285_v63 = vld [vmem:[%s1668_s0 + $0xe8] ss:$16 sps:$4 sm:$0xff]   ;;  %v1286_v0 = vld [vmem:[%s1668_s0 + $0x104] ss:$16 sps:$4 sm:$0xff]  }
  0x18   :  { %1053 = vmatpush3.bf16.msra.mxu0 %v1228_v22  ;;  %v1288_v1 = vld [vmem:[%s1668_s0 + $0x10c] ss:$16 sps:$4 sm:$0xff]   ;;  %v1290_v2 = vld [vmem:[%s1668_s0 + $0x100] ss:$16 sps:$4 sm:$0xff]   ;;  %v1291_v3 = vld [vmem:[%s1668_s0 + $0x108] ss:$16 sps:$4 sm:$0xff]  }
  0x19   :  { %1135 = vmatpush3.bf16.msra.mxu1 %v1229_v23  ;;  %1054 = vmatprep.subr.bf16.mxu0 %v1230_v24  ;;  %v1292_v4 = vld [vmem:[%s1668_s0 + $0x124] ss:$16 sps:$4 sm:$0xff]   ;;  %v1294_v5 = vld [vmem:[%s1668_s0 + $0x12c] ss:$16 sps:$4 sm:$0xff]   ;;  %v1296_v6 = vld [vmem:[%s1668_s0 + $0x120] ss:$16 sps:$4 sm:$0xff]  }
  0x1a   :  { %1136 = vmatprep.subr.bf16.mxu1 %v1231_v25  ;;  %v1297_v7 = vld [vmem:[%s1668_s0 + $0x128] ss:$16 sps:$4 sm:$0xff]   ;;  %v1298_v8 = vld [vmem:[%s1668_s0 + $0x144] ss:$16 sps:$4 sm:$0xff]   ;;  %v1300_v9 = vld [vmem:[%s1668_s0 + $0x14c] ss:$16 sps:$4 sm:$0xff]  }
  0x1b   :  { %v1302_v10 = vld [vmem:[%s1668_s0 + $0x140] ss:$16 sps:$4 sm:$0xff]   ;;  %v1303_v11 = vld [vmem:[%s1668_s0 + $0x148] ss:$16 sps:$4 sm:$0xff]  }
  0x1c   :  { %1055 = vmatpush3.bf16.msra.mxu0 %v1232_v26  ;;  %v1555_v14 = vld [vmem:[%s1669_s2] ss:$0 sm:$0xff] }
  0x1d   :  { %1137 = vmatpush3.bf16.msra.mxu1 %v1233_v27  ;;  %1056 = vmatprep.subr.bf16.mxu0 %v1234_v28 }
  0x1e   :  { %1138 = vmatprep.subr.bf16.mxu1 %v1235_v29 }
  0x20   :  { %1057 = vmatpush3.bf16.msra.mxu0 %v1236_v30 }
  0x21   :  { %1139 = vmatpush3.bf16.msra.mxu1 %v1237_v31 }
  0x23   :  { %575 = vmatmul.mubr.bf16.vlgmr.msra.gmra.mxu0 %v1238_v32 }
  0x24   :  { %696 = vmatmul.mubr.bf16.vlgmr.msra.gmra.mxu1 %v1241_v34  ;;  %582 = vmatprep.mubr.bf16.mxu0 %v1244_v36 }
  0x25   :  { %703 = vmatprep.mubr.bf16.mxu1 %v1246_v37 }
  0x2b   :  { %583 = vmatmul.mubr.bf16.gmra.mxu0 %v1248_v38 }
  0x2c   :  { %704 = vmatmul.mubr.bf16.gmra.mxu1 %v1249_v39  ;;  %590 = vmatprep.mubr.bf16.mxu0 %v1250_v40 }
  0x2d   :  { %711 = vmatprep.mubr.bf16.mxu1 %v1252_v41 }
  0x33   :  { %591 = vmatmul.mubr.bf16.gmra.mxu0 %v1254_v42 }
  0x34   :  { %712 = vmatmul.mubr.bf16.gmra.mxu1 %v1255_v43  ;;  %598 = vmatprep.mubr.bf16.mxu0 %v1256_v44 }
  0x35   :  { %719 = vmatprep.mubr.bf16.mxu1 %v1258_v45 }
  0x3b   :  { %599 = vmatmul.mubr.bf16.gmra.mxu0 %v1260_v46 }
  0x3c   :  { %720 = vmatmul.mubr.bf16.gmra.mxu1 %v1261_v47  ;;  %606 = vmatprep.mubr.bf16.mxu0 %v1262_v48 }
  0x3d   :  { %727 = vmatprep.mubr.bf16.mxu1 %v1264_v49 }
  0x43   :  { %607 = vmatmul.mubr.bf16.gmra.mxu0 %v1266_v50 }
  0x44   :  { %728 = vmatmul.mubr.bf16.gmra.mxu1 %v1267_v51  ;;  %614 = vmatprep.mubr.bf16.mxu0 %v1268_v52 }
  0x45   :  { %735 = vmatprep.mubr.bf16.mxu1 %v1270_v53 }
  0x4b   :  { %615 = vmatmul.mubr.bf16.gmra.mxu0 %v1272_v54 }
  0x4c   :  { %736 = vmatmul.mubr.bf16.gmra.mxu1 %v1273_v55  ;;  %622 = vmatprep.mubr.bf16.mxu0 %v1274_v56 }
  0x4d   :  { %743 = vmatprep.mubr.bf16.mxu1 %v1276_v57 }
  0x53   :  { %623 = vmatmul.mubr.bf16.gmra.mxu0 %v1278_v58 }
  0x54   :  { %744 = vmatmul.mubr.bf16.gmra.mxu1 %v1279_v59  ;;  %630 = vmatprep.mubr.bf16.mxu0 %v1280_v60 }
  0x55   :  { %751 = vmatprep.mubr.bf16.mxu1 %v1282_v61 }
  0x5b   :  { %631 = vmatmul.mubr.bf16.gmra.mxu0 %v1284_v62 }
  0x5c   :  { %752 = vmatmul.mubr.bf16.gmra.mxu1 %v1285_v63  ;;  %638 = vmatprep.mubr.bf16.mxu0 %v1286_v0 }
  0x5d   :  { %759 = vmatprep.mubr.bf16.mxu1 %v1288_v1 }
  0x63   :  { %639 = vmatmul.mubr.bf16.gmra.mxu0 %v1290_v2 }
  0x64   :  { %760 = vmatmul.mubr.bf16.gmra.mxu1 %v1291_v3  ;;  %646 = vmatprep.mubr.bf16.mxu0 %v1292_v4 }
  0x65   :  { %767 = vmatprep.mubr.bf16.mxu1 %v1294_v5 }
  0x6b   :  { %647 = vmatmul.mubr.bf16.gmra.mxu0 %v1296_v6 }
  0x6c   :  { %768 = vmatmul.mubr.bf16.gmra.mxu1 %v1297_v7  ;;  %654 = vmatprep.mubr.bf16.mxu0 %v1298_v8 }
  0x6d   :  { %775 = vmatprep.mubr.bf16.mxu1 %v1300_v9 }
  0x73   :  { %655 = vmatmul.mubr.bf16.gmra.mxu0 %v1302_v10 }
  0x74   :  { %776 = vmatmul.mubr.bf16.gmra.mxu1 %v1303_v11 }
  0xe3   :  { %v1058_v12 = vpop.f32.mrf.mxu0 }
  0xe4   :  { %v1140_v13 = vpop.f32.mrf.mxu1 }
  0xe5   :  { %v1059_v15 = vpop.f32.mrf.mxu0 }
  0xe6   :  { %v1060_v16 = vadd.f32 %v1059_v15, %v1058_v12  ;;  %v1141_v17 = vpop.f32.mrf.mxu1 }
  0xe7   :  { %v1061_v18 = vpop.f32.mrf.mxu0  ;;  %v1142_v20 = vadd.f32 %v1141_v17, %v1140_v13 }
  0xe8   :  { %v577_v19 = vadd.f32 %v1060_v16, %v1555_v14  ;;  %v1143_v21 = vpop.f32.mrf.mxu1 }
  0xe9   :  { %v1062_v22 = vpop.f32.mrf.mxu0 }
  0xea   :  { %v698_v23 = vadd.f32 %v1142_v20, %v577_v19  ;;  %v1063_v24 = vadd.f32 %v1062_v22, %v1061_v18  ;;  %v1144_v25 = vpop.f32.mrf.mxu1 }
  0xeb   :  { %v1064_v26 = vpop.f32.mrf.mxu0  ;;  %v1145_v29 = vadd.f32 %v1144_v25, %v1143_v21 }
  0xec   :  { %v784_v27 = vmax.f32 %v698_v23, 0.0  ;;  %v580_v28 = vadd.f32 %v1063_v24, %v1555_v14  ;;  %v1146_v30 = vpop.f32.mrf.mxu1 }
  0xed   :  { %v1065_v31 = vpop.f32.mrf.mxu0 }
  0xee   :  { %v1020_v32 = vpack.c.bf16 %v784_v27, %v784_v27  ;;  %v701_v33 = vadd.f32 %v1145_v29, %v580_v28  ;;  %v1066_v34 = vadd.f32 %v1065_v31, %v1064_v26  ;;  %v1147_v35 = vpop.f32.mrf.mxu1 }
  0xef   :  { %v1067_v36 = vpop.f32.mrf.mxu0  ;;  %v1148_v39 = vadd.f32 %v1147_v35, %v1146_v30 }
  0xf0   :  { %895 = vst.msk [vmem:[%s1670_s3] sm:$0xf] %vm894_vm0, %v1020_v32  ;;  %v785_v37 = vmax.f32 %v701_v33, 0.0  ;;  %v585_v38 = vadd.f32 %v1066_v34, %v1555_v14  ;;  %v1149_v40 = vpop.f32.mrf.mxu1 }
  0xf1   :  { %v1068_v41 = vpop.f32.mrf.mxu0 }
  0xf2   :  { %v1021_v42 = vpack.c.bf16 %v785_v37, %v785_v37  ;;  %v706_v43 = vadd.f32 %v1148_v39, %v585_v38  ;;  %v1069_v44 = vadd.f32 %v1068_v41, %v1067_v36  ;;  %v1150_v45 = vpop.f32.mrf.mxu1 }
  0xf3   :  { %v1070_v46 = vpop.f32.mrf.mxu0  ;;  %v1151_v49 = vadd.f32 %v1150_v45, %v1149_v40 }
  0xf4   :  { %896 = vst.msk [vmem:[%s1670_s3 + $0x4] sm:$0xf] %vm894_vm0, %v1021_v42  ;;  %v786_v47 = vmax.f32 %v706_v43, 0.0  ;;  %v588_v48 = vadd.f32 %v1069_v44, %v1555_v14  ;;  %v1152_v50 = vpop.f32.mrf.mxu1 }
  0xf5   :  { %v1071_v51 = vpop.f32.mrf.mxu0 }
  0xf6   :  { %v1022_v52 = vpack.c.bf16 %v786_v47, %v786_v47  ;;  %v709_v53 = vadd.f32 %v1151_v49, %v588_v48  ;;  %v1072_v54 = vadd.f32 %v1071_v51, %v1070_v46  ;;  %v1153_v55 = vpop.f32.mrf.mxu1 }
  0xf7   :  { %v1073_v56 = vpop.f32.mrf.mxu0  ;;  %v1154_v59 = vadd.f32 %v1153_v55, %v1152_v50 }
  0xf8   :  { %897 = vst.msk [vmem:[%s1670_s3 + $0x8] sm:$0xf] %vm894_vm0, %v1022_v52  ;;  %v787_v57 = vmax.f32 %v709_v53, 0.0  ;;  %v593_v58 = vadd.f32 %v1072_v54, %v1555_v14  ;;  %v1155_v60 = vpop.f32.mrf.mxu1 }
  0xf9   :  { %v1074_v61 = vpop.f32.mrf.mxu0 }
  0xfa   :  { %v1023_v62 = vpack.c.bf16 %v787_v57, %v787_v57  ;;  %v714_v63 = vadd.f32 %v1154_v59, %v593_v58  ;;  %v1075_v0 = vadd.f32 %v1074_v61, %v1073_v56  ;;  %v1156_v1 = vpop.f32.mrf.mxu1 }
  0xfb   :  { %v1076_v2 = vpop.f32.mrf.mxu0  ;;  %v1157_v5 = vadd.f32 %v1156_v1, %v1155_v60 }
  0xfc   :  { %898 = vst.msk [vmem:[%s1670_s3 + $0xc] sm:$0xf] %vm894_vm0, %v1023_v62  ;;  %v788_v3 = vmax.f32 %v714_v63, 0.0  ;;  %v596_v4 = vadd.f32 %v1075_v0, %v1555_v14  ;;  %v1158_v6 = vpop.f32.mrf.mxu1 }
  0xfd   :  { %v1077_v7 = vpop.f32.mrf.mxu0 }
  0xfe   :  { %v1024_v8 = vpack.c.bf16 %v788_v3, %v788_v3  ;;  %v717_v9 = vadd.f32 %v1157_v5, %v596_v4  ;;  %v1078_v10 = vadd.f32 %v1077_v7, %v1076_v2  ;;  %v1159_v11 = vpop.f32.mrf.mxu1 }
  0xff   :  { %v1079_v12 = vpop.f32.mrf.mxu0  ;;  %v1160_v16 = vadd.f32 %v1159_v11, %v1158_v6 }
 0x100   :  { %899 = vst.msk [vmem:[%s1670_s3 + $0x10] sm:$0xf] %vm894_vm0, %v1024_v8  ;;  %v789_v13 = vmax.f32 %v717_v9, 0.0  ;;  %v601_v15 = vadd.f32 %v1078_v10, %v1555_v14  ;;  %v1161_v17 = vpop.f32.mrf.mxu1 }
 0x101   :  { %v1080_v18 = vpop.f32.mrf.mxu0 }
 0x102   :  { %v1025_v19 = vpack.c.bf16 %v789_v13, %v789_v13  ;;  %v722_v20 = vadd.f32 %v1160_v16, %v601_v15  ;;  %v1081_v21 = vadd.f32 %v1080_v18, %v1079_v12  ;;  %v1162_v22 = vpop.f32.mrf.mxu1 }
 0x103   :  { %v1082_v23 = vpop.f32.mrf.mxu0  ;;  %v1163_v26 = vadd.f32 %v1162_v22, %v1161_v17 }
 0x104   :  { %900 = vst.msk [vmem:[%s1670_s3 + $0x14] sm:$0xf] %vm894_vm0, %v1025_v19  ;;  %v790_v24 = vmax.f32 %v722_v20, 0.0  ;;  %v604_v25 = vadd.f32 %v1081_v21, %v1555_v14  ;;  %v1164_v27 = vpop.f32.mrf.mxu1 }
 0x105   :  { %v1083_v28 = vpop.f32.mrf.mxu0 }
 0x106   :  { %v1026_v29 = vpack.c.bf16 %v790_v24, %v790_v24  ;;  %v725_v30 = vadd.f32 %v1163_v26, %v604_v25  ;;  %v1084_v31 = vadd.f32 %v1083_v28, %v1082_v23  ;;  %v1165_v32 = vpop.f32.mrf.mxu1 }
 0x107   :  { %v1085_v33 = vpop.f32.mrf.mxu0  ;;  %v1166_v36 = vadd.f32 %v1165_v32, %v1164_v27 }
 0x108   :  { %901 = vst.msk [vmem:[%s1670_s3 + $0x18] sm:$0xf] %vm894_vm0, %v1026_v29  ;;  %v791_v34 = vmax.f32 %v725_v30, 0.0  ;;  %v609_v35 = vadd.f32 %v1084_v31, %v1555_v14  ;;  %v1167_v37 = vpop.f32.mrf.mxu1 }
 0x109   :  { %v1086_v38 = vpop.f32.mrf.mxu0 }
 0x10a   :  { %v1027_v39 = vpack.c.bf16 %v791_v34, %v791_v34  ;;  %v730_v40 = vadd.f32 %v1166_v36, %v609_v35  ;;  %v1087_v41 = vadd.f32 %v1086_v38, %v1085_v33  ;;  %v1168_v42 = vpop.f32.mrf.mxu1 }
 0x10b   :  { %v1088_v43 = vpop.f32.mrf.mxu0  ;;  %v1169_v46 = vadd.f32 %v1168_v42, %v1167_v37 }
 0x10c   :  { %902 = vst.msk [vmem:[%s1670_s3 + $0x1c] sm:$0xf] %vm894_vm0, %v1027_v39  ;;  %v792_v44 = vmax.f32 %v730_v40, 0.0  ;;  %v612_v45 = vadd.f32 %v1087_v41, %v1555_v14  ;;  %v1170_v47 = vpop.f32.mrf.mxu1 }
 0x10d   :  { %v1089_v48 = vpop.f32.mrf.mxu0 }
 0x10e   :  { %v1028_v49 = vpack.c.bf16 %v792_v44, %v792_v44  ;;  %v733_v50 = vadd.f32 %v1169_v46, %v612_v45  ;;  %v1090_v51 = vadd.f32 %v1089_v48, %v1088_v43  ;;  %v1171_v52 = vpop.f32.mrf.mxu1 }
 0x10f   :  { %v1091_v53 = vpop.f32.mrf.mxu0  ;;  %v1172_v56 = vadd.f32 %v1171_v52, %v1170_v47 }
 0x110   :  { %903 = vst.msk [vmem:[%s1670_s3 + $0x20] sm:$0xf] %vm894_vm0, %v1028_v49  ;;  %v793_v54 = vmax.f32 %v733_v50, 0.0  ;;  %v617_v55 = vadd.f32 %v1090_v51, %v1555_v14  ;;  %v1173_v57 = vpop.f32.mrf.mxu1 }
 0x111   :  { %v1092_v58 = vpop.f32.mrf.mxu0 }
 0x112   :  { %v1029_v59 = vpack.c.bf16 %v793_v54, %v793_v54  ;;  %v738_v60 = vadd.f32 %v1172_v56, %v617_v55  ;;  %v1093_v61 = vadd.f32 %v1092_v58, %v1091_v53  ;;  %v1174_v62 = vpop.f32.mrf.mxu1 }
 0x113   :  { %v1094_v63 = vpop.f32.mrf.mxu0  ;;  %v1175_v2 = vadd.f32 %v1174_v62, %v1173_v57 }
 0x114   :  { %904 = vst.msk [vmem:[%s1670_s3 + $0x24] sm:$0xf] %vm894_vm0, %v1029_v59  ;;  %v794_v0 = vmax.f32 %v738_v60, 0.0  ;;  %v620_v1 = vadd.f32 %v1093_v61, %v1555_v14  ;;  %v1176_v3 = vpop.f32.mrf.mxu1 }
 0x115   :  { %v1095_v4 = vpop.f32.mrf.mxu0 }
 0x116   :  { %v1030_v5 = vpack.c.bf16 %v794_v0, %v794_v0  ;;  %v741_v6 = vadd.f32 %v1175_v2, %v620_v1  ;;  %v1096_v7 = vadd.f32 %v1095_v4, %v1094_v63  ;;  %v1177_v8 = vpop.f32.mrf.mxu1 }
 0x117   :  { %v1097_v9 = vpop.f32.mrf.mxu0  ;;  %v1178_v12 = vadd.f32 %v1177_v8, %v1176_v3 }
 0x118   :  { %905 = vst.msk [vmem:[%s1670_s3 + $0x28] sm:$0xf] %vm894_vm0, %v1030_v5  ;;  %v795_v10 = vmax.f32 %v741_v6, 0.0  ;;  %v625_v11 = vadd.f32 %v1096_v7, %v1555_v14  ;;  %v1179_v13 = vpop.f32.mrf.mxu1 }
 0x119   :  { %v1098_v15 = vpop.f32.mrf.mxu0 }
 0x11a   :  { %v1031_v16 = vpack.c.bf16 %v795_v10, %v795_v10  ;;  %v746_v17 = vadd.f32 %v1178_v12, %v625_v11  ;;  %v1099_v18 = vadd.f32 %v1098_v15, %v1097_v9  ;;  %v1180_v19 = vpop.f32.mrf.mxu1 }
 0x11b   :  { %v1100_v20 = vpop.f32.mrf.mxu0  ;;  %v1181_v23 = vadd.f32 %v1180_v19, %v1179_v13 }
 0x11c   :  { %906 = vst.msk [vmem:[%s1670_s3 + $0x2c] sm:$0xf] %vm894_vm0, %v1031_v16  ;;  %v796_v21 = vmax.f32 %v746_v17, 0.0  ;;  %v628_v22 = vadd.f32 %v1099_v18, %v1555_v14  ;;  %v1182_v24 = vpop.f32.mrf.mxu1 }
 0x11d   :  { %v1101_v25 = vpop.f32.mrf.mxu0 }
 0x11e   :  { %v1032_v26 = vpack.c.bf16 %v796_v21, %v796_v21  ;;  %v749_v27 = vadd.f32 %v1181_v23, %v628_v22  ;;  %v1102_v28 = vadd.f32 %v1101_v25, %v1100_v20  ;;  %v1183_v29 = vpop.f32.mrf.mxu1 }
 0x11f   :  { %v1103_v30 = vpop.f32.mrf.mxu0  ;;  %v1184_v33 = vadd.f32 %v1183_v29, %v1182_v24 }
 0x120   :  { %907 = vst.msk [vmem:[%s1670_s3 + $0x30] sm:$0xf] %vm894_vm0, %v1032_v26  ;;  %v797_v31 = vmax.f32 %v749_v27, 0.0  ;;  %v633_v32 = vadd.f32 %v1102_v28, %v1555_v14  ;;  %v1185_v34 = vpop.f32.mrf.mxu1 }
 0x121   :  { %v1104_v35 = vpop.f32.mrf.mxu0 }
 0x122   :  { %v1033_v36 = vpack.c.bf16 %v797_v31, %v797_v31  ;;  %v754_v37 = vadd.f32 %v1184_v33, %v633_v32  ;;  %v1105_v38 = vadd.f32 %v1104_v35, %v1103_v30  ;;  %v1186_v39 = vpop.f32.mrf.mxu1 }
 0x123   :  { %v1106_v40 = vpop.f32.mrf.mxu0  ;;  %v1187_v43 = vadd.f32 %v1186_v39, %v1185_v34 }
 0x124   :  { %908 = vst.msk [vmem:[%s1670_s3 + $0x34] sm:$0xf] %vm894_vm0, %v1033_v36  ;;  %v798_v41 = vmax.f32 %v754_v37, 0.0  ;;  %v636_v42 = vadd.f32 %v1105_v38, %v1555_v14  ;;  %v1188_v44 = vpop.f32.mrf.mxu1 }
 0x125   :  { %v1107_v45 = vpop.f32.mrf.mxu0 }
 0x126   :  { %v1034_v46 = vpack.c.bf16 %v798_v41, %v798_v41  ;;  %v757_v47 = vadd.f32 %v1187_v43, %v636_v42  ;;  %v1108_v48 = vadd.f32 %v1107_v45, %v1106_v40  ;;  %v1189_v49 = vpop.f32.mrf.mxu1 }
 0x127   :  { %v1109_v50 = vpop.f32.mrf.mxu0  ;;  %v1190_v53 = vadd.f32 %v1189_v49, %v1188_v44 }
 0x128   :  { %909 = vst.msk [vmem:[%s1670_s3 + $0x38] sm:$0xf] %vm894_vm0, %v1034_v46  ;;  %v799_v51 = vmax.f32 %v757_v47, 0.0  ;;  %v641_v52 = vadd.f32 %v1108_v48, %v1555_v14  ;;  %v1191_v54 = vpop.f32.mrf.mxu1 }
 0x129   :  { %v1110_v55 = vpop.f32.mrf.mxu0 }
 0x12a   :  { %v1035_v56 = vpack.c.bf16 %v799_v51, %v799_v51  ;;  %v762_v57 = vadd.f32 %v1190_v53, %v641_v52  ;;  %v1111_v58 = vadd.f32 %v1110_v55, %v1109_v50  ;;  %v1192_v59 = vpop.f32.mrf.mxu1 }
 0x12b   :  { %v1112_v60 = vpop.f32.mrf.mxu0  ;;  %v1193_v63 = vadd.f32 %v1192_v59, %v1191_v54 }
 0x12c   :  { %910 = vst.msk [vmem:[%s1670_s3 + $0x3c] sm:$0xf] %vm894_vm0, %v1035_v56  ;;  %v800_v61 = vmax.f32 %v762_v57, 0.0  ;;  %v644_v62 = vadd.f32 %v1111_v58, %v1555_v14  ;;  %v1194_v0 = vpop.f32.mrf.mxu1 }
 0x12d   :  { %v1113_v1 = vpop.f32.mrf.mxu0 }
 0x12e   :  { %v1036_v2 = vpack.c.bf16 %v800_v61, %v800_v61  ;;  %v765_v3 = vadd.f32 %v1193_v63, %v644_v62  ;;  %v1114_v4 = vadd.f32 %v1113_v1, %v1112_v60  ;;  %v1195_v5 = vpop.f32.mrf.mxu1 }
 0x12f   :  { %v1115_v6 = vpop.f32.mrf.mxu0  ;;  %v1196_v9 = vadd.f32 %v1195_v5, %v1194_v0 }
 0x130   :  { %911 = vst.msk [vmem:[%s1670_s3 + $0x40] sm:$0xf] %vm894_vm0, %v1036_v2  ;;  %v801_v7 = vmax.f32 %v765_v3, 0.0  ;;  %v649_v8 = vadd.f32 %v1114_v4, %v1555_v14  ;;  %v1197_v10 = vpop.f32.mrf.mxu1 }
 0x131   :  { %v1116_v11 = vpop.f32.mrf.mxu0 }
 0x132   :  { %v1037_v12 = vpack.c.bf16 %v801_v7, %v801_v7  ;;  %v770_v13 = vadd.f32 %v1196_v9, %v649_v8  ;;  %v1117_v15 = vadd.f32 %v1116_v11, %v1115_v6  ;;  %v1198_v16 = vpop.f32.mrf.mxu1 }
 0x133   :  { %v1118_v17 = vpop.f32.mrf.mxu0  ;;  %v1199_v20 = vadd.f32 %v1198_v16, %v1197_v10 }
 0x134   :  { %912 = vst.msk [vmem:[%s1670_s3 + $0x44] sm:$0xf] %vm894_vm0, %v1037_v12  ;;  %v802_v18 = vmax.f32 %v770_v13, 0.0  ;;  %v652_v19 = vadd.f32 %v1117_v15, %v1555_v14  ;;  %v1200_v21 = vpop.f32.mrf.mxu1 }
 0x135   :  { %v1119_v22 = vpop.f32.mrf.mxu0 }
 0x136   :  { %v1038_v23 = vpack.c.bf16 %v802_v18, %v802_v18  ;;  %v773_v24 = vadd.f32 %v1199_v20, %v652_v19  ;;  %v1120_v25 = vadd.f32 %v1119_v22, %v1118_v17  ;;  %v1201_v26 = vpop.f32.mrf.mxu1 }
 0x137   :  { %v1121_v27 = vpop.f32.mrf.mxu0  ;;  %v1202_v30 = vadd.f32 %v1201_v26, %v1200_v21 }
 0x138   :  { %913 = vst.msk [vmem:[%s1670_s3 + $0x48] sm:$0xf] %vm894_vm0, %v1038_v23  ;;  %v803_v28 = vmax.f32 %v773_v24, 0.0  ;;  %v657_v29 = vadd.f32 %v1120_v25, %v1555_v14  ;;  %v1203_v31 = vpop.f32.mrf.mxu1 }
 0x139   :  { %v1122_v32 = vpop.f32.mrf.mxu0 }
 0x13a   :  { %v1039_v33 = vpack.c.bf16 %v803_v28, %v803_v28  ;;  %v778_v34 = vadd.f32 %v1202_v30, %v657_v29  ;;  %v1123_v35 = vadd.f32 %v1122_v32, %v1121_v27  ;;  %v1204_v36 = vpop.f32.mrf.mxu1 }
 0x13b   :  { %v1205_v39 = vadd.f32 %v1204_v36, %v1203_v31 }
 0x13c   :  { %914 = vst.msk [vmem:[%s1670_s3 + $0x4c] sm:$0xf] %vm894_vm0, %v1039_v33  ;;  %v804_v37 = vmax.f32 %v778_v34, 0.0  ;;  %v660_v38 = vadd.f32 %v1123_v35, %v1555_v14 }
 0x13e   :  { %v1040_v40 = vpack.c.bf16 %v804_v37, %v804_v37  ;;  %v781_v41 = vadd.f32 %v1205_v39, %v660_v38 }
 0x140   :  { %915 = vst.msk [vmem:[%s1670_s3 + $0x50] sm:$0xf] %vm894_vm0, %v1040_v40  ;;  %v805_v42 = vmax.f32 %v781_v41, 0.0 }
 0x142   :  { %v1041_v43 = vpack.c.bf16 %v805_v42, %v805_v42 }
 0x144   :  { %916 = vst.msk [vmem:[%s1670_s3 + $0x54] sm:$0xf] %vm894_vm0, %v1041_v43 }

// kernel: dqn_forward.6
= control target key start
LH: loop header
LB: loop body
LE: loop exit
PB: predicated region body
PF: predicated region fallthrough
CT: control target
= control target key end

     0   :  { %v1270_v34 = vmov 0.0   ;;  %vm1271_vm0 = vmmov 0   ;;  %vm527_vm1 = vcmask 523264   ;;  %vm886_vm2 = vcmask 519168   ;;  %s1693_s1 = inlined_call_operand.vmem [shape: bf16[576,64], index: 1, kind: input, shape index: {}]   ;;  %s1694_s0 = inlined_call_operand.vmem [shape: bf16[112,576], index: 0, kind: input, shape index: {}]   ;;  %s1695_s2 = inlined_call_operand.vmem [shape: f32[1,64], index: 2, kind: input, shape index: {}]   ;;  %s1696_s3 = inlined_call_operand.vmem [shape: bf16[112,64], index: 3, kind: output, shape index: {}]  }
   0x1   :  { %v1185_v0 = vld [vmem:[%s1693_s1 + $0x78] sm:$0xff]   ;;  %v1189_v4 = vld [vmem:[%s1693_s1 + $0x70] sm:$0xff]   ;;  %v1193_v8 = vld [vmem:[%s1693_s1 + $0x68] sm:$0xff]  }
   0x2   :  { %v1186_v1 = vld [vmem:[%s1693_s1 + $0xf8] sm:$0xff]   ;;  %1012 = vmatprep.subr.bf16.mxu0 %v1185_v0  ;;  %v1190_v5 = vld [vmem:[%s1693_s1 + $0xf0] sm:$0xff]   ;;  %v1194_v9 = vld [vmem:[%s1693_s1 + $0xe8] sm:$0xff]  }
   0x3   :  { %v1187_v2 = vld [vmem:[%s1693_s1 + $0x38] sm:$0xff]   ;;  %1070 = vmatprep.subr.bf16.mxu1 %v1186_v1  ;;  %v1191_v6 = vld [vmem:[%s1693_s1 + $0x30] sm:$0xff]   ;;  %v1195_v10 = vld [vmem:[%s1693_s1 + $0x28] sm:$0xff]  }
   0x4   :  { %v1188_v3 = vld [vmem:[%s1693_s1 + $0xb8] sm:$0xff]   ;;  %1013 = vmatpush3.bf16.msra.mxu0 %v1187_v2  ;;  %v1192_v7 = vld [vmem:[%s1693_s1 + $0xb0] sm:$0xff]   ;;  %v1196_v11 = vld [vmem:[%s1693_s1 + $0xa8] sm:$0xff]  }
   0x5   :  { %1071 = vmatpush3.bf16.msra.mxu1 %v1188_v3  ;;  %1014 = vmatprep.subr.bf16.mxu0 %v1189_v4  ;;  %v1197_v12 = vld [vmem:[%s1693_s1 + $0x60] sm:$0xff]   ;;  %v1201_v16 = vld [vmem:[%s1693_s1 + $0x58] sm:$0xff]   ;;  %v1205_v20 = vld [vmem:[%s1693_s1 + $0x50] sm:$0xff]  }
   0x6   :  { %1072 = vmatprep.subr.bf16.mxu1 %v1190_v5  ;;  %v1198_v13 = vld [vmem:[%s1693_s1 + $0xe0] sm:$0xff]   ;;  %v1202_v17 = vld [vmem:[%s1693_s1 + $0xd8] sm:$0xff]   ;;  %v1206_v21 = vld [vmem:[%s1693_s1 + $0xd0] sm:$0xff]  }
   0x7   :  { %v1199_v14 = vld [vmem:[%s1693_s1 + $0x20] sm:$0xff]   ;;  %v1203_v18 = vld [vmem:[%s1693_s1 + $0x18] sm:$0xff]   ;;  %v1207_v22 = vld [vmem:[%s1693_s1 + $0x10] sm:$0xff]  }
   0x8   :  { %1015 = vmatpush3.bf16.msra.mxu0 %v1191_v6  ;;  %v1200_v15 = vld [vmem:[%s1693_s1 + $0xa0] sm:$0xff]   ;;  %v1204_v19 = vld [vmem:[%s1693_s1 + $0x98] sm:$0xff]   ;;  %v1208_v23 = vld [vmem:[%s1693_s1 + $0x90] sm:$0xff]  }
   0x9   :  { %1073 = vmatpush3.bf16.msra.mxu1 %v1192_v7  ;;  %1016 = vmatprep.subr.bf16.mxu0 %v1193_v8  ;;  %v1209_v24 = vld [vmem:[%s1693_s1 + $0x48] sm:$0xff]   ;;  %v1213_v28 = vld [vmem:[%s1693_s1 + $0x40] sm:$0xff]   ;;  %v1223_v37 = vld [vmem:[%s1693_s1 + $0x118] sm:$0xff]  }
   0xa   :  { %1074 = vmatprep.subr.bf16.mxu1 %v1194_v9  ;;  %v1210_v25 = vld [vmem:[%s1693_s1 + $0xc8] sm:$0xff]   ;;  %v1214_v29 = vld [vmem:[%s1693_s1 + $0xc0] sm:$0xff]   ;;  %v1234_v43 = vld [vmem:[%s1693_s1 + $0x110] sm:$0xff]  }
   0xb   :  { %v1211_v26 = vld [vmem:[%s1693_s1 + $0x8] sm:$0xff]   ;;  %v1215_v30 = vld [vmem:[%s1693_s1] sm:$0xff]   ;;  %v1232_v44 = vld [vmem:[%s1694_s0 + $0x5c] ss:$20 sps:$4 sm:$0xff]  }
   0xc   :  { %1017 = vmatpush3.bf16.msra.mxu0 %v1195_v10  ;;  %v1212_v27 = vld [vmem:[%s1693_s1 + $0x88] sm:$0xff]   ;;  %v1216_v31 = vld [vmem:[%s1693_s1 + $0x80] sm:$0xff]   ;;  %v1237_v48 = vld [vmem:[%s1694_s0 + $0x7c] ss:$20 sps:$4 sm:$0xff]  }
   0xd   :  { %1075 = vmatpush3.bf16.msra.mxu1 %v1196_v11  ;;  %1018 = vmatprep.subr.bf16.mxu0 %v1197_v12  ;;  %v1217_v32 = vld [vmem:[%s1694_s0] ss:$20 sps:$4 sm:$0xff]   ;;  %v1219_v33 = vld [vmem:[%s1694_s0 + $0x4] ss:$20 sps:$4 sm:$0xff]   ;;  %v1220_v35 = vld [vmem:[%s1694_s0 + $0x8] ss:$20 sps:$4 sm:$0xff]  }
   0xe   :  { %1076 = vmatprep.subr.bf16.mxu1 %v1198_v13  ;;  %v1222_v36 = vld [vmem:[%s1694_s0 + $0xc] ss:$20 sps:$4 sm:$0xff]   ;;  %581 = vmatprep.mubr.bf16.mxu0 %v1219_v33  ;;  %v1226_v39 = vld [vmem:[%s1694_s0 + $0x34] ss:$20 sps:$4 sm:$0xff]   ;;  %v1229_v41 = vld [vmem:[%s1694_s0 + $0x30] ss:$20 sps:$4 sm:$0xff]  }
   0xf   :  { %670 = vmatprep.mubr.bf16.mxu1 %v1222_v36  ;;  %v1224_v38 = vld [vmem:[%s1694_s0 + $0x2c] ss:$20 sps:$4 sm:$0xff]   ;;  %v1228_v40 = vld [vmem:[%s1694_s0 + $0x28] ss:$20 sps:$4 sm:$0xff]   ;;  %v1235_v46 = vld [vmem:[%s1694_s0 + $0x50] ss:$20 sps:$4 sm:$0xff]  }
  0x10   :  { %1019 = vmatpush3.bf16.msra.mxu0 %v1199_v14  ;;  %v1230_v42 = vld [vmem:[%s1694_s0 + $0x54] ss:$20 sps:$4 sm:$0xff]   ;;  %v1236_v47 = vld [vmem:[%s1694_s0 + $0x58] ss:$20 sps:$4 sm:$0xff]   ;;  %v1256_v50 = vld [vmem:[%s1693_s1 + $0x100] sm:$0xff]  }
  0x11   :  { %1077 = vmatpush3.bf16.msra.mxu1 %v1200_v15  ;;  %1020 = vmatprep.subr.bf16.mxu0 %v1201_v16  ;;  %v1243_v45 = vld [vmem:[%s1693_s1 + $0x108] sm:$0xff]   ;;  %v1239_v49 = vld [vmem:[%s1694_s0 + $0x84] ss:$20 sps:$4 sm:$0xff]   ;;  %v1242_v52 = vld [vmem:[%s1694_s0 + $0x80] ss:$20 sps:$4 sm:$0xff]  }
  0x12   :  { %1078 = vmatprep.subr.bf16.mxu1 %v1202_v17  ;;  %v1241_v51 = vld [vmem:[%s1694_s0 + $0x78] ss:$20 sps:$4 sm:$0xff]   ;;  %v1248_v55 = vld [vmem:[%s1694_s0 + $0xa0] ss:$20 sps:$4 sm:$0xff]   ;;  %v1249_v56 = vld [vmem:[%s1694_s0 + $0xa8] ss:$20 sps:$4 sm:$0xff]  }
  0x13   :  { %v1244_v53 = vld [vmem:[%s1694_s0 + $0xa4] ss:$20 sps:$4 sm:$0xff]   ;;  %v1246_v54 = vld [vmem:[%s1694_s0 + $0xac] ss:$20 sps:$4 sm:$0xff]   ;;  %v1252_v58 = vld [vmem:[%s1694_s0 + $0xd4] ss:$20 sps:$4 sm:$0xff]  }
  0x14   :  { %1021 = vmatpush3.bf16.msra.mxu0 %v1203_v18  ;;  %v1250_v57 = vld [vmem:[%s1694_s0 + $0xcc] ss:$20 sps:$4 sm:$0xff]   ;;  %v1254_v59 = vld [vmem:[%s1694_s0 + $0xc8] ss:$20 sps:$4 sm:$0xff]   ;;  %v1255_v60 = vld [vmem:[%s1694_s0 + $0xd0] ss:$20 sps:$4 sm:$0xff]  }
  0x15   :  { %1079 = vmatpush3.bf16.msra.mxu1 %v1204_v19  ;;  %1022 = vmatprep.subr.bf16.mxu0 %v1205_v20  ;;  %v1257_v61 = vld [vmem:[%s1694_s0 + $0xf4] ss:$20 sps:$4 sm:$0xff]   ;;  %v1259_v62 = vld [vmem:[%s1694_s0 + $0xfc] ss:$20 sps:$4 sm:$0xff]   ;;  %v1262_v0 = vld [vmem:[%s1694_s0 + $0xf8] ss:$20 sps:$4 sm:$0xff]  }
  0x16   :  { %1080 = vmatprep.subr.bf16.mxu1 %v1206_v21  ;;  %v1261_v63 = vld [vmem:[%s1694_s0 + $0xf0] ss:$20 sps:$4 sm:$0xff]   ;;  %v1265_v3 = vld [vmem:[%s1694_s0 + $0x38] ss:$20 sps:$4 sm:$0xff]   ;;  %v1267_v5 = vld [vmem:[%s1694_s0 + $0x60] ss:$20 sps:$4 sm:$0xff]  }
  0x17   :  { %v1263_v1 = vld [vmem:[%s1694_s0 + $0x10] ss:$20 sps:$4 sm:$0xff]   ;;  %v1266_v4 = vld [vmem:[%s1694_s0 + $0xd8] ss:$20 sps:$4 sm:$0xff]   ;;  %v1268_v6 = vld [vmem:[%s1694_s0 + $0x100] ss:$20 sps:$4 sm:$0xff]  }
  0x18   :  { %1023 = vmatpush3.bf16.msra.mxu0 %v1207_v22  ;;  %v1264_v2 = vld [vmem:[%s1694_s0 + $0xb0] ss:$20 sps:$4 sm:$0xff]   ;;  %v1269_v7 = vld [vmem:[%s1694_s0 + $0x88] ss:$20 sps:$4 sm:$0xff]  }
  0x19   :  { %1081 = vmatpush3.bf16.msra.mxu1 %v1208_v23  ;;  %1024 = vmatprep.subr.bf16.mxu0 %v1209_v24 }
  0x1a   :  { %1082 = vmatprep.subr.bf16.mxu1 %v1210_v25 }
  0x1c   :  { %1025 = vmatpush3.bf16.msra.mxu0 %v1211_v26 }
  0x1d   :  { %1083 = vmatpush3.bf16.msra.mxu1 %v1212_v27  ;;  %1026 = vmatprep.subr.bf16.mxu0 %v1213_v28 }
  0x1e   :  { %1084 = vmatprep.subr.bf16.mxu1 %v1214_v29 }
  0x20   :  { %1027 = vmatpush3.bf16.msra.mxu0 %v1215_v30 }
  0x21   :  { %1085 = vmatpush3.bf16.msra.mxu1 %v1216_v31  ;;  %1139 = vmatprep.subr.bf16.mxu0 %v1270_v34 }
  0x22   :  { %1175 = vmatprep.subr.bf16.mxu1 %v1270_v34 }
  0x23   :  { %582 = vmatmul.mubr.bf16.vlgmr.msra.gmra.mxu0 %v1217_v32 }
  0x24   :  { %671 = vmatmul.mubr.bf16.vlgmr.msra.gmra.mxu1 %v1220_v35  ;;  %1140 = vmatpush3.bf16.msra.mxu0 %v1223_v37 }
  0x25   :  { %589 = vmatprep.mubr.bf16.mxu0 %v1224_v38  ;;  %1179 = vmatpush3.bf16.msra.mxu1 %v1223_v37 }
  0x26   :  { %678 = vmatprep.mubr.bf16.mxu1 %v1226_v39  ;;  %1141 = vmatprep.subr.bf16.mxu0 %v1270_v34 }
  0x27   :  { %1176 = vmatprep.subr.bf16.mxu1 %v1270_v34 }
  0x28   :  { %1142 = vmatpush3.bf16.msra.mxu0 %v1234_v43 }
  0x29   :  { %1180 = vmatpush3.bf16.msra.mxu1 %v1234_v43  ;;  %1143 = vmatprep.subr.bf16.mxu0 %v1270_v34 }
  0x2a   :  { %1177 = vmatprep.subr.bf16.mxu1 %v1270_v34 }
  0x2b   :  { %590 = vmatmul.mubr.bf16.gmra.mxu0 %v1228_v40 }
  0x2c   :  { %679 = vmatmul.mubr.bf16.gmra.mxu1 %v1229_v41  ;;  %597 = vmatprep.mubr.bf16.mxu0 %v1230_v42 }
  0x2d   :  { %686 = vmatprep.mubr.bf16.mxu1 %v1232_v44  ;;  %1144 = vmatpush3.bf16.msra.mxu0 %v1243_v45 }
  0x2e   :  { %1181 = vmatpush3.bf16.msra.mxu1 %v1243_v45  ;;  %1145 = vmatprep.subr.bf16.mxu0 %v1270_v34 }
  0x2f   :  { %1178 = vmatprep.subr.bf16.mxu1 %v1270_v34 }
  0x31   :  { %1146 = vmatpush3.bf16.msra.mxu0 %v1256_v50 }
  0x32   :  { %1182 = vmatpush3.bf16.msra.mxu1 %v1256_v50 }
  0x33   :  { %598 = vmatmul.mubr.bf16.gmra.mxu0 %v1235_v46 }
  0x34   :  { %687 = vmatmul.mubr.bf16.gmra.mxu1 %v1236_v47  ;;  %605 = vmatprep.mubr.bf16.mxu0 %v1237_v48 }
  0x35   :  { %694 = vmatprep.mubr.bf16.mxu1 %v1239_v49 }
  0x3b   :  { %606 = vmatmul.mubr.bf16.gmra.mxu0 %v1241_v51 }
  0x3c   :  { %695 = vmatmul.mubr.bf16.gmra.mxu1 %v1242_v52  ;;  %613 = vmatprep.mubr.bf16.mxu0 %v1244_v53 }
  0x3d   :  { %702 = vmatprep.mubr.bf16.mxu1 %v1246_v54 }
  0x43   :  { %614 = vmatmul.mubr.bf16.gmra.mxu0 %v1248_v55 }
  0x44   :  { %703 = vmatmul.mubr.bf16.gmra.mxu1 %v1249_v56  ;;  %621 = vmatprep.mubr.bf16.mxu0 %v1250_v57  ;;  %v1581_v57 = vld [vmem:[%s1695_s2] ss:$0 sm:$0xff] }
  0x45   :  { %710 = vmatprep.mubr.bf16.mxu1 %v1252_v58 }
  0x4b   :  { %622 = vmatmul.mubr.bf16.gmra.mxu0 %v1254_v59 }
  0x4c   :  { %711 = vmatmul.mubr.bf16.gmra.mxu1 %v1255_v60  ;;  %629 = vmatprep.mubr.bf16.mxu0 %v1257_v61 }
  0x4d   :  { %718 = vmatprep.mubr.bf16.mxu1 %v1259_v62 }
  0x53   :  { %630 = vmatmul.mubr.bf16.gmra.mxu0 %v1261_v63 }
  0x54   :  { %719 = vmatmul.mubr.bf16.gmra.mxu1 %v1262_v0  ;;  %1147 = vmatprep.mubr.msk.bf16.mxu0 %vm1271_vm0, %v1270_v34 }
  0x55   :  { %1163 = vmatprep.mubr.msk.bf16.mxu1 %vm1271_vm0, %v1270_v34 }
  0x5b   :  { %1148 = vmatmul.mubr.msk.bf16.vlgmr.msra.gmra.mxu0 %vm527_vm1, %v1263_v1 }
  0x5c   :  { %1164 = vmatmul.mubr.msk.bf16.vlgmr.msra.gmra.mxu1 %vm527_vm1, %v1264_v2  ;;  %1151 = vmatprep.mubr.msk.bf16.mxu0 %vm1271_vm0, %v1270_v34 }
  0x5d   :  { %1167 = vmatprep.mubr.msk.bf16.mxu1 %vm1271_vm0, %v1270_v34 }
  0x63   :  { %1152 = vmatmul.mubr.msk.bf16.gmra.mxu0 %vm527_vm1, %v1265_v3 }
  0x64   :  { %1168 = vmatmul.mubr.msk.bf16.gmra.mxu1 %vm527_vm1, %v1266_v4  ;;  %1155 = vmatprep.mubr.msk.bf16.mxu0 %vm1271_vm0, %v1270_v34 }
  0x65   :  { %1171 = vmatprep.mubr.msk.bf16.mxu1 %vm1271_vm0, %v1270_v34 }
  0x6b   :  { %1156 = vmatmul.mubr.msk.bf16.gmra.mxu0 %vm527_vm1, %v1267_v5 }
  0x6c   :  { %1172 = vmatmul.mubr.msk.bf16.gmra.mxu1 %vm527_vm1, %v1268_v6  ;;  %1159 = vmatprep.mubr.msk.bf16.mxu0 %vm1271_vm0, %v1270_v34 }
  0x73   :  { %1160 = vmatmul.mubr.msk.bf16.gmra.mxu0 %vm527_vm1, %v1269_v7 }
  0xe3   :  { %v1028_v8 = vpop.f32.mrf.mxu0 }
  0xe4   :  { %v1086_v9 = vpop.f32.mrf.mxu1 }
  0xe5   :  { %v1029_v10 = vpop.f32.mrf.mxu0 }
  0xe6   :  { %v1087_v11 = vpop.f32.mrf.mxu1  ;;  %v1030_v55 = vadd.f32 %v1029_v10, %v1028_v8 }
  0xe7   :  { %v1031_v12 = vpop.f32.mrf.mxu0  ;;  %v1088_v63 = vadd.f32 %v1087_v11, %v1086_v9 }
  0xe8   :  { %v1089_v13 = vpop.f32.mrf.mxu1  ;;  %v584_v62 = vadd.f32 %v1030_v55, %v1581_v57 }
  0xe9   :  { %v1032_v14 = vpop.f32.mrf.mxu0 }
  0xea   :  { %v1090_v15 = vpop.f32.mrf.mxu1  ;;  %v1033_v0 = vadd.f32 %v1032_v14, %v1031_v12  ;;  %v673_v9 = vadd.f32 %v1088_v63, %v584_v62 }
  0xeb   :  { %v1034_v16 = vpop.f32.mrf.mxu0 }
  0xec   :  { %v1534_v17 = vpop.f32.mrf.mxu1  ;;  %v587_v10 = vadd.f32 %v1033_v0, %v1581_v57 }
  0xed   :  { %v1035_v18 = vpop.f32.mrf.mxu0 }
  0xee   :  { %v1536_v19 = vpop.f32.mrf.mxu1  ;;  %v1036_v6 = vadd.f32 %v1035_v18, %v1034_v16 }
  0xef   :  { %v1538_v20 = vpop.f32.mrf.mxu0  ;;  %v1094_v16 = vadd.f32 %v1536_v19, %v1534_v17 }
  0xf0   :  { %v1540_v21 = vpop.f32.mrf.mxu1 }
  0xf1   :  { %v1542_v22 = vpop.f32.mrf.mxu0 }
  0xf2   :  { %v1544_v23 = vpop.f32.mrf.mxu1 }
  0xf3   :  { %v1546_v24 = vpop.f32.mrf.mxu0 }
  0xf4   :  { %v1548_v25 = vpop.f32.mrf.mxu1 }
  0xf5   :  { %v1550_v26 = vpop.f32.mrf.mxu0 }
  0xf6   :  { %v1552_v27 = vpop.f32.mrf.mxu1 }
  0xf7   :  { %v1554_v28 = vpop.f32.mrf.mxu0 }
  0xf8   :  { %v1556_v29 = vpop.f32.mrf.mxu1 }
  0xf9   :  { %v1558_v30 = vpop.f32.mrf.mxu0 }
  0xfa   :  { %v1560_v31 = vpop.f32.mrf.mxu1 }
  0xfb   :  { %v1562_v32 = vpop.f32.mrf.mxu0 }
  0xfc   :  { %v1564_v33 = vpop.f32.mrf.mxu1 }
  0xfd   :  { %v1566_v34 = vpop.f32.mrf.mxu0 }
  0xfe   :  { %v1568_v35 = vpop.f32.mrf.mxu1 }
  0xff   :  { %v1570_v36 = vpop.f32.mrf.mxu0 }
 0x100   :  { %v1572_v37 = vpop.f32.mrf.mxu1 }
 0x101   :  { %v1574_v38 = vpop.f32.mrf.mxu0 }
 0x102   :  { %v1576_v39 = vpop.f32.mrf.mxu1 }
 0x103   :  { %v1052_v40 = vpop.f32.mrf.mxu0 }
 0x104   :  { %v1110_v41 = vpop.f32.mrf.mxu1 }
 0x105   :  { %v1053_v42 = vpop.f32.mrf.mxu0 }
 0x106   :  { %v1111_v43 = vpop.f32.mrf.mxu1  ;;  %v1054_v58 = vadd.f32 %v1053_v42, %v1052_v40  ;;  %v1091_v40 = vadd.f32 %v1090_v15, %v1089_v13 }
 0x107   :  { %v1055_v44 = vpop.f32.mrf.mxu0  ;;  %v1112_v3 = vadd.f32 %v1111_v43, %v1110_v41  ;;  %v592_v43 = vadd.f32 %v1036_v6, %v1581_v57 }
 0x108   :  { %v1113_v45 = vpop.f32.mrf.mxu1  ;;  %v616_v2 = vadd.f32 %v1054_v58, %v1581_v57 }
 0x109   :  { %v1056_v46 = vpop.f32.mrf.mxu0 }
 0x10a   :  { %v1114_v47 = vpop.f32.mrf.mxu1  ;;  %v1057_v4 = vadd.f32 %v1056_v46, %v1055_v44  ;;  %v705_v41 = vadd.f32 %v1112_v3, %v616_v2  ;;  %v1039_v46 = vadd.f32 %v1542_v22, %v1538_v20  ;;  %v1097_v20 = vadd.f32 %v1544_v23, %v1540_v21 }
 0x10b   :  { %v1058_v48 = vpop.f32.mrf.mxu0  ;;  %v1115_v12 = vadd.f32 %v1114_v47, %v1113_v45  ;;  %v676_v45 = vadd.f32 %v1091_v40, %v587_v10  ;;  %v1042_v10 = vadd.f32 %v1550_v26, %v1546_v24 }
 0x10c   :  { %v1116_v49 = vpop.f32.mrf.mxu1  ;;  %v619_v11 = vadd.f32 %v1057_v4, %v1581_v57  ;;  %v681_v4 = vadd.f32 %v1094_v16, %v592_v43  ;;  %v595_v6 = vadd.f32 %v1039_v46, %v1581_v57 }
 0x10d   :  { %v1059_v50 = vpop.f32.mrf.mxu0 }
 0x10e   :  { %v1117_v51 = vpop.f32.mrf.mxu1  ;;  %v1060_v14 = vadd.f32 %v1059_v50, %v1058_v48  ;;  %v708_v2 = vadd.f32 %v1115_v12, %v619_v11  ;;  %v684_v43 = vadd.f32 %v1097_v20, %v595_v6 }
 0x10f   :  { %v1061_v52 = vpop.f32.mrf.mxu0  ;;  %v1118_v48 = vadd.f32 %v1117_v51, %v1116_v49 }
 0x110   :  { %v1119_v53 = vpop.f32.mrf.mxu1  ;;  %v624_v47 = vadd.f32 %v1060_v14, %v1581_v57 }
 0x111   :  { %v1062_v54 = vpop.f32.mrf.mxu0 }
 0x112   :  { %v1120_v56 = vpop.f32.mrf.mxu1  ;;  %v1063_v58 = vadd.f32 %v1062_v54, %v1061_v52  ;;  %v713_v12 = vadd.f32 %v1118_v48, %v624_v47 }
 0x113   :  { %v1064_v59 = vpop.f32.mrf.mxu0  ;;  %v1121_v51 = vadd.f32 %v1120_v56, %v1119_v53  ;;  %v1045_v53 = vadd.f32 %v1558_v30, %v1554_v28 }
 0x114   :  { %v1583_v60 = vpop.f32.mrf.mxu1  ;;  %v627_v49 = vadd.f32 %v1063_v58, %v1581_v57 }
 0x115   :  { %v1065_v61 = vpop.f32.mrf.mxu0 }
 0x116   :  { %v1586_v1 = vpop.f32.mrf.mxu1  ;;  %v1066_v11 = vadd.f32 %v1065_v61, %v1064_v59  ;;  %v600_v59 = vadd.f32 %v1042_v10, %v1581_v57  ;;  %v1100_v61 = vadd.f32 %v1552_v27, %v1548_v25 }
 0x117   :  { %v1589_v5 = vpop.f32.mrf.mxu0  ;;  %v1124_v28 = vadd.f32 %v1586_v1, %v1583_v60 }
 0x118   :  { %v1591_v7 = vpop.f32.mrf.mxu1  ;;  %v632_v46 = vadd.f32 %v1066_v11, %v1581_v57  ;;  %v689_v48 = vadd.f32 %v1100_v61, %v600_v59  ;;  %v1109_v11 = vadd.f32 %v1576_v39, %v1572_v37 }
 0x119   :  { %v1593_v8 = vpop.f32.mrf.mxu0 }
 0x11a   :  { %v1596_v42 = vpop.f32.mrf.mxu1  ;;  %v1069_v30 = vadd.f32 %v1593_v8, %v1589_v5  ;;  %v1048_v5 = vadd.f32 %v1566_v34, %v1562_v32  ;;  %v721_v32 = vadd.f32 %v1124_v28, %v632_v46 }
 0x11b   :  { %v761_v55 = vpop.f32.mrf.mxu0 }
 0x11c   :  { %v762_v18 = vadd.f32 %v761_v55, %v673_v9  ;;  %v793_v44 = vpop.f32.mrf.mxu1  ;;  %v608_v20 = vadd.f32 %v1048_v5, %v1581_v57 }
 0x11d   :  { %v794_v13 = vadd.f32 %v793_v44, %v705_v41  ;;  %v1149_v15 = vpop.f32.mrf.mxu0  ;;  %v716_v44 = vadd.f32 %v1121_v51, %v627_v49 }
 0x11e   :  { %v816_v62 = vmax.f32 %v762_v18, 0.0  ;;  %v1165_v63 = vpop.f32.mrf.mxu1 }
 0x11f   :  { %v824_v50 = vmax.f32 %v794_v13, 0.0  ;;  %v764_v0 = vpop.f32.mrf.mxu0  ;;  %v1103_v63 = vadd.f32 %v1560_v31, %v1556_v29 }
 0x120   :  { %v998_v3 = vpack.c.bf16 %v816_v62, %v816_v62  ;;  %v765_v17 = vadd.f32 %v764_v0, %v676_v45  ;;  %v796_v19 = vpop.f32.mrf.mxu1  ;;  %v603_v62 = vadd.f32 %v1045_v53, %v1581_v57  ;;  %v1127_v0 = vadd.f32 %v1596_v42, %v1591_v7 }
 0x121   :  { %v1006_v22 = vpack.c.bf16 %v824_v50, %v824_v50  ;;  %v797_v52 = vadd.f32 %v796_v19, %v708_v2  ;;  %v1150_v54 = vpop.f32.mrf.mxu0  ;;  %v635_v50 = vadd.f32 %v1069_v30, %v1581_v57  ;;  %v1106_v7 = vadd.f32 %v1568_v35, %v1564_v33 }
 0x122   :  { %887 = vst.msk [vmem:[%s1696_s3] sm:$0xf] %vm886_vm2, %v998_v3  ;;  %v817_v40 = vmax.f32 %v765_v17, 0.0  ;;  %v1166_v9 = vpop.f32.mrf.mxu1  ;;  %v692_v6 = vadd.f32 %v1103_v63, %v603_v62  ;;  %v1051_v42 = vadd.f32 %v1574_v38, %v1570_v36 }
 0x123   :  { %895 = vst.msk [vmem:[%s1696_s3 + $0x20] sm:$0xf] %vm886_vm2, %v1006_v22  ;;  %v825_v21 = vmax.f32 %v797_v52, 0.0  ;;  %v769_v23 = vpop.f32.mrf.mxu0  ;;  %v724_v49 = vadd.f32 %v1127_v0, %v635_v50 }
 0x124   :  { %v999_v24 = vpack.c.bf16 %v817_v40, %v817_v40  ;;  %v770_v26 = vadd.f32 %v769_v23, %v681_v4  ;;  %v801_v14 = vpop.f32.mrf.mxu1  ;;  %v611_v9 = vadd.f32 %v1051_v42, %v1581_v57  ;;  %v697_v23 = vadd.f32 %v1106_v7, %v608_v20 }
 0x125   :  { %v1007_v56 = vpack.c.bf16 %v825_v21, %v825_v21  ;;  %v802_v55 = vadd.f32 %v801_v14, %v713_v12  ;;  %v1153_v41 = vpop.f32.mrf.mxu0 }
 0x126   :  { %888 = vst.msk [vmem:[%s1696_s3 + $0x4] sm:$0xf] %vm886_vm2, %v999_v24  ;;  %v818_v16 = vmax.f32 %v770_v26, 0.0  ;;  %v1169_v18 = vpop.f32.mrf.mxu1  ;;  %v700_v39 = vadd.f32 %v1109_v11, %v611_v9 }
 0x127   :  { %896 = vst.msk [vmem:[%s1696_s3 + $0x24] sm:$0xf] %vm886_vm2, %v1007_v56  ;;  %v826_v25 = vmax.f32 %v802_v55, 0.0  ;;  %v772_v27 = vpop.f32.mrf.mxu0 }
 0x128   :  { %v1000_v13 = vpack.c.bf16 %v818_v16, %v818_v16  ;;  %v773_v15 = vadd.f32 %v772_v27, %v684_v43  ;;  %v804_v58 = vpop.f32.mrf.mxu1 }
 0x129   :  { %v1008_v45 = vpack.c.bf16 %v826_v25, %v826_v25  ;;  %v805_v60 = vadd.f32 %v804_v58, %v716_v44  ;;  %v1154_v1 = vpop.f32.mrf.mxu0 }
 0x12a   :  { %889 = vst.msk [vmem:[%s1696_s3 + $0x8] sm:$0xf] %vm886_vm2, %v1000_v13  ;;  %v819_v8 = vmax.f32 %v773_v15, 0.0  ;;  %v1170_v47 = vpop.f32.mrf.mxu1 }
 0x12b   :  { %897 = vst.msk [vmem:[%s1696_s3 + $0x28] sm:$0xf] %vm886_vm2, %v1008_v45  ;;  %v827_v29 = vmax.f32 %v805_v60, 0.0  ;;  %v777_v31 = vpop.f32.mrf.mxu0 }
 0x12c   :  { %v1001_v34 = vpack.c.bf16 %v819_v8, %v819_v8  ;;  %v778_v2 = vadd.f32 %v777_v31, %v689_v48  ;;  %v809_v3 = vpop.f32.mrf.mxu1 }
 0x12d   :  { %v1009_v17 = vpack.c.bf16 %v827_v29, %v827_v29  ;;  %v810_v19 = vadd.f32 %v809_v3, %v721_v32  ;;  %v1157_v4 = vpop.f32.mrf.mxu0 }
 0x12e   :  { %890 = vst.msk [vmem:[%s1696_s3 + $0xc] sm:$0xf] %vm886_vm2, %v1001_v34  ;;  %v820_v22 = vmax.f32 %v778_v2, 0.0  ;;  %v1173_v52 = vpop.f32.mrf.mxu1 }
 0x12f   :  { %898 = vst.msk [vmem:[%s1696_s3 + $0x2c] sm:$0xf] %vm886_vm2, %v1009_v17  ;;  %v828_v54 = vmax.f32 %v810_v19, 0.0  ;;  %v780_v10 = vpop.f32.mrf.mxu0 }
 0x130   :  { %v1002_v51 = vpack.c.bf16 %v820_v22, %v820_v22  ;;  %v781_v33 = vadd.f32 %v780_v10, %v692_v6  ;;  %v812_v35 = vpop.f32.mrf.mxu1 }
 0x131   :  { %v1010_v40 = vpack.c.bf16 %v828_v54, %v828_v54  ;;  %v813_v36 = vadd.f32 %v812_v35, %v724_v49  ;;  %v1158_v38 = vpop.f32.mrf.mxu0 }
 0x132   :  { %891 = vst.msk [vmem:[%s1696_s3 + $0x10] sm:$0xf] %vm886_vm2, %v1002_v51  ;;  %v821_v21 = vmax.f32 %v781_v33, 0.0  ;;  %v1174_v12 = vpop.f32.mrf.mxu1 }
 0x133   :  { %899 = vst.msk [vmem:[%s1696_s3 + $0x30] sm:$0xf] %vm886_vm2, %v1010_v40  ;;  %v829_v24 = vmax.f32 %v813_v36, 0.0  ;;  %v785_v26 = vpop.f32.mrf.mxu0 }
 0x134   :  { %v1003_v14 = vpack.c.bf16 %v821_v21, %v821_v21  ;;  %v786_v57 = vadd.f32 %v785_v26, %v697_v23 }
 0x135   :  { %v1011_v53 = vpack.c.bf16 %v829_v24, %v829_v24  ;;  %v1161_v56 = vpop.f32.mrf.mxu0 }
 0x136   :  { %892 = vst.msk [vmem:[%s1696_s3 + $0x14] sm:$0xf] %vm886_vm2, %v1003_v14  ;;  %v822_v37 = vmax.f32 %v786_v57, 0.0 }
 0x137   :  { %900 = vst.msk [vmem:[%s1696_s3 + $0x34] sm:$0xf] %vm886_vm2, %v1011_v53  ;;  %v788_v55 = vpop.f32.mrf.mxu0 }
 0x138   :  { %v1004_v41 = vpack.c.bf16 %v822_v37, %v822_v37  ;;  %v789_v43 = vadd.f32 %v788_v55, %v700_v39 }
 0x139   :  { %v1162_v59 = vpop.f32.mrf.mxu0 }
 0x13a   :  { %893 = vst.msk [vmem:[%s1696_s3 + $0x18] sm:$0xf] %vm886_vm2, %v1004_v41  ;;  %v823_v61 = vmax.f32 %v789_v43, 0.0 }
 0x13c   :  { %v1005_v16 = vpack.c.bf16 %v823_v61, %v823_v61 }
 0x13e   :  { %894 = vst.msk [vmem:[%s1696_s3 + $0x1c] sm:$0xf] %vm886_vm2, %v1005_v16 }

// kernel: dqn_forward.7
= control target key start
LH: loop header
LB: loop body
LE: loop exit
PB: predicated region body
PF: predicated region fallthrough
CT: control target
= control target key end

     0   :  { %vm4898_vm0 = vcmask 523264   ;;  %s11334_s1 = inlined_call_operand.vmem [shape: bf16[3136,512], index: 1, kind: input, shape index: {}]   ;;  %s11335_s0 = inlined_call_operand.vmem [shape: bf16[16,3136], index: 0, kind: input, shape index: {}]   ;;  %s11336_s3 = inlined_call_operand.vmem [shape: bf16[512,128], index: 3, kind: input, shape index: {}]   ;;  %s11337_s2 = inlined_call_operand.vmem [shape: f32[1,512], index: 2, kind: input, shape index: {}]   ;;  %s11338_s4 = inlined_call_operand.vmem [shape: f32[1,128], index: 4, kind: input, shape index: {}]   ;;  %s11339_s5 = inlined_call_operand.vmem [shape: f32[16,128], index: 5, kind: output, shape index: {}]  }
   0x1   :  { %v7272_v0 = vld [vmem:[%s11334_s1 + $0xe4] ss:$16 sps:$4 sm:$0xff]   ;;  %v7276_v2 = vld [vmem:[%s11334_s1 + $0xe0] ss:$16 sps:$4 sm:$0xff]  }
   0x2   :  { %v7274_v1 = vld [vmem:[%s11334_s1 + $0x2e4] ss:$16 sps:$4 sm:$0xff]   ;;  %4902 = vmatprep.subr.bf16.mxu0 %v7272_v0  ;;  %v7277_v3 = vld [vmem:[%s11334_s1 + $0x2e0] ss:$16 sps:$4 sm:$0xff]  }
   0x3   :  { %4945 = vmatprep.subr.bf16.mxu1 %v7274_v1  ;;  %v7278_v4 = vld [vmem:[%s11334_s1 + $0xc4] ss:$16 sps:$4 sm:$0xff]   ;;  %4903 = vmatpush1.bf16.msra.mxu0 %v7276_v2  ;;  %v7282_v6 = vld [vmem:[%s11334_s1 + $0xc0] ss:$16 sps:$4 sm:$0xff]  }
   0x4   :  { %4946 = vmatpush1.bf16.msra.mxu1 %v7277_v3  ;;  %v7280_v5 = vld [vmem:[%s11334_s1 + $0x2c4] ss:$16 sps:$4 sm:$0xff]   ;;  %4904 = vmatprep.subr.bf16.mxu0 %v7278_v4  ;;  %v7283_v7 = vld [vmem:[%s11334_s1 + $0x2c0] ss:$16 sps:$4 sm:$0xff]  }
   0x5   :  { %4947 = vmatprep.subr.bf16.mxu1 %v7280_v5  ;;  %v7284_v8 = vld [vmem:[%s11334_s1 + $0xa4] ss:$16 sps:$4 sm:$0xff]   ;;  %v7288_v10 = vld [vmem:[%s11334_s1 + $0xa0] ss:$16 sps:$4 sm:$0xff]   ;;  %v7371_v5 = vld [vmem:[%s11335_s0 + $0x8] ss:$100 sps:$4 sm:$0xff]  }
   0x6   :  { %v7286_v9 = vld [vmem:[%s11334_s1 + $0x2a4] ss:$16 sps:$4 sm:$0xff]   ;;  %v7289_v11 = vld [vmem:[%s11334_s1 + $0x2a0] ss:$16 sps:$4 sm:$0xff]  }
   0x7   :  { %4905 = vmatpush1.bf16.msra.mxu0 %v7282_v6  ;;  %v7290_v12 = vld [vmem:[%s11334_s1 + $0x84] ss:$16 sps:$4 sm:$0xff]   ;;  %v7294_v14 = vld [vmem:[%s11334_s1 + $0x80] ss:$16 sps:$4 sm:$0xff]  }
   0x8   :  { %4948 = vmatpush1.bf16.msra.mxu1 %v7283_v7  ;;  %4906 = vmatprep.subr.bf16.mxu0 %v7284_v8  ;;  %v7292_v13 = vld [vmem:[%s11334_s1 + $0x284] ss:$16 sps:$4 sm:$0xff]   ;;  %v7295_v15 = vld [vmem:[%s11334_s1 + $0x280] ss:$16 sps:$4 sm:$0xff]  }
   0x9   :  { %4949 = vmatprep.subr.bf16.mxu1 %v7286_v9  ;;  %v7296_v16 = vld [vmem:[%s11334_s1 + $0x64] ss:$16 sps:$4 sm:$0xff]   ;;  %v7300_v18 = vld [vmem:[%s11334_s1 + $0x60] ss:$16 sps:$4 sm:$0xff]  }
   0xa   :  { %v7298_v17 = vld [vmem:[%s11334_s1 + $0x264] ss:$16 sps:$4 sm:$0xff]   ;;  %v7301_v19 = vld [vmem:[%s11334_s1 + $0x260] ss:$16 sps:$4 sm:$0xff]  }
   0xb   :  { %4907 = vmatpush1.bf16.msra.mxu0 %v7288_v10  ;;  %v7302_v20 = vld [vmem:[%s11334_s1 + $0x44] ss:$16 sps:$4 sm:$0xff]   ;;  %v7306_v22 = vld [vmem:[%s11334_s1 + $0x40] ss:$16 sps:$4 sm:$0xff]  }
   0xc   :  { %4950 = vmatpush1.bf16.msra.mxu1 %v7289_v11  ;;  %4908 = vmatprep.subr.bf16.mxu0 %v7290_v12  ;;  %v7304_v21 = vld [vmem:[%s11334_s1 + $0x244] ss:$16 sps:$4 sm:$0xff]   ;;  %v7307_v23 = vld [vmem:[%s11334_s1 + $0x240] ss:$16 sps:$4 sm:$0xff]  }
   0xd   :  { %4951 = vmatprep.subr.bf16.mxu1 %v7292_v13  ;;  %v7308_v24 = vld [vmem:[%s11334_s1 + $0x24] ss:$16 sps:$4 sm:$0xff]   ;;  %v7312_v26 = vld [vmem:[%s11334_s1 + $0x20] ss:$16 sps:$4 sm:$0xff]  }
   0xe   :  { %v7310_v25 = vld [vmem:[%s11334_s1 + $0x224] ss:$16 sps:$4 sm:$0xff]   ;;  %v7313_v27 = vld [vmem:[%s11334_s1 + $0x220] ss:$16 sps:$4 sm:$0xff]  }
   0xf   :  { %4909 = vmatpush1.bf16.msra.mxu0 %v7294_v14  ;;  %v7314_v28 = vld [vmem:[%s11334_s1 + $0x4] ss:$16 sps:$4 sm:$0xff]   ;;  %v7318_v30 = vld [vmem:[%s11334_s1] ss:$16 sps:$4 sm:$0xff]  }
  0x10   :  { %4952 = vmatpush1.bf16.msra.mxu1 %v7295_v15  ;;  %4910 = vmatprep.subr.bf16.mxu0 %v7296_v16  ;;  %v7316_v29 = vld [vmem:[%s11334_s1 + $0x204] ss:$16 sps:$4 sm:$0xff]   ;;  %v7319_v31 = vld [vmem:[%s11334_s1 + $0x200] ss:$16 sps:$4 sm:$0xff]  }
  0x11   :  { %4953 = vmatprep.subr.bf16.mxu1 %v7298_v17  ;;  %v7320_v32 = vld [vmem:[%s11334_s1 + $0x1e4] ss:$16 sps:$4 sm:$0xff]   ;;  %v7324_v34 = vld [vmem:[%s11334_s1 + $0x1e0] ss:$16 sps:$4 sm:$0xff]  }
  0x12   :  { %v7322_v33 = vld [vmem:[%s11334_s1 + $0x3e4] ss:$16 sps:$4 sm:$0xff]   ;;  %v7325_v35 = vld [vmem:[%s11334_s1 + $0x3e0] ss:$16 sps:$4 sm:$0xff]  }
  0x13   :  { %4911 = vmatpush1.bf16.msra.mxu0 %v7300_v18  ;;  %v7326_v36 = vld [vmem:[%s11334_s1 + $0x1c4] ss:$16 sps:$4 sm:$0xff]   ;;  %v7330_v38 = vld [vmem:[%s11334_s1 + $0x1c0] ss:$16 sps:$4 sm:$0xff]  }
  0x14   :  { %4954 = vmatpush1.bf16.msra.mxu1 %v7301_v19  ;;  %4912 = vmatprep.subr.bf16.mxu0 %v7302_v20  ;;  %v7328_v37 = vld [vmem:[%s11334_s1 + $0x3c4] ss:$16 sps:$4 sm:$0xff]   ;;  %v7331_v39 = vld [vmem:[%s11334_s1 + $0x3c0] ss:$16 sps:$4 sm:$0xff]  }
  0x15   :  { %4955 = vmatprep.subr.bf16.mxu1 %v7304_v21  ;;  %v7332_v40 = vld [vmem:[%s11334_s1 + $0x1a4] ss:$16 sps:$4 sm:$0xff]   ;;  %v7336_v42 = vld [vmem:[%s11334_s1 + $0x1a0] ss:$16 sps:$4 sm:$0xff]  }
  0x16   :  { %v7334_v41 = vld [vmem:[%s11334_s1 + $0x3a4] ss:$16 sps:$4 sm:$0xff]   ;;  %v7337_v43 = vld [vmem:[%s11334_s1 + $0x3a0] ss:$16 sps:$4 sm:$0xff]  }
  0x17   :  { %4913 = vmatpush1.bf16.msra.mxu0 %v7306_v22  ;;  %v7338_v44 = vld [vmem:[%s11334_s1 + $0x184] ss:$16 sps:$4 sm:$0xff]   ;;  %v7342_v46 = vld [vmem:[%s11334_s1 + $0x180] ss:$16 sps:$4 sm:$0xff]  }
  0x18   :  { %4956 = vmatpush1.bf16.msra.mxu1 %v7307_v23  ;;  %4914 = vmatprep.subr.bf16.mxu0 %v7308_v24  ;;  %v7340_v45 = vld [vmem:[%s11334_s1 + $0x384] ss:$16 sps:$4 sm:$0xff]   ;;  %v7343_v47 = vld [vmem:[%s11334_s1 + $0x380] ss:$16 sps:$4 sm:$0xff]  }
  0x19   :  { %4957 = vmatprep.subr.bf16.mxu1 %v7310_v25  ;;  %v7344_v48 = vld [vmem:[%s11334_s1 + $0x164] ss:$16 sps:$4 sm:$0xff]   ;;  %v7373_v51 = vld [vmem:[%s11335_s0 + $0xc] ss:$100 sps:$4 sm:$0xff]  }
  0x1a   :  { %v7370_v49 = vld [vmem:[%s11335_s0 + $0x4] ss:$100 sps:$4 sm:$0xff]   ;;  %v7348_v52 = vld [vmem:[%s11334_s1 + $0x160] ss:$16 sps:$4 sm:$0xff]   ;;  %4977 = vmatprep.mubr.bf16.mxu1 %v7373_v51 }
  0x1b   :  { %4915 = vmatpush1.bf16.msra.mxu0 %v7312_v26  ;;  %v7346_v50 = vld [vmem:[%s11334_s1 + $0x364] ss:$16 sps:$4 sm:$0xff]   ;;  %4934 = vmatprep.mubr.bf16.mxu0 %v7370_v49  ;;  %v7349_v53 = vld [vmem:[%s11334_s1 + $0x360] ss:$16 sps:$4 sm:$0xff]  }
  0x1c   :  { %4958 = vmatpush1.bf16.msra.mxu1 %v7313_v27  ;;  %4916 = vmatprep.subr.bf16.mxu0 %v7314_v28  ;;  %v7350_v54 = vld [vmem:[%s11334_s1 + $0x144] ss:$16 sps:$4 sm:$0xff]   ;;  %v7354_v56 = vld [vmem:[%s11334_s1 + $0x140] ss:$16 sps:$4 sm:$0xff]  }
  0x1d   :  { %4959 = vmatprep.subr.bf16.mxu1 %v7316_v29  ;;  %v7352_v55 = vld [vmem:[%s11334_s1 + $0x344] ss:$16 sps:$4 sm:$0xff]   ;;  %v7355_v57 = vld [vmem:[%s11334_s1 + $0x340] ss:$16 sps:$4 sm:$0xff]  }
  0x1e   :  { %v7356_v58 = vld [vmem:[%s11334_s1 + $0x124] ss:$16 sps:$4 sm:$0xff]   ;;  %v7360_v60 = vld [vmem:[%s11334_s1 + $0x120] ss:$16 sps:$4 sm:$0xff]  }
  0x1f   :  { %4917 = vmatpush1.bf16.msra.mxu0 %v7318_v30  ;;  %v7358_v59 = vld [vmem:[%s11334_s1 + $0x324] ss:$16 sps:$4 sm:$0xff]   ;;  %v7361_v61 = vld [vmem:[%s11334_s1 + $0x320] ss:$16 sps:$4 sm:$0xff]  }
  0x20   :  { %4960 = vmatpush1.bf16.msra.mxu1 %v7319_v31  ;;  %4918 = vmatprep.subr.bf16.mxu0 %v7320_v32  ;;  %v7362_v62 = vld [vmem:[%s11334_s1 + $0x104] ss:$16 sps:$4 sm:$0xff]   ;;  %v7366_v0 = vld [vmem:[%s11334_s1 + $0x100] ss:$16 sps:$4 sm:$0xff]  }
  0x21   :  { %4961 = vmatprep.subr.bf16.mxu1 %v7322_v33  ;;  %v7364_v63 = vld [vmem:[%s11334_s1 + $0x304] ss:$16 sps:$4 sm:$0xff]   ;;  %v7367_v1 = vld [vmem:[%s11334_s1 + $0x300] ss:$16 sps:$4 sm:$0xff]  }
  0x22   :  { %v7376_v2 = vld [vmem:[%s11334_s1 + $0x4e4] ss:$16 sps:$4 sm:$0xff]   ;;  %v7374_v6 = vld [vmem:[%s11334_s1 + $0x4e0] ss:$16 sps:$4 sm:$0xff]  }
  0x23   :  { %4919 = vmatpush2.bf16.msra.mxu0 %v7324_v34  ;;  %v7379_v3 = vld [vmem:[%s11334_s1 + $0x6e4] ss:$16 sps:$4 sm:$0xff]   ;;  %v7377_v7 = vld [vmem:[%s11334_s1 + $0x6e0] ss:$16 sps:$4 sm:$0xff]  }
  0x24   :  { %4962 = vmatpush2.bf16.msra.mxu1 %v7325_v35  ;;  %4920 = vmatprep.subr.bf16.mxu0 %v7326_v36  ;;  %v7368_v4 = vld [vmem:[%s11335_s0] ss:$100 sps:$4 sm:$0xff]   ;;  %v7472_v34 = vld [vmem:[%s11335_s0 + $0x14] ss:$100 sps:$4 sm:$0xff]  }
  0x25   :  { %4963 = vmatprep.subr.bf16.mxu1 %v7328_v37  ;;  %v7382_v8 = vld [vmem:[%s11334_s1 + $0x4c4] ss:$16 sps:$4 sm:$0xff]   ;;  %v7380_v10 = vld [vmem:[%s11334_s1 + $0x4c0] ss:$16 sps:$4 sm:$0xff]  }
  0x26   :  { %v7385_v9 = vld [vmem:[%s11334_s1 + $0x6c4] ss:$16 sps:$4 sm:$0xff]   ;;  %v7383_v11 = vld [vmem:[%s11334_s1 + $0x6c0] ss:$16 sps:$4 sm:$0xff]  }
  0x27   :  { %4921 = vmatpush2.bf16.msra.mxu0 %v7330_v38  ;;  %v7388_v12 = vld [vmem:[%s11334_s1 + $0x4a4] ss:$16 sps:$4 sm:$0xff]   ;;  %v7386_v14 = vld [vmem:[%s11334_s1 + $0x4a0] ss:$16 sps:$4 sm:$0xff]  }
  0x28   :  { %4964 = vmatpush2.bf16.msra.mxu1 %v7331_v39  ;;  %4922 = vmatprep.subr.bf16.mxu0 %v7332_v40  ;;  %v7391_v13 = vld [vmem:[%s11334_s1 + $0x6a4] ss:$16 sps:$4 sm:$0xff]   ;;  %v7389_v15 = vld [vmem:[%s11334_s1 + $0x6a0] ss:$16 sps:$4 sm:$0xff]  }
  0x29   :  { %4965 = vmatprep.subr.bf16.mxu1 %v7334_v41  ;;  %v7394_v16 = vld [vmem:[%s11334_s1 + $0x484] ss:$16 sps:$4 sm:$0xff]   ;;  %v7392_v18 = vld [vmem:[%s11334_s1 + $0x480] ss:$16 sps:$4 sm:$0xff]  }
  0x2a   :  { %v7397_v17 = vld [vmem:[%s11334_s1 + $0x684] ss:$16 sps:$4 sm:$0xff]   ;;  %v7395_v19 = vld [vmem:[%s11334_s1 + $0x680] ss:$16 sps:$4 sm:$0xff]  }
  0x2b   :  { %4923 = vmatpush2.bf16.msra.mxu0 %v7336_v42  ;;  %v7400_v20 = vld [vmem:[%s11334_s1 + $0x464] ss:$16 sps:$4 sm:$0xff]   ;;  %v7398_v22 = vld [vmem:[%s11334_s1 + $0x460] ss:$16 sps:$4 sm:$0xff]  }
  0x2c   :  { %4966 = vmatpush2.bf16.msra.mxu1 %v7337_v43  ;;  %4924 = vmatprep.subr.bf16.mxu0 %v7338_v44  ;;  %v7403_v21 = vld [vmem:[%s11334_s1 + $0x664] ss:$16 sps:$4 sm:$0xff]   ;;  %v7401_v23 = vld [vmem:[%s11334_s1 + $0x660] ss:$16 sps:$4 sm:$0xff]  }
  0x2d   :  { %4967 = vmatprep.subr.bf16.mxu1 %v7340_v45  ;;  %v7406_v24 = vld [vmem:[%s11334_s1 + $0x444] ss:$16 sps:$4 sm:$0xff]   ;;  %v7404_v26 = vld [vmem:[%s11334_s1 + $0x440] ss:$16 sps:$4 sm:$0xff]  }
  0x2e   :  { %v7409_v25 = vld [vmem:[%s11334_s1 + $0x644] ss:$16 sps:$4 sm:$0xff]   ;;  %v7407_v27 = vld [vmem:[%s11334_s1 + $0x640] ss:$16 sps:$4 sm:$0xff]  }
  0x2f   :  { %4925 = vmatpush2.bf16.msra.mxu0 %v7342_v46  ;;  %v7412_v28 = vld [vmem:[%s11334_s1 + $0x424] ss:$16 sps:$4 sm:$0xff]   ;;  %v7410_v30 = vld [vmem:[%s11334_s1 + $0x420] ss:$16 sps:$4 sm:$0xff]  }
  0x30   :  { %4968 = vmatpush2.bf16.msra.mxu1 %v7343_v47  ;;  %4926 = vmatprep.subr.bf16.mxu0 %v7344_v48  ;;  %v7415_v29 = vld [vmem:[%s11334_s1 + $0x624] ss:$16 sps:$4 sm:$0xff]   ;;  %v7413_v31 = vld [vmem:[%s11334_s1 + $0x620] ss:$16 sps:$4 sm:$0xff]  }
  0x31   :  { %4969 = vmatprep.subr.bf16.mxu1 %v7346_v50  ;;  %v7418_v32 = vld [vmem:[%s11334_s1 + $0x404] ss:$16 sps:$4 sm:$0xff]   ;;  %v7475_v35 = vld [vmem:[%s11335_s0 + $0x1c] ss:$100 sps:$4 sm:$0xff]  }
  0x32   :  { %v7421_v33 = vld [vmem:[%s11334_s1 + $0x604] ss:$16 sps:$4 sm:$0xff]   ;;  %v7416_v36 = vld [vmem:[%s11334_s1 + $0x400] ss:$16 sps:$4 sm:$0xff]  }
  0x33   :  { %4927 = vmatpush2.bf16.msra.mxu0 %v7348_v52  ;;  %v7419_v37 = vld [vmem:[%s11334_s1 + $0x600] ss:$16 sps:$4 sm:$0xff]   ;;  %v7424_v38 = vld [vmem:[%s11334_s1 + $0x5e4] ss:$16 sps:$4 sm:$0xff]  }
  0x34   :  { %4970 = vmatpush2.bf16.msra.mxu1 %v7349_v53  ;;  %4928 = vmatprep.subr.bf16.mxu0 %v7350_v54  ;;  %v7427_v39 = vld [vmem:[%s11334_s1 + $0x7e4] ss:$16 sps:$4 sm:$0xff]   ;;  %v7422_v40 = vld [vmem:[%s11334_s1 + $0x5e0] ss:$16 sps:$4 sm:$0xff]  }
  0x35   :  { %4971 = vmatprep.subr.bf16.mxu1 %v7352_v55  ;;  %v7425_v41 = vld [vmem:[%s11334_s1 + $0x7e0] ss:$16 sps:$4 sm:$0xff]   ;;  %v7430_v42 = vld [vmem:[%s11334_s1 + $0x5c4] ss:$16 sps:$4 sm:$0xff]  }
  0x36   :  { %v7433_v43 = vld [vmem:[%s11334_s1 + $0x7c4] ss:$16 sps:$4 sm:$0xff]   ;;  %v7428_v44 = vld [vmem:[%s11334_s1 + $0x5c0] ss:$16 sps:$4 sm:$0xff]  }
  0x37   :  { %4929 = vmatpush2.bf16.msra.mxu0 %v7354_v56  ;;  %v7431_v45 = vld [vmem:[%s11334_s1 + $0x7c0] ss:$16 sps:$4 sm:$0xff]   ;;  %v7436_v46 = vld [vmem:[%s11334_s1 + $0x5a4] ss:$16 sps:$4 sm:$0xff]  }
  0x38   :  { %4972 = vmatpush2.bf16.msra.mxu1 %v7355_v57  ;;  %4930 = vmatprep.subr.bf16.mxu0 %v7356_v58  ;;  %v7439_v47 = vld [vmem:[%s11334_s1 + $0x7a4] ss:$16 sps:$4 sm:$0xff]   ;;  %v7434_v48 = vld [vmem:[%s11334_s1 + $0x5a0] ss:$16 sps:$4 sm:$0xff]  }
  0x39   :  { %4973 = vmatprep.subr.bf16.mxu1 %v7358_v59  ;;  %v7437_v49 = vld [vmem:[%s11334_s1 + $0x7a0] ss:$16 sps:$4 sm:$0xff]   ;;  %v7442_v50 = vld [vmem:[%s11334_s1 + $0x584] ss:$16 sps:$4 sm:$0xff]  }
  0x3a   :  { %v7445_v51 = vld [vmem:[%s11334_s1 + $0x784] ss:$16 sps:$4 sm:$0xff]   ;;  %v7440_v52 = vld [vmem:[%s11334_s1 + $0x580] ss:$16 sps:$4 sm:$0xff]  }
  0x3b   :  { %4931 = vmatpush2.bf16.msra.mxu0 %v7360_v60  ;;  %v7443_v53 = vld [vmem:[%s11334_s1 + $0x780] ss:$16 sps:$4 sm:$0xff]   ;;  %v7448_v54 = vld [vmem:[%s11334_s1 + $0x564] ss:$16 sps:$4 sm:$0xff]  }
  0x3c   :  { %4974 = vmatpush2.bf16.msra.mxu1 %v7361_v61  ;;  %4932 = vmatprep.subr.bf16.mxu0 %v7362_v62  ;;  %v7451_v55 = vld [vmem:[%s11334_s1 + $0x764] ss:$16 sps:$4 sm:$0xff]   ;;  %v7446_v56 = vld [vmem:[%s11334_s1 + $0x560] ss:$16 sps:$4 sm:$0xff]  }
  0x3d   :  { %4975 = vmatprep.subr.bf16.mxu1 %v7364_v63  ;;  %v7449_v57 = vld [vmem:[%s11334_s1 + $0x760] ss:$16 sps:$4 sm:$0xff]   ;;  %v7454_v58 = vld [vmem:[%s11334_s1 + $0x544] ss:$16 sps:$4 sm:$0xff]  }
  0x3e   :  { %v7457_v59 = vld [vmem:[%s11334_s1 + $0x744] ss:$16 sps:$4 sm:$0xff]   ;;  %v7452_v60 = vld [vmem:[%s11334_s1 + $0x540] ss:$16 sps:$4 sm:$0xff]  }
  0x3f   :  { %4933 = vmatpush2.bf16.msra.mxu0 %v7366_v0  ;;  %v7455_v61 = vld [vmem:[%s11334_s1 + $0x740] ss:$16 sps:$4 sm:$0xff]   ;;  %v7460_v62 = vld [vmem:[%s11334_s1 + $0x524] ss:$16 sps:$4 sm:$0xff]  }
  0x40   :  { %4976 = vmatpush2.bf16.msra.mxu1 %v7367_v1  ;;  %4988 = vmatprep.subr.bf16.mxu0 %v7376_v2  ;;  %v7463_v63 = vld [vmem:[%s11334_s1 + $0x724] ss:$16 sps:$4 sm:$0xff]   ;;  %v7458_v0 = vld [vmem:[%s11334_s1 + $0x520] ss:$16 sps:$4 sm:$0xff]  }
  0x41   :  { %5031 = vmatprep.subr.bf16.mxu1 %v7379_v3  ;;  %v7461_v1 = vld [vmem:[%s11334_s1 + $0x720] ss:$16 sps:$4 sm:$0xff]   ;;  %v7466_v2 = vld [vmem:[%s11334_s1 + $0x504] ss:$16 sps:$4 sm:$0xff]  }
  0x42   :  { %4935 = vmatmul.mubr.bf16.vlgmr.msra.gmra.mxu0 %v7368_v4  ;;  %v7469_v3 = vld [vmem:[%s11334_s1 + $0x704] ss:$16 sps:$4 sm:$0xff]   ;;  %v7464_v4 = vld [vmem:[%s11334_s1 + $0x500] ss:$16 sps:$4 sm:$0xff]  }
  0x43   :  { %4978 = vmatmul.mubr.bf16.vlgmr.msra.gmra.mxu1 %v7371_v5  ;;  %4989 = vmatpush1.bf16.msra.mxu0 %v7374_v6  ;;  %v7467_v5 = vld [vmem:[%s11334_s1 + $0x700] ss:$16 sps:$4 sm:$0xff]   ;;  %v7478_v6 = vld [vmem:[%s11334_s1 + $0x8e4] ss:$16 sps:$4 sm:$0xff]  }
  0x44   :  { %5032 = vmatpush1.bf16.msra.mxu1 %v7377_v7  ;;  %4990 = vmatprep.subr.bf16.mxu0 %v7382_v8  ;;  %v7481_v7 = vld [vmem:[%s11334_s1 + $0xae4] ss:$16 sps:$4 sm:$0xff]  }
  0x45   :  { %5033 = vmatprep.subr.bf16.mxu1 %v7385_v9  ;;  %5020 = vmatprep.mubr.bf16.mxu0 %v7472_v34  ;;  %v7470_v8 = vld [vmem:[%s11335_s0 + $0x10] ss:$100 sps:$4 sm:$0xff]   ;;  %v7473_v9 = vld [vmem:[%s11335_s0 + $0x18] ss:$100 sps:$4 sm:$0xff]  }
  0x46   :  { %5063 = vmatprep.mubr.bf16.mxu1 %v7475_v35  ;;  %v7514_v34 = vld [vmem:[%s11334_s1 + $0x824] ss:$16 sps:$4 sm:$0xff]  }
  0x47   :  { %4991 = vmatpush1.bf16.msra.mxu0 %v7380_v10  ;;  %v7476_v10 = vld [vmem:[%s11334_s1 + $0x8e0] ss:$16 sps:$4 sm:$0xff]   ;;  %v7517_v35 = vld [vmem:[%s11334_s1 + $0xa24] ss:$16 sps:$4 sm:$0xff]  }
  0x48   :  { %5034 = vmatpush1.bf16.msra.mxu1 %v7383_v11  ;;  %4992 = vmatprep.subr.bf16.mxu0 %v7388_v12  ;;  %v7479_v11 = vld [vmem:[%s11334_s1 + $0xae0] ss:$16 sps:$4 sm:$0xff]   ;;  %v7484_v12 = vld [vmem:[%s11334_s1 + $0x8c4] ss:$16 sps:$4 sm:$0xff]  }
  0x49   :  { %5035 = vmatprep.subr.bf16.mxu1 %v7391_v13  ;;  %v7487_v13 = vld [vmem:[%s11334_s1 + $0xac4] ss:$16 sps:$4 sm:$0xff]  }
  0x4b   :  { %4993 = vmatpush1.bf16.msra.mxu0 %v7386_v14  ;;  %v7482_v14 = vld [vmem:[%s11334_s1 + $0x8c0] ss:$16 sps:$4 sm:$0xff]  }
  0x4c   :  { %5036 = vmatpush1.bf16.msra.mxu1 %v7389_v15  ;;  %4994 = vmatprep.subr.bf16.mxu0 %v7394_v16  ;;  %v7485_v15 = vld [vmem:[%s11334_s1 + $0xac0] ss:$16 sps:$4 sm:$0xff]   ;;  %v7490_v16 = vld [vmem:[%s11334_s1 + $0x8a4] ss:$16 sps:$4 sm:$0xff]  }
  0x4d   :  { %5037 = vmatprep.subr.bf16.mxu1 %v7397_v17  ;;  %v7493_v17 = vld [vmem:[%s11334_s1 + $0xaa4] ss:$16 sps:$4 sm:$0xff]  }
  0x4f   :  { %4995 = vmatpush1.bf16.msra.mxu0 %v7392_v18  ;;  %v7488_v18 = vld [vmem:[%s11334_s1 + $0x8a0] ss:$16 sps:$4 sm:$0xff]  }
  0x50   :  { %5038 = vmatpush1.bf16.msra.mxu1 %v7395_v19  ;;  %4996 = vmatprep.subr.bf16.mxu0 %v7400_v20  ;;  %v7574_v19 = vld [vmem:[%s11335_s0 + $0x24] ss:$100 sps:$4 sm:$0xff]   ;;  %v7491_v20 = vld [vmem:[%s11334_s1 + $0xaa0] ss:$16 sps:$4 sm:$0xff]  }
  0x51   :  { %5039 = vmatprep.subr.bf16.mxu1 %v7403_v21  ;;  %v7577_v21 = vld [vmem:[%s11335_s0 + $0x2c] ss:$100 sps:$4 sm:$0xff]  }
  0x53   :  { %4997 = vmatpush1.bf16.msra.mxu0 %v7398_v22  ;;  %v7496_v22 = vld [vmem:[%s11334_s1 + $0x884] ss:$16 sps:$4 sm:$0xff]  }
  0x54   :  { %5040 = vmatpush1.bf16.msra.mxu1 %v7401_v23  ;;  %4998 = vmatprep.subr.bf16.mxu0 %v7406_v24  ;;  %v7499_v23 = vld [vmem:[%s11334_s1 + $0xa84] ss:$16 sps:$4 sm:$0xff]   ;;  %v7494_v24 = vld [vmem:[%s11334_s1 + $0x880] ss:$16 sps:$4 sm:$0xff]  }
  0x55   :  { %5041 = vmatprep.subr.bf16.mxu1 %v7409_v25  ;;  %v7497_v25 = vld [vmem:[%s11334_s1 + $0xa80] ss:$16 sps:$4 sm:$0xff]  }
  0x57   :  { %4999 = vmatpush1.bf16.msra.mxu0 %v7404_v26  ;;  %v7502_v26 = vld [vmem:[%s11334_s1 + $0x864] ss:$16 sps:$4 sm:$0xff]  }
  0x58   :  { %5042 = vmatpush1.bf16.msra.mxu1 %v7407_v27  ;;  %5000 = vmatprep.subr.bf16.mxu0 %v7412_v28  ;;  %v7505_v27 = vld [vmem:[%s11334_s1 + $0xa64] ss:$16 sps:$4 sm:$0xff]   ;;  %v7500_v28 = vld [vmem:[%s11334_s1 + $0x860] ss:$16 sps:$4 sm:$0xff]  }
  0x59   :  { %5043 = vmatprep.subr.bf16.mxu1 %v7415_v29  ;;  %v7503_v29 = vld [vmem:[%s11334_s1 + $0xa60] ss:$16 sps:$4 sm:$0xff]  }
  0x5b   :  { %5001 = vmatpush1.bf16.msra.mxu0 %v7410_v30  ;;  %v7508_v30 = vld [vmem:[%s11334_s1 + $0x844] ss:$16 sps:$4 sm:$0xff]  }
  0x5c   :  { %5044 = vmatpush1.bf16.msra.mxu1 %v7413_v31  ;;  %5002 = vmatprep.subr.bf16.mxu0 %v7418_v32  ;;  %v7511_v31 = vld [vmem:[%s11334_s1 + $0xa44] ss:$16 sps:$4 sm:$0xff]   ;;  %v7506_v32 = vld [vmem:[%s11334_s1 + $0x840] ss:$16 sps:$4 sm:$0xff]  }
  0x5d   :  { %5045 = vmatprep.subr.bf16.mxu1 %v7421_v33  ;;  %v7509_v33 = vld [vmem:[%s11334_s1 + $0xa40] ss:$16 sps:$4 sm:$0xff]  }
  0x5f   :  { %5003 = vmatpush1.bf16.msra.mxu0 %v7416_v36  ;;  %v7512_v36 = vld [vmem:[%s11334_s1 + $0x820] ss:$16 sps:$4 sm:$0xff]  }
  0x60   :  { %5046 = vmatpush1.bf16.msra.mxu1 %v7419_v37  ;;  %5004 = vmatprep.subr.bf16.mxu0 %v7424_v38  ;;  %v7515_v37 = vld [vmem:[%s11334_s1 + $0xa20] ss:$16 sps:$4 sm:$0xff]   ;;  %v7520_v38 = vld [vmem:[%s11334_s1 + $0x804] ss:$16 sps:$4 sm:$0xff]  }
  0x61   :  { %5047 = vmatprep.subr.bf16.mxu1 %v7427_v39  ;;  %v7523_v39 = vld [vmem:[%s11334_s1 + $0xa04] ss:$16 sps:$4 sm:$0xff]  }
  0x63   :  { %5005 = vmatpush2.bf16.msra.mxu0 %v7422_v40  ;;  %v7518_v40 = vld [vmem:[%s11334_s1 + $0x800] ss:$16 sps:$4 sm:$0xff]  }
  0x64   :  { %5048 = vmatpush2.bf16.msra.mxu1 %v7425_v41  ;;  %5006 = vmatprep.subr.bf16.mxu0 %v7430_v42  ;;  %v7521_v41 = vld [vmem:[%s11334_s1 + $0xa00] ss:$16 sps:$4 sm:$0xff]   ;;  %v7526_v42 = vld [vmem:[%s11334_s1 + $0x9e4] ss:$16 sps:$4 sm:$0xff]  }
  0x65   :  { %5049 = vmatprep.subr.bf16.mxu1 %v7433_v43  ;;  %v7529_v43 = vld [vmem:[%s11334_s1 + $0xbe4] ss:$16 sps:$4 sm:$0xff]  }
  0x67   :  { %5007 = vmatpush2.bf16.msra.mxu0 %v7428_v44  ;;  %v7524_v44 = vld [vmem:[%s11334_s1 + $0x9e0] ss:$16 sps:$4 sm:$0xff]  }
  0x68   :  { %5050 = vmatpush2.bf16.msra.mxu1 %v7431_v45  ;;  %5008 = vmatprep.subr.bf16.mxu0 %v7436_v46  ;;  %v7527_v45 = vld [vmem:[%s11334_s1 + $0xbe0] ss:$16 sps:$4 sm:$0xff]   ;;  %v7532_v46 = vld [vmem:[%s11334_s1 + $0x9c4] ss:$16 sps:$4 sm:$0xff]  }
  0x69   :  { %5051 = vmatprep.subr.bf16.mxu1 %v7439_v47  ;;  %v7535_v47 = vld [vmem:[%s11334_s1 + $0xbc4] ss:$16 sps:$4 sm:$0xff]  }
  0x6b   :  { %5009 = vmatpush2.bf16.msra.mxu0 %v7434_v48  ;;  %v7530_v48 = vld [vmem:[%s11334_s1 + $0x9c0] ss:$16 sps:$4 sm:$0xff]  }
  0x6c   :  { %5052 = vmatpush2.bf16.msra.mxu1 %v7437_v49  ;;  %5010 = vmatprep.subr.bf16.mxu0 %v7442_v50  ;;  %v7533_v49 = vld [vmem:[%s11334_s1 + $0xbc0] ss:$16 sps:$4 sm:$0xff]   ;;  %v7538_v50 = vld [vmem:[%s11334_s1 + $0x9a4] ss:$16 sps:$4 sm:$0xff]  }
  0x6d   :  { %5053 = vmatprep.subr.bf16.mxu1 %v7445_v51  ;;  %v7541_v51 = vld [vmem:[%s11334_s1 + $0xba4] ss:$16 sps:$4 sm:$0xff]  }
  0x6f   :  { %5011 = vmatpush2.bf16.msra.mxu0 %v7440_v52  ;;  %v7536_v52 = vld [vmem:[%s11334_s1 + $0x9a0] ss:$16 sps:$4 sm:$0xff]  }
  0x70   :  { %5054 = vmatpush2.bf16.msra.mxu1 %v7443_v53  ;;  %5012 = vmatprep.subr.bf16.mxu0 %v7448_v54  ;;  %v7539_v53 = vld [vmem:[%s11334_s1 + $0xba0] ss:$16 sps:$4 sm:$0xff]   ;;  %v7544_v54 = vld [vmem:[%s11334_s1 + $0x984] ss:$16 sps:$4 sm:$0xff]  }
  0x71   :  { %5055 = vmatprep.subr.bf16.mxu1 %v7451_v55  ;;  %v7547_v55 = vld [vmem:[%s11334_s1 + $0xb84] ss:$16 sps:$4 sm:$0xff]  }
  0x73   :  { %5013 = vmatpush2.bf16.msra.mxu0 %v7446_v56  ;;  %v7542_v56 = vld [vmem:[%s11334_s1 + $0x980] ss:$16 sps:$4 sm:$0xff]  }
  0x74   :  { %5056 = vmatpush2.bf16.msra.mxu1 %v7449_v57  ;;  %5014 = vmatprep.subr.bf16.mxu0 %v7454_v58  ;;  %v7545_v57 = vld [vmem:[%s11334_s1 + $0xb80] ss:$16 sps:$4 sm:$0xff]   ;;  %v7550_v58 = vld [vmem:[%s11334_s1 + $0x964] ss:$16 sps:$4 sm:$0xff]  }
  0x75   :  { %5057 = vmatprep.subr.bf16.mxu1 %v7457_v59  ;;  %v7553_v59 = vld [vmem:[%s11334_s1 + $0xb64] ss:$16 sps:$4 sm:$0xff]  }
  0x77   :  { %5015 = vmatpush2.bf16.msra.mxu0 %v7452_v60  ;;  %v7548_v60 = vld [vmem:[%s11334_s1 + $0x960] ss:$16 sps:$4 sm:$0xff]  }
  0x78   :  { %5058 = vmatpush2.bf16.msra.mxu1 %v7455_v61  ;;  %5016 = vmatprep.subr.bf16.mxu0 %v7460_v62  ;;  %v7551_v61 = vld [vmem:[%s11334_s1 + $0xb60] ss:$16 sps:$4 sm:$0xff]   ;;  %v7556_v62 = vld [vmem:[%s11334_s1 + $0x944] ss:$16 sps:$4 sm:$0xff]  }
  0x79   :  { %5059 = vmatprep.subr.bf16.mxu1 %v7463_v63  ;;  %v7559_v63 = vld [vmem:[%s11334_s1 + $0xb44] ss:$16 sps:$4 sm:$0xff]  }
  0x7b   :  { %5017 = vmatpush2.bf16.msra.mxu0 %v7458_v0  ;;  %v7554_v0 = vld [vmem:[%s11334_s1 + $0x940] ss:$16 sps:$4 sm:$0xff]  }
  0x7c   :  { %5060 = vmatpush2.bf16.msra.mxu1 %v7461_v1  ;;  %5018 = vmatprep.subr.bf16.mxu0 %v7466_v2  ;;  %v7557_v1 = vld [vmem:[%s11334_s1 + $0xb40] ss:$16 sps:$4 sm:$0xff]   ;;  %v7562_v2 = vld [vmem:[%s11334_s1 + $0x924] ss:$16 sps:$4 sm:$0xff]  }
  0x7d   :  { %5061 = vmatprep.subr.bf16.mxu1 %v7469_v3  ;;  %v7565_v3 = vld [vmem:[%s11334_s1 + $0xb24] ss:$16 sps:$4 sm:$0xff]  }
  0x7f   :  { %5019 = vmatpush2.bf16.msra.mxu0 %v7464_v4  ;;  %v7560_v4 = vld [vmem:[%s11334_s1 + $0x920] ss:$16 sps:$4 sm:$0xff]  }
  0x80   :  { %5062 = vmatpush2.bf16.msra.mxu1 %v7467_v5  ;;  %5074 = vmatprep.subr.bf16.mxu0 %v7478_v6  ;;  %v7563_v5 = vld [vmem:[%s11334_s1 + $0xb20] ss:$16 sps:$4 sm:$0xff]   ;;  %v7568_v6 = vld [vmem:[%s11334_s1 + $0x904] ss:$16 sps:$4 sm:$0xff]  }
  0x81   :  { %5117 = vmatprep.subr.bf16.mxu1 %v7481_v7  ;;  %v7571_v7 = vld [vmem:[%s11334_s1 + $0xb04] ss:$16 sps:$4 sm:$0xff]  }
  0x82   :  { %5021 = vmatmul.mubr.bf16.vlgmr.msra.gmra.mxu0 %v7470_v8  ;;  %v7566_v8 = vld [vmem:[%s11334_s1 + $0x900] ss:$16 sps:$4 sm:$0xff]  }
  0x83   :  { %5064 = vmatmul.mubr.bf16.vlgmr.msra.gmra.mxu1 %v7473_v9  ;;  %5075 = vmatpush1.bf16.msra.mxu0 %v7476_v10  ;;  %v7569_v9 = vld [vmem:[%s11334_s1 + $0xb00] ss:$16 sps:$4 sm:$0xff]   ;;  %v7580_v10 = vld [vmem:[%s11334_s1 + $0xce4] ss:$16 sps:$4 sm:$0xff]  }
  0x84   :  { %5118 = vmatpush1.bf16.msra.mxu1 %v7479_v11  ;;  %5076 = vmatprep.subr.bf16.mxu0 %v7484_v12  ;;  %v7583_v11 = vld [vmem:[%s11334_s1 + $0xee4] ss:$16 sps:$4 sm:$0xff]  }
  0x85   :  { %5119 = vmatprep.subr.bf16.mxu1 %v7487_v13  ;;  %5106 = vmatprep.mubr.bf16.mxu0 %v7574_v19  ;;  %v7572_v12 = vld [vmem:[%s11335_s0 + $0x20] ss:$100 sps:$4 sm:$0xff]   ;;  %v7575_v13 = vld [vmem:[%s11335_s0 + $0x28] ss:$100 sps:$4 sm:$0xff]  }
  0x86   :  { %5149 = vmatprep.mubr.bf16.mxu1 %v7577_v21  ;;  %v7679_v19 = vld [vmem:[%s11335_s0 + $0x3c] ss:$100 sps:$4 sm:$0xff]  }
  0x87   :  { %5077 = vmatpush1.bf16.msra.mxu0 %v7482_v14  ;;  %v7578_v14 = vld [vmem:[%s11334_s1 + $0xce0] ss:$16 sps:$4 sm:$0xff]  }
  0x88   :  { %5120 = vmatpush1.bf16.msra.mxu1 %v7485_v15  ;;  %5078 = vmatprep.subr.bf16.mxu0 %v7490_v16  ;;  %v7581_v15 = vld [vmem:[%s11334_s1 + $0xee0] ss:$16 sps:$4 sm:$0xff]   ;;  %v7586_v16 = vld [vmem:[%s11334_s1 + $0xcc4] ss:$16 sps:$4 sm:$0xff]  }
  0x89   :  { %5121 = vmatprep.subr.bf16.mxu1 %v7493_v17  ;;  %v7589_v17 = vld [vmem:[%s11334_s1 + $0xec4] ss:$16 sps:$4 sm:$0xff]   ;;  %v7587_v21 = vld [vmem:[%s11334_s1 + $0xec0] ss:$16 sps:$4 sm:$0xff]  }
  0x8b   :  { %5079 = vmatpush1.bf16.msra.mxu0 %v7488_v18  ;;  %v7676_v18 = vld [vmem:[%s11335_s0 + $0x34] ss:$100 sps:$4 sm:$0xff]  }
  0x8c   :  { %5122 = vmatpush1.bf16.msra.mxu1 %v7491_v20  ;;  %5080 = vmatprep.subr.bf16.mxu0 %v7496_v22  ;;  %v7584_v20 = vld [vmem:[%s11334_s1 + $0xcc0] ss:$16 sps:$4 sm:$0xff]   ;;  %v7592_v22 = vld [vmem:[%s11334_s1 + $0xca4] ss:$16 sps:$4 sm:$0xff]  }
  0x8d   :  { %5123 = vmatprep.subr.bf16.mxu1 %v7499_v23  ;;  %v7595_v23 = vld [vmem:[%s11334_s1 + $0xea4] ss:$16 sps:$4 sm:$0xff]  }
  0x8f   :  { %5081 = vmatpush1.bf16.msra.mxu0 %v7494_v24  ;;  %v7590_v24 = vld [vmem:[%s11334_s1 + $0xca0] ss:$16 sps:$4 sm:$0xff]  }
  0x90   :  { %5124 = vmatpush1.bf16.msra.mxu1 %v7497_v25  ;;  %5082 = vmatprep.subr.bf16.mxu0 %v7502_v26  ;;  %v7593_v25 = vld [vmem:[%s11334_s1 + $0xea0] ss:$16 sps:$4 sm:$0xff]   ;;  %v7598_v26 = vld [vmem:[%s11334_s1 + $0xc84] ss:$16 sps:$4 sm:$0xff]  }
  0x91   :  { %5125 = vmatprep.subr.bf16.mxu1 %v7505_v27  ;;  %v7601_v27 = vld [vmem:[%s11334_s1 + $0xe84] ss:$16 sps:$4 sm:$0xff]  }
  0x93   :  { %5083 = vmatpush1.bf16.msra.mxu0 %v7500_v28  ;;  %v7596_v28 = vld [vmem:[%s11334_s1 + $0xc80] ss:$16 sps:$4 sm:$0xff]  }
  0x94   :  { %5126 = vmatpush1.bf16.msra.mxu1 %v7503_v29  ;;  %5084 = vmatprep.subr.bf16.mxu0 %v7508_v30  ;;  %v7599_v29 = vld [vmem:[%s11334_s1 + $0xe80] ss:$16 sps:$4 sm:$0xff]   ;;  %v7604_v30 = vld [vmem:[%s11334_s1 + $0xc64] ss:$16 sps:$4 sm:$0xff]  }
  0x95   :  { %5127 = vmatprep.subr.bf16.mxu1 %v7511_v31  ;;  %v7607_v31 = vld [vmem:[%s11334_s1 + $0xe64] ss:$16 sps:$4 sm:$0xff]  }
  0x97   :  { %5085 = vmatpush1.bf16.msra.mxu0 %v7506_v32  ;;  %v7602_v32 = vld [vmem:[%s11334_s1 + $0xc60] ss:$16 sps:$4 sm:$0xff]  }
  0x98   :  { %5128 = vmatpush1.bf16.msra.mxu1 %v7509_v33  ;;  %5086 = vmatprep.subr.bf16.mxu0 %v7514_v34  ;;  %v7605_v33 = vld [vmem:[%s11334_s1 + $0xe60] ss:$16 sps:$4 sm:$0xff]   ;;  %v7610_v34 = vld [vmem:[%s11334_s1 + $0xc44] ss:$16 sps:$4 sm:$0xff]  }
  0x99   :  { %5129 = vmatprep.subr.bf16.mxu1 %v7517_v35  ;;  %v7613_v35 = vld [vmem:[%s11334_s1 + $0xe44] ss:$16 sps:$4 sm:$0xff]  }
  0x9b   :  { %5087 = vmatpush1.bf16.msra.mxu0 %v7512_v36  ;;  %v7608_v36 = vld [vmem:[%s11334_s1 + $0xc40] ss:$16 sps:$4 sm:$0xff]  }
  0x9c   :  { %5130 = vmatpush1.bf16.msra.mxu1 %v7515_v37  ;;  %5088 = vmatprep.subr.bf16.mxu0 %v7520_v38  ;;  %v7611_v37 = vld [vmem:[%s11334_s1 + $0xe40] ss:$16 sps:$4 sm:$0xff]   ;;  %v7616_v38 = vld [vmem:[%s11334_s1 + $0xc24] ss:$16 sps:$4 sm:$0xff]  }
  0x9d   :  { %5131 = vmatprep.subr.bf16.mxu1 %v7523_v39  ;;  %v7619_v39 = vld [vmem:[%s11334_s1 + $0xe24] ss:$16 sps:$4 sm:$0xff]  }
  0x9f   :  { %5089 = vmatpush1.bf16.msra.mxu0 %v7518_v40  ;;  %v7614_v40 = vld [vmem:[%s11334_s1 + $0xc20] ss:$16 sps:$4 sm:$0xff]  }
  0xa0   :  { %5132 = vmatpush1.bf16.msra.mxu1 %v7521_v41  ;;  %5090 = vmatprep.subr.bf16.mxu0 %v7526_v42  ;;  %v7617_v41 = vld [vmem:[%s11334_s1 + $0xe20] ss:$16 sps:$4 sm:$0xff]   ;;  %v7622_v42 = vld [vmem:[%s11334_s1 + $0xc04] ss:$16 sps:$4 sm:$0xff]  }
  0xa1   :  { %5133 = vmatprep.subr.bf16.mxu1 %v7529_v43  ;;  %v7625_v43 = vld [vmem:[%s11334_s1 + $0xe04] ss:$16 sps:$4 sm:$0xff]  }
  0xa3   :  { %5091 = vmatpush2.bf16.msra.mxu0 %v7524_v44  ;;  %v7620_v44 = vld [vmem:[%s11334_s1 + $0xc00] ss:$16 sps:$4 sm:$0xff]  }
  0xa4   :  { %5134 = vmatpush2.bf16.msra.mxu1 %v7527_v45  ;;  %5092 = vmatprep.subr.bf16.mxu0 %v7532_v46  ;;  %v7623_v45 = vld [vmem:[%s11334_s1 + $0xe00] ss:$16 sps:$4 sm:$0xff]   ;;  %v7628_v46 = vld [vmem:[%s11334_s1 + $0xde4] ss:$16 sps:$4 sm:$0xff]  }
  0xa5   :  { %5135 = vmatprep.subr.bf16.mxu1 %v7535_v47  ;;  %v7631_v47 = vld [vmem:[%s11334_s1 + $0xfe4] ss:$16 sps:$4 sm:$0xff]  }
  0xa7   :  { %5093 = vmatpush2.bf16.msra.mxu0 %v7530_v48  ;;  %v7626_v48 = vld [vmem:[%s11334_s1 + $0xde0] ss:$16 sps:$4 sm:$0xff]  }
  0xa8   :  { %5136 = vmatpush2.bf16.msra.mxu1 %v7533_v49  ;;  %5094 = vmatprep.subr.bf16.mxu0 %v7538_v50  ;;  %v7629_v49 = vld [vmem:[%s11334_s1 + $0xfe0] ss:$16 sps:$4 sm:$0xff]   ;;  %v7634_v50 = vld [vmem:[%s11334_s1 + $0xdc4] ss:$16 sps:$4 sm:$0xff]  }
  0xa9   :  { %5137 = vmatprep.subr.bf16.mxu1 %v7541_v51  ;;  %v7637_v51 = vld [vmem:[%s11334_s1 + $0xfc4] ss:$16 sps:$4 sm:$0xff]  }
  0xab   :  { %5095 = vmatpush2.bf16.msra.mxu0 %v7536_v52  ;;  %v7632_v52 = vld [vmem:[%s11334_s1 + $0xdc0] ss:$16 sps:$4 sm:$0xff]  }
  0xac   :  { %5138 = vmatpush2.bf16.msra.mxu1 %v7539_v53  ;;  %5096 = vmatprep.subr.bf16.mxu0 %v7544_v54  ;;  %v7635_v53 = vld [vmem:[%s11334_s1 + $0xfc0] ss:$16 sps:$4 sm:$0xff]   ;;  %v7640_v54 = vld [vmem:[%s11334_s1 + $0xda4] ss:$16 sps:$4 sm:$0xff]  }
  0xad   :  { %5139 = vmatprep.subr.bf16.mxu1 %v7547_v55  ;;  %v7643_v55 = vld [vmem:[%s11334_s1 + $0xfa4] ss:$16 sps:$4 sm:$0xff]  }
  0xaf   :  { %5097 = vmatpush2.bf16.msra.mxu0 %v7542_v56  ;;  %v7638_v56 = vld [vmem:[%s11334_s1 + $0xda0] ss:$16 sps:$4 sm:$0xff]  }
  0xb0   :  { %5140 = vmatpush2.bf16.msra.mxu1 %v7545_v57  ;;  %5098 = vmatprep.subr.bf16.mxu0 %v7550_v58  ;;  %v7641_v57 = vld [vmem:[%s11334_s1 + $0xfa0] ss:$16 sps:$4 sm:$0xff]   ;;  %v7646_v58 = vld [vmem:[%s11334_s1 + $0xd84] ss:$16 sps:$4 sm:$0xff]  }
  0xb1   :  { %5141 = vmatprep.subr.bf16.mxu1 %v7553_v59  ;;  %v7649_v59 = vld [vmem:[%s11334_s1 + $0xf84] ss:$16 sps:$4 sm:$0xff]  }
  0xb3   :  { %5099 = vmatpush2.bf16.msra.mxu0 %v7548_v60  ;;  %v7644_v60 = vld [vmem:[%s11334_s1 + $0xd80] ss:$16 sps:$4 sm:$0xff]  }
  0xb4   :  { %5142 = vmatpush2.bf16.msra.mxu1 %v7551_v61  ;;  %5100 = vmatprep.subr.bf16.mxu0 %v7556_v62  ;;  %v7647_v61 = vld [vmem:[%s11334_s1 + $0xf80] ss:$16 sps:$4 sm:$0xff]   ;;  %v7652_v62 = vld [vmem:[%s11334_s1 + $0xd64] ss:$16 sps:$4 sm:$0xff]  }
  0xb5   :  { %5143 = vmatprep.subr.bf16.mxu1 %v7559_v63  ;;  %v7655_v63 = vld [vmem:[%s11334_s1 + $0xf64] ss:$16 sps:$4 sm:$0xff]  }
  0xb7   :  { %5101 = vmatpush2.bf16.msra.mxu0 %v7554_v0  ;;  %v7650_v0 = vld [vmem:[%s11334_s1 + $0xd60] ss:$16 sps:$4 sm:$0xff]  }
  0xb8   :  { %5144 = vmatpush2.bf16.msra.mxu1 %v7557_v1  ;;  %5102 = vmatprep.subr.bf16.mxu0 %v7562_v2  ;;  %v7653_v1 = vld [vmem:[%s11334_s1 + $0xf60] ss:$16 sps:$4 sm:$0xff]   ;;  %v7658_v2 = vld [vmem:[%s11334_s1 + $0xd44] ss:$16 sps:$4 sm:$0xff]  }
  0xb9   :  { %5145 = vmatprep.subr.bf16.mxu1 %v7565_v3  ;;  %v7661_v3 = vld [vmem:[%s11334_s1 + $0xf44] ss:$16 sps:$4 sm:$0xff]  }
  0xbb   :  { %5103 = vmatpush2.bf16.msra.mxu0 %v7560_v4  ;;  %v7656_v4 = vld [vmem:[%s11334_s1 + $0xd40] ss:$16 sps:$4 sm:$0xff]  }
  0xbc   :  { %5146 = vmatpush2.bf16.msra.mxu1 %v7563_v5  ;;  %5104 = vmatprep.subr.bf16.mxu0 %v7568_v6  ;;  %v7659_v5 = vld [vmem:[%s11334_s1 + $0xf40] ss:$16 sps:$4 sm:$0xff]   ;;  %v7664_v6 = vld [vmem:[%s11334_s1 + $0xd24] ss:$16 sps:$4 sm:$0xff]  }
  0xbd   :  { %5147 = vmatprep.subr.bf16.mxu1 %v7571_v7  ;;  %v7667_v7 = vld [vmem:[%s11334_s1 + $0xf24] ss:$16 sps:$4 sm:$0xff]  }
  0xbf   :  { %5105 = vmatpush2.bf16.msra.mxu0 %v7566_v8  ;;  %v7662_v8 = vld [vmem:[%s11334_s1 + $0xd20] ss:$16 sps:$4 sm:$0xff]  }
  0xc0   :  { %5148 = vmatpush2.bf16.msra.mxu1 %v7569_v9  ;;  %5160 = vmatprep.subr.bf16.mxu0 %v7580_v10  ;;  %v7665_v9 = vld [vmem:[%s11334_s1 + $0xf20] ss:$16 sps:$4 sm:$0xff]   ;;  %v7670_v10 = vld [vmem:[%s11334_s1 + $0xd04] ss:$16 sps:$4 sm:$0xff]  }
  0xc1   :  { %5203 = vmatprep.subr.bf16.mxu1 %v7583_v11  ;;  %v7673_v11 = vld [vmem:[%s11334_s1 + $0xf04] ss:$16 sps:$4 sm:$0xff]  }
  0xc2   :  { %5107 = vmatmul.mubr.bf16.vlgmr.msra.gmra.mxu0 %v7572_v12  ;;  %v7668_v12 = vld [vmem:[%s11334_s1 + $0xd00] ss:$16 sps:$4 sm:$0xff]  }
  0xc3   :  { %5150 = vmatmul.mubr.bf16.vlgmr.msra.gmra.mxu1 %v7575_v13  ;;  %5161 = vmatpush1.bf16.msra.mxu0 %v7578_v14  ;;  %v7671_v13 = vld [vmem:[%s11334_s1 + $0xf00] ss:$16 sps:$4 sm:$0xff]   ;;  %v7682_v14 = vld [vmem:[%s11334_s1 + $0x10e4] ss:$16 sps:$4 sm:$0xff]  }
  0xc4   :  { %5204 = vmatpush1.bf16.msra.mxu1 %v7581_v15  ;;  %5162 = vmatprep.subr.bf16.mxu0 %v7586_v16  ;;  %v7685_v15 = vld [vmem:[%s11334_s1 + $0x12e4] ss:$16 sps:$4 sm:$0xff]  }
  0xc5   :  { %5205 = vmatprep.subr.bf16.mxu1 %v7589_v17  ;;  %5192 = vmatprep.mubr.bf16.mxu0 %v7676_v18  ;;  %v7674_v16 = vld [vmem:[%s11335_s0 + $0x30] ss:$100 sps:$4 sm:$0xff]   ;;  %v7677_v17 = vld [vmem:[%s11335_s0 + $0x38] ss:$100 sps:$4 sm:$0xff]  }
  0xc6   :  { %5235 = vmatprep.mubr.bf16.mxu1 %v7679_v19  ;;  %v7680_v18 = vld [vmem:[%s11334_s1 + $0x10e0] ss:$16 sps:$4 sm:$0xff]  }
  0xc7   :  { %5163 = vmatpush1.bf16.msra.mxu0 %v7584_v20  ;;  %v7683_v19 = vld [vmem:[%s11334_s1 + $0x12e0] ss:$16 sps:$4 sm:$0xff]   ;;  %v7688_v20 = vld [vmem:[%s11334_s1 + $0x10c4] ss:$16 sps:$4 sm:$0xff]  }
  0xc8   :  { %5206 = vmatpush1.bf16.msra.mxu1 %v7587_v21  ;;  %5164 = vmatprep.subr.bf16.mxu0 %v7592_v22  ;;  %v7691_v21 = vld [vmem:[%s11334_s1 + $0x12c4] ss:$16 sps:$4 sm:$0xff]  }
  0xc9   :  { %5207 = vmatprep.subr.bf16.mxu1 %v7595_v23  ;;  %v7778_v22 = vld [vmem:[%s11335_s0 + $0x44] ss:$100 sps:$4 sm:$0xff]   ;;  %v7781_v23 = vld [vmem:[%s11335_s0 + $0x4c] ss:$100 sps:$4 sm:$0xff]  }
  0xcb   :  { %5165 = vmatpush1.bf16.msra.mxu0 %v7590_v24  ;;  %v7686_v24 = vld [vmem:[%s11334_s1 + $0x10c0] ss:$16 sps:$4 sm:$0xff]  }
  0xcc   :  { %5208 = vmatpush1.bf16.msra.mxu1 %v7593_v25  ;;  %5166 = vmatprep.subr.bf16.mxu0 %v7598_v26  ;;  %v7689_v25 = vld [vmem:[%s11334_s1 + $0x12c0] ss:$16 sps:$4 sm:$0xff]   ;;  %v7694_v26 = vld [vmem:[%s11334_s1 + $0x10a4] ss:$16 sps:$4 sm:$0xff]  }
  0xcd   :  { %5209 = vmatprep.subr.bf16.mxu1 %v7601_v27  ;;  %v7697_v27 = vld [vmem:[%s11334_s1 + $0x12a4] ss:$16 sps:$4 sm:$0xff]  }
  0xcf   :  { %5167 = vmatpush1.bf16.msra.mxu0 %v7596_v28  ;;  %v7692_v28 = vld [vmem:[%s11334_s1 + $0x10a0] ss:$16 sps:$4 sm:$0xff]  }
  0xd0   :  { %5210 = vmatpush1.bf16.msra.mxu1 %v7599_v29  ;;  %5168 = vmatprep.subr.bf16.mxu0 %v7604_v30  ;;  %v7695_v29 = vld [vmem:[%s11334_s1 + $0x12a0] ss:$16 sps:$4 sm:$0xff]   ;;  %v7700_v30 = vld [vmem:[%s11334_s1 + $0x1084] ss:$16 sps:$4 sm:$0xff]  }
  0xd1   :  { %5211 = vmatprep.subr.bf16.mxu1 %v7607_v31  ;;  %v7703_v31 = vld [vmem:[%s11334_s1 + $0x1284] ss:$16 sps:$4 sm:$0xff]  }
  0xd3   :  { %5169 = vmatpush1.bf16.msra.mxu0 %v7602_v32  ;;  %v7698_v32 = vld [vmem:[%s11334_s1 + $0x1080] ss:$16 sps:$4 sm:$0xff]  }
  0xd4   :  { %5212 = vmatpush1.bf16.msra.mxu1 %v7605_v33  ;;  %5170 = vmatprep.subr.bf16.mxu0 %v7610_v34  ;;  %v7701_v33 = vld [vmem:[%s11334_s1 + $0x1280] ss:$16 sps:$4 sm:$0xff]   ;;  %v7706_v34 = vld [vmem:[%s11334_s1 + $0x1064] ss:$16 sps:$4 sm:$0xff]  }
  0xd5   :  { %5213 = vmatprep.subr.bf16.mxu1 %v7613_v35  ;;  %v7709_v35 = vld [vmem:[%s11334_s1 + $0x1264] ss:$16 sps:$4 sm:$0xff]  }
  0xd7   :  { %5171 = vmatpush1.bf16.msra.mxu0 %v7608_v36  ;;  %v7704_v36 = vld [vmem:[%s11334_s1 + $0x1060] ss:$16 sps:$4 sm:$0xff]  }
  0xd8   :  { %5214 = vmatpush1.bf16.msra.mxu1 %v7611_v37  ;;  %5172 = vmatprep.subr.bf16.mxu0 %v7616_v38  ;;  %v7707_v37 = vld [vmem:[%s11334_s1 + $0x1260] ss:$16 sps:$4 sm:$0xff]   ;;  %v7712_v38 = vld [vmem:[%s11334_s1 + $0x1044] ss:$16 sps:$4 sm:$0xff]  }
  0xd9   :  { %5215 = vmatprep.subr.bf16.mxu1 %v7619_v39  ;;  %v7715_v39 = vld [vmem:[%s11334_s1 + $0x1244] ss:$16 sps:$4 sm:$0xff]  }
  0xdb   :  { %5173 = vmatpush1.bf16.msra.mxu0 %v7614_v40  ;;  %v7710_v40 = vld [vmem:[%s11334_s1 + $0x1040] ss:$16 sps:$4 sm:$0xff]  }
  0xdc   :  { %5216 = vmatpush1.bf16.msra.mxu1 %v7617_v41  ;;  %5174 = vmatprep.subr.bf16.mxu0 %v7622_v42  ;;  %v7713_v41 = vld [vmem:[%s11334_s1 + $0x1240] ss:$16 sps:$4 sm:$0xff]   ;;  %v7718_v42 = vld [vmem:[%s11334_s1 + $0x1024] ss:$16 sps:$4 sm:$0xff]  }
  0xdd   :  { %5217 = vmatprep.subr.bf16.mxu1 %v7625_v43  ;;  %v7721_v43 = vld [vmem:[%s11334_s1 + $0x1224] ss:$16 sps:$4 sm:$0xff]  }
  0xdf   :  { %5175 = vmatpush1.bf16.msra.mxu0 %v7620_v44  ;;  %v7716_v44 = vld [vmem:[%s11334_s1 + $0x1020] ss:$16 sps:$4 sm:$0xff]  }
  0xe0   :  { %5218 = vmatpush1.bf16.msra.mxu1 %v7623_v45  ;;  %5176 = vmatprep.subr.bf16.mxu0 %v7628_v46  ;;  %v7719_v45 = vld [vmem:[%s11334_s1 + $0x1220] ss:$16 sps:$4 sm:$0xff]   ;;  %v7724_v46 = vld [vmem:[%s11334_s1 + $0x1004] ss:$16 sps:$4 sm:$0xff]  }
  0xe1   :  { %5219 = vmatprep.subr.bf16.mxu1 %v7631_v47  ;;  %v7727_v47 = vld [vmem:[%s11334_s1 + $0x1204] ss:$16 sps:$4 sm:$0xff]  }
  0xe3   :  { %5177 = vmatpush2.bf16.msra.mxu0 %v7626_v48  ;;  %v7722_v48 = vld [vmem:[%s11334_s1 + $0x1000] ss:$16 sps:$4 sm:$0xff]  }
  0xe4   :  { %5220 = vmatpush2.bf16.msra.mxu1 %v7629_v49  ;;  %5178 = vmatprep.subr.bf16.mxu0 %v7634_v50  ;;  %v7725_v49 = vld [vmem:[%s11334_s1 + $0x1200] ss:$16 sps:$4 sm:$0xff]   ;;  %v7730_v50 = vld [vmem:[%s11334_s1 + $0x11e4] ss:$16 sps:$4 sm:$0xff]  }
  0xe5   :  { %5221 = vmatprep.subr.bf16.mxu1 %v7637_v51  ;;  %v7733_v51 = vld [vmem:[%s11334_s1 + $0x13e4] ss:$16 sps:$4 sm:$0xff]  }
  0xe7   :  { %5179 = vmatpush2.bf16.msra.mxu0 %v7632_v52  ;;  %v7728_v52 = vld [vmem:[%s11334_s1 + $0x11e0] ss:$16 sps:$4 sm:$0xff]  }
  0xe8   :  { %5222 = vmatpush2.bf16.msra.mxu1 %v7635_v53  ;;  %5180 = vmatprep.subr.bf16.mxu0 %v7640_v54  ;;  %v7731_v53 = vld [vmem:[%s11334_s1 + $0x13e0] ss:$16 sps:$4 sm:$0xff]   ;;  %v7736_v54 = vld [vmem:[%s11334_s1 + $0x11c4] ss:$16 sps:$4 sm:$0xff]  }
  0xe9   :  { %5223 = vmatprep.subr.bf16.mxu1 %v7643_v55  ;;  %v7739_v55 = vld [vmem:[%s11334_s1 + $0x13c4] ss:$16 sps:$4 sm:$0xff]  }
  0xeb   :  { %5181 = vmatpush2.bf16.msra.mxu0 %v7638_v56  ;;  %v7734_v56 = vld [vmem:[%s11334_s1 + $0x11c0] ss:$16 sps:$4 sm:$0xff]  }
  0xec   :  { %5224 = vmatpush2.bf16.msra.mxu1 %v7641_v57  ;;  %5182 = vmatprep.subr.bf16.mxu0 %v7646_v58  ;;  %v7737_v57 = vld [vmem:[%s11334_s1 + $0x13c0] ss:$16 sps:$4 sm:$0xff]   ;;  %v7742_v58 = vld [vmem:[%s11334_s1 + $0x11a4] ss:$16 sps:$4 sm:$0xff]  }
  0xed   :  { %5225 = vmatprep.subr.bf16.mxu1 %v7649_v59  ;;  %v7745_v59 = vld [vmem:[%s11334_s1 + $0x13a4] ss:$16 sps:$4 sm:$0xff]  }
  0xef   :  { %5183 = vmatpush2.bf16.msra.mxu0 %v7644_v60  ;;  %v7740_v60 = vld [vmem:[%s11334_s1 + $0x11a0] ss:$16 sps:$4 sm:$0xff]  }
  0xf0   :  { %5226 = vmatpush2.bf16.msra.mxu1 %v7647_v61  ;;  %5184 = vmatprep.subr.bf16.mxu0 %v7652_v62  ;;  %v7743_v61 = vld [vmem:[%s11334_s1 + $0x13a0] ss:$16 sps:$4 sm:$0xff]   ;;  %v7748_v62 = vld [vmem:[%s11334_s1 + $0x1184] ss:$16 sps:$4 sm:$0xff]  }
  0xf1   :  { %5227 = vmatprep.subr.bf16.mxu1 %v7655_v63  ;;  %v7751_v63 = vld [vmem:[%s11334_s1 + $0x1384] ss:$16 sps:$4 sm:$0xff]  }
  0xf3   :  { %5185 = vmatpush2.bf16.msra.mxu0 %v7650_v0  ;;  %v7746_v0 = vld [vmem:[%s11334_s1 + $0x1180] ss:$16 sps:$4 sm:$0xff]  }
  0xf4   :  { %5228 = vmatpush2.bf16.msra.mxu1 %v7653_v1  ;;  %5186 = vmatprep.subr.bf16.mxu0 %v7658_v2  ;;  %v7749_v1 = vld [vmem:[%s11334_s1 + $0x1380] ss:$16 sps:$4 sm:$0xff]   ;;  %v7754_v2 = vld [vmem:[%s11334_s1 + $0x1164] ss:$16 sps:$4 sm:$0xff]  }
  0xf5   :  { %5229 = vmatprep.subr.bf16.mxu1 %v7661_v3  ;;  %v7757_v3 = vld [vmem:[%s11334_s1 + $0x1364] ss:$16 sps:$4 sm:$0xff]  }
  0xf7   :  { %5187 = vmatpush2.bf16.msra.mxu0 %v7656_v4  ;;  %v7752_v4 = vld [vmem:[%s11334_s1 + $0x1160] ss:$16 sps:$4 sm:$0xff]  }
  0xf8   :  { %5230 = vmatpush2.bf16.msra.mxu1 %v7659_v5  ;;  %5188 = vmatprep.subr.bf16.mxu0 %v7664_v6  ;;  %v7755_v5 = vld [vmem:[%s11334_s1 + $0x1360] ss:$16 sps:$4 sm:$0xff]   ;;  %v7760_v6 = vld [vmem:[%s11334_s1 + $0x1144] ss:$16 sps:$4 sm:$0xff]  }
  0xf9   :  { %5231 = vmatprep.subr.bf16.mxu1 %v7667_v7  ;;  %v7763_v7 = vld [vmem:[%s11334_s1 + $0x1344] ss:$16 sps:$4 sm:$0xff]  }
  0xfb   :  { %5189 = vmatpush2.bf16.msra.mxu0 %v7662_v8  ;;  %v7758_v8 = vld [vmem:[%s11334_s1 + $0x1140] ss:$16 sps:$4 sm:$0xff]  }
  0xfc   :  { %5232 = vmatpush2.bf16.msra.mxu1 %v7665_v9  ;;  %5190 = vmatprep.subr.bf16.mxu0 %v7670_v10  ;;  %v7761_v9 = vld [vmem:[%s11334_s1 + $0x1340] ss:$16 sps:$4 sm:$0xff]   ;;  %v7766_v10 = vld [vmem:[%s11334_s1 + $0x1124] ss:$16 sps:$4 sm:$0xff]  }
  0xfd   :  { %5233 = vmatprep.subr.bf16.mxu1 %v7673_v11  ;;  %v7769_v11 = vld [vmem:[%s11334_s1 + $0x1324] ss:$16 sps:$4 sm:$0xff]  }
  0xff   :  { %5191 = vmatpush2.bf16.msra.mxu0 %v7668_v12  ;;  %v7764_v12 = vld [vmem:[%s11334_s1 + $0x1120] ss:$16 sps:$4 sm:$0xff]  }
 0x100   :  { %5234 = vmatpush2.bf16.msra.mxu1 %v7671_v13  ;;  %5246 = vmatprep.subr.bf16.mxu0 %v7682_v14  ;;  %v7767_v13 = vld [vmem:[%s11334_s1 + $0x1320] ss:$16 sps:$4 sm:$0xff]   ;;  %v7772_v14 = vld [vmem:[%s11334_s1 + $0x1104] ss:$16 sps:$4 sm:$0xff]  }
 0x101   :  { %5289 = vmatprep.subr.bf16.mxu1 %v7685_v15  ;;  %v7775_v15 = vld [vmem:[%s11334_s1 + $0x1304] ss:$16 sps:$4 sm:$0xff]  }
 0x102   :  { %5193 = vmatmul.mubr.bf16.vlgmr.msra.gmra.mxu0 %v7674_v16  ;;  %v7770_v16 = vld [vmem:[%s11334_s1 + $0x1100] ss:$16 sps:$4 sm:$0xff]  }
 0x103   :  { %5236 = vmatmul.mubr.bf16.vlgmr.msra.gmra.mxu1 %v7677_v17  ;;  %5247 = vmatpush1.bf16.msra.mxu0 %v7680_v18  ;;  %v7773_v17 = vld [vmem:[%s11334_s1 + $0x1300] ss:$16 sps:$4 sm:$0xff]  }
 0x104   :  { %5290 = vmatpush1.bf16.msra.mxu1 %v7683_v19  ;;  %5248 = vmatprep.subr.bf16.mxu0 %v7688_v20  ;;  %v7776_v18 = vld [vmem:[%s11335_s0 + $0x40] ss:$100 sps:$4 sm:$0xff]   ;;  %v7779_v19 = vld [vmem:[%s11335_s0 + $0x48] ss:$100 sps:$4 sm:$0xff]  }
 0x105   :  { %5291 = vmatprep.subr.bf16.mxu1 %v7691_v21  ;;  %5278 = vmatprep.mubr.bf16.mxu0 %v7778_v22  ;;  %v7784_v20 = vld [vmem:[%s11334_s1 + $0x14e4] ss:$16 sps:$4 sm:$0xff]   ;;  %v7782_v22 = vld [vmem:[%s11334_s1 + $0x14e0] ss:$16 sps:$4 sm:$0xff]  }
 0x106   :  { %5321 = vmatprep.mubr.bf16.mxu1 %v7781_v23  ;;  %v7787_v21 = vld [vmem:[%s11334_s1 + $0x16e4] ss:$16 sps:$4 sm:$0xff]   ;;  %v7785_v23 = vld [vmem:[%s11334_s1 + $0x16e0] ss:$16 sps:$4 sm:$0xff]  }
 0x107   :  { %5249 = vmatpush1.bf16.msra.mxu0 %v7686_v24  ;;  %v7790_v24 = vld [vmem:[%s11334_s1 + $0x14c4] ss:$16 sps:$4 sm:$0xff]  }
 0x108   :  { %5292 = vmatpush1.bf16.msra.mxu1 %v7689_v25  ;;  %5250 = vmatprep.subr.bf16.mxu0 %v7694_v26  ;;  %v7793_v25 = vld [vmem:[%s11334_s1 + $0x16c4] ss:$16 sps:$4 sm:$0xff]   ;;  %v7788_v26 = vld [vmem:[%s11334_s1 + $0x14c0] ss:$16 sps:$4 sm:$0xff]  }
 0x109   :  { %5293 = vmatprep.subr.bf16.mxu1 %v7697_v27  ;;  %v7791_v27 = vld [vmem:[%s11334_s1 + $0x16c0] ss:$16 sps:$4 sm:$0xff]  }
 0x10b   :  { %5251 = vmatpush1.bf16.msra.mxu0 %v7692_v28  ;;  %v7880_v28 = vld [vmem:[%s11335_s0 + $0x54] ss:$100 sps:$4 sm:$0xff]  }
 0x10c   :  { %5294 = vmatpush1.bf16.msra.mxu1 %v7695_v29  ;;  %5252 = vmatprep.subr.bf16.mxu0 %v7700_v30  ;;  %v7883_v29 = vld [vmem:[%s11335_s0 + $0x5c] ss:$100 sps:$4 sm:$0xff]   ;;  %v7796_v30 = vld [vmem:[%s11334_s1 + $0x14a4] ss:$16 sps:$4 sm:$0xff]  }
 0x10d   :  { %5295 = vmatprep.subr.bf16.mxu1 %v7703_v31  ;;  %v7799_v31 = vld [vmem:[%s11334_s1 + $0x16a4] ss:$16 sps:$4 sm:$0xff]  }
 0x10f   :  { %5253 = vmatpush1.bf16.msra.mxu0 %v7698_v32  ;;  %v7794_v32 = vld [vmem:[%s11334_s1 + $0x14a0] ss:$16 sps:$4 sm:$0xff]  }
 0x110   :  { %5296 = vmatpush1.bf16.msra.mxu1 %v7701_v33  ;;  %5254 = vmatprep.subr.bf16.mxu0 %v7706_v34  ;;  %v7797_v33 = vld [vmem:[%s11334_s1 + $0x16a0] ss:$16 sps:$4 sm:$0xff]   ;;  %v7802_v34 = vld [vmem:[%s11334_s1 + $0x1484] ss:$16 sps:$4 sm:$0xff]  }
 0x111   :  { %5297 = vmatprep.subr.bf16.mxu1 %v7709_v35  ;;  %v7805_v35 = vld [vmem:[%s11334_s1 + $0x1684] ss:$16 sps:$4 sm:$0xff]  }
 0x113   :  { %5255 = vmatpush1.bf16.msra.mxu0 %v7704_v36  ;;  %v7800_v36 = vld [vmem:[%s11334_s1 + $0x1480] ss:$16 sps:$4 sm:$0xff]  }
 0x114   :  { %5298 = vmatpush1.bf16.msra.mxu1 %v7707_v37  ;;  %5256 = vmatprep.subr.bf16.mxu0 %v7712_v38  ;;  %v7803_v37 = vld [vmem:[%s11334_s1 + $0x1680] ss:$16 sps:$4 sm:$0xff]   ;;  %v7808_v38 = vld [vmem:[%s11334_s1 + $0x1464] ss:$16 sps:$4 sm:$0xff]  }
 0x115   :  { %5299 = vmatprep.subr.bf16.mxu1 %v7715_v39  ;;  %v7811_v39 = vld [vmem:[%s11334_s1 + $0x1664] ss:$16 sps:$4 sm:$0xff]  }
 0x117   :  { %5257 = vmatpush1.bf16.msra.mxu0 %v7710_v40  ;;  %v7806_v40 = vld [vmem:[%s11334_s1 + $0x1460] ss:$16 sps:$4 sm:$0xff]  }
 0x118   :  { %5300 = vmatpush1.bf16.msra.mxu1 %v7713_v41  ;;  %5258 = vmatprep.subr.bf16.mxu0 %v7718_v42  ;;  %v7809_v41 = vld [vmem:[%s11334_s1 + $0x1660] ss:$16 sps:$4 sm:$0xff]   ;;  %v7814_v42 = vld [vmem:[%s11334_s1 + $0x1444] ss:$16 sps:$4 sm:$0xff]  }
 0x119   :  { %5301 = vmatprep.subr.bf16.mxu1 %v7721_v43  ;;  %v7817_v43 = vld [vmem:[%s11334_s1 + $0x1644] ss:$16 sps:$4 sm:$0xff]  }
 0x11b   :  { %5259 = vmatpush1.bf16.msra.mxu0 %v7716_v44  ;;  %v7812_v44 = vld [vmem:[%s11334_s1 + $0x1440] ss:$16 sps:$4 sm:$0xff]  }
 0x11c   :  { %5302 = vmatpush1.bf16.msra.mxu1 %v7719_v45  ;;  %5260 = vmatprep.subr.bf16.mxu0 %v7724_v46  ;;  %v7815_v45 = vld [vmem:[%s11334_s1 + $0x1640] ss:$16 sps:$4 sm:$0xff]   ;;  %v7820_v46 = vld [vmem:[%s11334_s1 + $0x1424] ss:$16 sps:$4 sm:$0xff]  }
 0x11d   :  { %5303 = vmatprep.subr.bf16.mxu1 %v7727_v47  ;;  %v7823_v47 = vld [vmem:[%s11334_s1 + $0x1624] ss:$16 sps:$4 sm:$0xff]  }
 0x11f   :  { %5261 = vmatpush1.bf16.msra.mxu0 %v7722_v48  ;;  %v7818_v48 = vld [vmem:[%s11334_s1 + $0x1420] ss:$16 sps:$4 sm:$0xff]  }
 0x120   :  { %5304 = vmatpush1.bf16.msra.mxu1 %v7725_v49  ;;  %5262 = vmatprep.subr.bf16.mxu0 %v7730_v50  ;;  %v7821_v49 = vld [vmem:[%s11334_s1 + $0x1620] ss:$16 sps:$4 sm:$0xff]   ;;  %v7826_v50 = vld [vmem:[%s11334_s1 + $0x1404] ss:$16 sps:$4 sm:$0xff]  }
 0x121   :  { %5305 = vmatprep.subr.bf16.mxu1 %v7733_v51  ;;  %v7829_v51 = vld [vmem:[%s11334_s1 + $0x1604] ss:$16 sps:$4 sm:$0xff]  }
 0x123   :  { %5263 = vmatpush2.bf16.msra.mxu0 %v7728_v52  ;;  %v7824_v52 = vld [vmem:[%s11334_s1 + $0x1400] ss:$16 sps:$4 sm:$0xff]  }
 0x124   :  { %5306 = vmatpush2.bf16.msra.mxu1 %v7731_v53  ;;  %5264 = vmatprep.subr.bf16.mxu0 %v7736_v54  ;;  %v7827_v53 = vld [vmem:[%s11334_s1 + $0x1600] ss:$16 sps:$4 sm:$0xff]   ;;  %v7832_v54 = vld [vmem:[%s11334_s1 + $0x15e4] ss:$16 sps:$4 sm:$0xff]  }
 0x125   :  { %5307 = vmatprep.subr.bf16.mxu1 %v7739_v55  ;;  %v7835_v55 = vld [vmem:[%s11334_s1 + $0x17e4] ss:$16 sps:$4 sm:$0xff]  }
 0x127   :  { %5265 = vmatpush2.bf16.msra.mxu0 %v7734_v56  ;;  %v7830_v56 = vld [vmem:[%s11334_s1 + $0x15e0] ss:$16 sps:$4 sm:$0xff]  }
 0x128   :  { %5308 = vmatpush2.bf16.msra.mxu1 %v7737_v57  ;;  %5266 = vmatprep.subr.bf16.mxu0 %v7742_v58  ;;  %v7833_v57 = vld [vmem:[%s11334_s1 + $0x17e0] ss:$16 sps:$4 sm:$0xff]   ;;  %v7838_v58 = vld [vmem:[%s11334_s1 + $0x15c4] ss:$16 sps:$4 sm:$0xff]  }
 0x129   :  { %5309 = vmatprep.subr.bf16.mxu1 %v7745_v59  ;;  %v7841_v59 = vld [vmem:[%s11334_s1 + $0x17c4] ss:$16 sps:$4 sm:$0xff]  }
 0x12b   :  { %5267 = vmatpush2.bf16.msra.mxu0 %v7740_v60  ;;  %v7836_v60 = vld [vmem:[%s11334_s1 + $0x15c0] ss:$16 sps:$4 sm:$0xff]  }
 0x12c   :  { %5310 = vmatpush2.bf16.msra.mxu1 %v7743_v61  ;;  %5268 = vmatprep.subr.bf16.mxu0 %v7748_v62  ;;  %v7839_v61 = vld [vmem:[%s11334_s1 + $0x17c0] ss:$16 sps:$4 sm:$0xff]   ;;  %v7844_v62 = vld [vmem:[%s11334_s1 + $0x15a4] ss:$16 sps:$4 sm:$0xff]  }
 0x12d   :  { %5311 = vmatprep.subr.bf16.mxu1 %v7751_v63  ;;  %v7847_v63 = vld [vmem:[%s11334_s1 + $0x17a4] ss:$16 sps:$4 sm:$0xff]  }
 0x12f   :  { %5269 = vmatpush2.bf16.msra.mxu0 %v7746_v0  ;;  %v7842_v0 = vld [vmem:[%s11334_s1 + $0x15a0] ss:$16 sps:$4 sm:$0xff]  }
 0x130   :  { %5312 = vmatpush2.bf16.msra.mxu1 %v7749_v1  ;;  %5270 = vmatprep.subr.bf16.mxu0 %v7754_v2  ;;  %v7845_v1 = vld [vmem:[%s11334_s1 + $0x17a0] ss:$16 sps:$4 sm:$0xff]   ;;  %v7850_v2 = vld [vmem:[%s11334_s1 + $0x1584] ss:$16 sps:$4 sm:$0xff]  }
 0x131   :  { %5313 = vmatprep.subr.bf16.mxu1 %v7757_v3  ;;  %v7853_v3 = vld [vmem:[%s11334_s1 + $0x1784] ss:$16 sps:$4 sm:$0xff]  }
 0x133   :  { %5271 = vmatpush2.bf16.msra.mxu0 %v7752_v4  ;;  %v7848_v4 = vld [vmem:[%s11334_s1 + $0x1580] ss:$16 sps:$4 sm:$0xff]  }
 0x134   :  { %5314 = vmatpush2.bf16.msra.mxu1 %v7755_v5  ;;  %5272 = vmatprep.subr.bf16.mxu0 %v7760_v6  ;;  %v7851_v5 = vld [vmem:[%s11334_s1 + $0x1780] ss:$16 sps:$4 sm:$0xff]   ;;  %v7856_v6 = vld [vmem:[%s11334_s1 + $0x1564] ss:$16 sps:$4 sm:$0xff]  }
 0x135   :  { %5315 = vmatprep.subr.bf16.mxu1 %v7763_v7  ;;  %v7859_v7 = vld [vmem:[%s11334_s1 + $0x1764] ss:$16 sps:$4 sm:$0xff]  }
 0x137   :  { %5273 = vmatpush2.bf16.msra.mxu0 %v7758_v8  ;;  %v7854_v8 = vld [vmem:[%s11334_s1 + $0x1560] ss:$16 sps:$4 sm:$0xff]  }
 0x138   :  { %5316 = vmatpush2.bf16.msra.mxu1 %v7761_v9  ;;  %5274 = vmatprep.subr.bf16.mxu0 %v7766_v10  ;;  %v7857_v9 = vld [vmem:[%s11334_s1 + $0x1760] ss:$16 sps:$4 sm:$0xff]   ;;  %v7862_v10 = vld [vmem:[%s11334_s1 + $0x1544] ss:$16 sps:$4 sm:$0xff]  }
 0x139   :  { %5317 = vmatprep.subr.bf16.mxu1 %v7769_v11  ;;  %v7865_v11 = vld [vmem:[%s11334_s1 + $0x1744] ss:$16 sps:$4 sm:$0xff]  }
 0x13b   :  { %5275 = vmatpush2.bf16.msra.mxu0 %v7764_v12  ;;  %v7860_v12 = vld [vmem:[%s11334_s1 + $0x1540] ss:$16 sps:$4 sm:$0xff]  }
 0x13c   :  { %5318 = vmatpush2.bf16.msra.mxu1 %v7767_v13  ;;  %5276 = vmatprep.subr.bf16.mxu0 %v7772_v14  ;;  %v7863_v13 = vld [vmem:[%s11334_s1 + $0x1740] ss:$16 sps:$4 sm:$0xff]   ;;  %v7868_v14 = vld [vmem:[%s11334_s1 + $0x1524] ss:$16 sps:$4 sm:$0xff]  }
 0x13d   :  { %5319 = vmatprep.subr.bf16.mxu1 %v7775_v15  ;;  %v7871_v15 = vld [vmem:[%s11334_s1 + $0x1724] ss:$16 sps:$4 sm:$0xff]  }
 0x13f   :  { %5277 = vmatpush2.bf16.msra.mxu0 %v7770_v16  ;;  %v7866_v16 = vld [vmem:[%s11334_s1 + $0x1520] ss:$16 sps:$4 sm:$0xff]  }
 0x140   :  { %5320 = vmatpush2.bf16.msra.mxu1 %v7773_v17  ;;  %5332 = vmatprep.subr.bf16.mxu0 %v7784_v20  ;;  %v7869_v17 = vld [vmem:[%s11334_s1 + $0x1720] ss:$16 sps:$4 sm:$0xff]  }
 0x141   :  { %5375 = vmatprep.subr.bf16.mxu1 %v7787_v21  ;;  %v7872_v20 = vld [vmem:[%s11334_s1 + $0x1500] ss:$16 sps:$4 sm:$0xff]  }
 0x142   :  { %5279 = vmatmul.mubr.bf16.vlgmr.msra.gmra.mxu0 %v7776_v18  ;;  %v7874_v18 = vld [vmem:[%s11334_s1 + $0x1504] ss:$16 sps:$4 sm:$0xff]   ;;  %v7875_v21 = vld [vmem:[%s11334_s1 + $0x1700] ss:$16 sps:$4 sm:$0xff]  }
 0x143   :  { %5322 = vmatmul.mubr.bf16.vlgmr.msra.gmra.mxu1 %v7779_v19  ;;  %5333 = vmatpush1.bf16.msra.mxu0 %v7782_v22  ;;  %v7877_v19 = vld [vmem:[%s11334_s1 + $0x1704] ss:$16 sps:$4 sm:$0xff]  }
 0x144   :  { %5376 = vmatpush1.bf16.msra.mxu1 %v7785_v23  ;;  %5334 = vmatprep.subr.bf16.mxu0 %v7790_v24  ;;  %v7878_v22 = vld [vmem:[%s11335_s0 + $0x50] ss:$100 sps:$4 sm:$0xff]   ;;  %v7881_v23 = vld [vmem:[%s11335_s0 + $0x58] ss:$100 sps:$4 sm:$0xff]  }
 0x145   :  { %5377 = vmatprep.subr.bf16.mxu1 %v7793_v25  ;;  %5364 = vmatprep.mubr.bf16.mxu0 %v7880_v28  ;;  %v7886_v24 = vld [vmem:[%s11334_s1 + $0x1864] ss:$16 sps:$4 sm:$0xff]   ;;  %v7889_v25 = vld [vmem:[%s11334_s1 + $0xec] ss:$16 sps:$4 sm:$0xff]  }
 0x146   :  { %5407 = vmatprep.mubr.bf16.mxu1 %v7883_v29  ;;  %v7892_v28 = vld [vmem:[%s11334_s1 + $0x1844] ss:$16 sps:$4 sm:$0xff]   ;;  %v7895_v29 = vld [vmem:[%s11334_s1 + $0xcc] ss:$16 sps:$4 sm:$0xff]  }
 0x147   :  { %5335 = vmatpush1.bf16.msra.mxu0 %v7788_v26  ;;  %v7884_v26 = vld [vmem:[%s11334_s1 + $0x1860] ss:$16 sps:$4 sm:$0xff]  }
 0x148   :  { %5378 = vmatpush1.bf16.msra.mxu1 %v7791_v27  ;;  %5336 = vmatprep.subr.bf16.mxu0 %v7796_v30  ;;  %v7887_v27 = vld [vmem:[%s11334_s1 + $0xe8] ss:$16 sps:$4 sm:$0xff]   ;;  %v7890_v30 = vld [vmem:[%s11334_s1 + $0x1840] ss:$16 sps:$4 sm:$0xff]  }
 0x149   :  { %5379 = vmatprep.subr.bf16.mxu1 %v7799_v31  ;;  %v7893_v31 = vld [vmem:[%s11334_s1 + $0xc8] ss:$16 sps:$4 sm:$0xff]  }
 0x14b   :  { %5337 = vmatpush1.bf16.msra.mxu0 %v7794_v32  ;;  %v7898_v32 = vld [vmem:[%s11334_s1 + $0x1824] ss:$16 sps:$4 sm:$0xff]  }
 0x14c   :  { %5380 = vmatpush1.bf16.msra.mxu1 %v7797_v33  ;;  %5338 = vmatprep.subr.bf16.mxu0 %v7802_v34  ;;  %v7901_v33 = vld [vmem:[%s11334_s1 + $0xac] ss:$16 sps:$4 sm:$0xff]   ;;  %v7896_v34 = vld [vmem:[%s11334_s1 + $0x1820] ss:$16 sps:$4 sm:$0xff]  }
 0x14d   :  { %5381 = vmatprep.subr.bf16.mxu1 %v7805_v35  ;;  %v7899_v35 = vld [vmem:[%s11334_s1 + $0xa8] ss:$16 sps:$4 sm:$0xff]  }
 0x14f   :  { %5339 = vmatpush1.bf16.msra.mxu0 %v7800_v36  ;;  %v8542_v36 = vmov 0  }
 0x150   :  { %5382 = vmatpush1.bf16.msra.mxu1 %v7803_v37  ;;  %5340 = vmatprep.subr.bf16.mxu0 %v7808_v38  ;;  %v8517_v37 = vld [vmem:[%s11335_s0 + $0x4] ss:$100 sps:$4 sm:$0xff]  }
 0x151   :  { %5383 = vmatprep.subr.bf16.mxu1 %v7811_v39  ;;  %v7904_v38 = vld [vmem:[%s11334_s1 + $0x1804] ss:$16 sps:$4 sm:$0xff]   ;;  %v7907_v39 = vld [vmem:[%s11334_s1 + $0x8c] ss:$16 sps:$4 sm:$0xff]  }
 0x153   :  { %5341 = vmatpush1.bf16.msra.mxu0 %v7806_v40  ;;  %v7902_v40 = vld [vmem:[%s11334_s1 + $0x1800] ss:$16 sps:$4 sm:$0xff]  }
 0x154   :  { %5384 = vmatpush1.bf16.msra.mxu1 %v7809_v41  ;;  %5342 = vmatprep.subr.bf16.mxu0 %v7814_v42  ;;  %v7905_v41 = vld [vmem:[%s11334_s1 + $0x88] ss:$16 sps:$4 sm:$0xff]   ;;  %v7908_v42 = vld [vmem:[%s11335_s0 + $0x60] ss:$100 sps:$4 sm:$0xff]  }
 0x155   :  { %5385 = vmatprep.subr.bf16.mxu1 %v7817_v43  ;;  %v7911_v43 = vld [vmem:[%s11334_s1 + $0x6c] ss:$16 sps:$4 sm:$0xff]  }
 0x157   :  { %5343 = vmatpush1.bf16.msra.mxu0 %v7812_v44  ;;  %v7914_v44 = vld [vmem:[%s11334_s1 + $0x2ec] ss:$16 sps:$4 sm:$0xff]  }
 0x158   :  { %5386 = vmatpush1.bf16.msra.mxu1 %v7815_v45  ;;  %5344 = vmatprep.subr.bf16.mxu0 %v7820_v46  ;;  %v7909_v45 = vld [vmem:[%s11334_s1 + $0x68] ss:$16 sps:$4 sm:$0xff]  }
 0x159   :  { %5387 = vmatprep.subr.bf16.mxu1 %v7823_v47  ;;  %v7912_v46 = vld [vmem:[%s11334_s1 + $0x2e8] ss:$16 sps:$4 sm:$0xff]   ;;  %v7917_v47 = vld [vmem:[%s11334_s1 + $0x4c] ss:$16 sps:$4 sm:$0xff]  }
 0x15b   :  { %5345 = vmatpush1.bf16.msra.mxu0 %v7818_v48  ;;  %v7920_v48 = vld [vmem:[%s11334_s1 + $0x2cc] ss:$16 sps:$4 sm:$0xff]  }
 0x15c   :  { %5388 = vmatpush1.bf16.msra.mxu1 %v7821_v49  ;;  %5346 = vmatprep.subr.bf16.mxu0 %v7826_v50  ;;  %v7915_v49 = vld [vmem:[%s11334_s1 + $0x48] ss:$16 sps:$4 sm:$0xff]  }
 0x15d   :  { %5389 = vmatprep.subr.bf16.mxu1 %v7829_v51  ;;  %v7918_v50 = vld [vmem:[%s11334_s1 + $0x2c8] ss:$16 sps:$4 sm:$0xff]   ;;  %v7923_v51 = vld [vmem:[%s11334_s1 + $0x2c] ss:$16 sps:$4 sm:$0xff]  }
 0x15f   :  { %5347 = vmatpush1.bf16.msra.mxu0 %v7824_v52  ;;  %v7926_v52 = vld [vmem:[%s11334_s1 + $0x2ac] ss:$16 sps:$4 sm:$0xff]  }
 0x160   :  { %5390 = vmatpush1.bf16.msra.mxu1 %v7827_v53  ;;  %5348 = vmatprep.subr.bf16.mxu0 %v7832_v54  ;;  %v8518_v53 = vld [vmem:[%s11335_s0 + $0xc] ss:$100 sps:$4 sm:$0xff]   ;;  %v7921_v54 = vld [vmem:[%s11334_s1 + $0x28] ss:$16 sps:$4 sm:$0xff]  }
 0x161   :  { %5391 = vmatprep.subr.bf16.mxu1 %v7835_v55  ;;  %v7924_v55 = vld [vmem:[%s11334_s1 + $0x2a8] ss:$16 sps:$4 sm:$0xff]  }
 0x163   :  { %5349 = vmatpush2.bf16.msra.mxu0 %v7830_v56  ;;  %v7929_v56 = vld [vmem:[%s11334_s1 + $0xc] ss:$16 sps:$4 sm:$0xff]  }
 0x164   :  { %5392 = vmatpush2.bf16.msra.mxu1 %v7833_v57  ;;  %5350 = vmatprep.subr.bf16.mxu0 %v7838_v58  ;;  %v7932_v57 = vld [vmem:[%s11334_s1 + $0x28c] ss:$16 sps:$4 sm:$0xff]   ;;  %v7927_v58 = vld [vmem:[%s11334_s1 + $0x8] ss:$16 sps:$4 sm:$0xff]  }
 0x165   :  { %5393 = vmatprep.subr.bf16.mxu1 %v7841_v59  ;;  %v7930_v59 = vld [vmem:[%s11334_s1 + $0x288] ss:$16 sps:$4 sm:$0xff]  }
 0x167   :  { %5351 = vmatpush2.bf16.msra.mxu0 %v7836_v60  ;;  %v7935_v60 = vld [vmem:[%s11334_s1 + $0x1ec] ss:$16 sps:$4 sm:$0xff]  }
 0x168   :  { %5394 = vmatpush2.bf16.msra.mxu1 %v7839_v61  ;;  %5352 = vmatprep.subr.bf16.mxu0 %v7844_v62  ;;  %v7938_v61 = vld [vmem:[%s11334_s1 + $0x26c] ss:$16 sps:$4 sm:$0xff]   ;;  %v7933_v62 = vld [vmem:[%s11334_s1 + $0x1e8] ss:$16 sps:$4 sm:$0xff]  }
 0x169   :  { %5395 = vmatprep.subr.bf16.mxu1 %v7847_v63  ;;  %v7936_v63 = vld [vmem:[%s11334_s1 + $0x268] ss:$16 sps:$4 sm:$0xff]  }
 0x16b   :  { %5353 = vmatpush2.bf16.msra.mxu0 %v7842_v0  ;;  %v7941_v0 = vld [vmem:[%s11334_s1 + $0x1cc] ss:$16 sps:$4 sm:$0xff]  }
 0x16c   :  { %5396 = vmatpush2.bf16.msra.mxu1 %v7845_v1  ;;  %5354 = vmatprep.subr.bf16.mxu0 %v7850_v2  ;;  %v7944_v1 = vld [vmem:[%s11334_s1 + $0x24c] ss:$16 sps:$4 sm:$0xff]   ;;  %v7939_v2 = vld [vmem:[%s11334_s1 + $0x1c8] ss:$16 sps:$4 sm:$0xff]  }
 0x16d   :  { %5397 = vmatprep.subr.bf16.mxu1 %v7853_v3  ;;  %v7942_v3 = vld [vmem:[%s11334_s1 + $0x248] ss:$16 sps:$4 sm:$0xff]  }
 0x16f   :  { %5355 = vmatpush2.bf16.msra.mxu0 %v7848_v4  ;;  %v7947_v4 = vld [vmem:[%s11334_s1 + $0x1ac] ss:$16 sps:$4 sm:$0xff]  }
 0x170   :  { %5398 = vmatpush2.bf16.msra.mxu1 %v7851_v5  ;;  %5356 = vmatprep.subr.bf16.mxu0 %v7856_v6  ;;  %v7950_v5 = vld [vmem:[%s11334_s1 + $0x22c] ss:$16 sps:$4 sm:$0xff]   ;;  %v7945_v6 = vld [vmem:[%s11334_s1 + $0x1a8] ss:$16 sps:$4 sm:$0xff]  }
 0x171   :  { %5399 = vmatprep.subr.bf16.mxu1 %v7859_v7  ;;  %v7948_v7 = vld [vmem:[%s11334_s1 + $0x228] ss:$16 sps:$4 sm:$0xff]  }
 0x173   :  { %5357 = vmatpush2.bf16.msra.mxu0 %v7854_v8  ;;  %v7953_v8 = vld [vmem:[%s11334_s1 + $0x18c] ss:$16 sps:$4 sm:$0xff]  }
 0x174   :  { %5400 = vmatpush2.bf16.msra.mxu1 %v7857_v9  ;;  %5358 = vmatprep.subr.bf16.mxu0 %v7862_v10  ;;  %v7956_v9 = vld [vmem:[%s11334_s1 + $0x20c] ss:$16 sps:$4 sm:$0xff]   ;;  %v7951_v10 = vld [vmem:[%s11334_s1 + $0x188] ss:$16 sps:$4 sm:$0xff]  }
 0x175   :  { %5401 = vmatprep.subr.bf16.mxu1 %v7865_v11  ;;  %v7954_v11 = vld [vmem:[%s11334_s1 + $0x208] ss:$16 sps:$4 sm:$0xff]  }
 0x177   :  { %5359 = vmatpush2.bf16.msra.mxu0 %v7860_v12  ;;  %v7959_v12 = vld [vmem:[%s11334_s1 + $0x16c] ss:$16 sps:$4 sm:$0xff]  }
 0x178   :  { %5402 = vmatpush2.bf16.msra.mxu1 %v7863_v13  ;;  %5360 = vmatprep.subr.bf16.mxu0 %v7868_v14  ;;  %v7962_v13 = vld [vmem:[%s11334_s1 + $0x3ec] ss:$16 sps:$4 sm:$0xff]   ;;  %v7957_v14 = vld [vmem:[%s11334_s1 + $0x168] ss:$16 sps:$4 sm:$0xff]  }
 0x179   :  { %5403 = vmatprep.subr.bf16.mxu1 %v7871_v15  ;;  %v7960_v15 = vld [vmem:[%s11334_s1 + $0x3e8] ss:$16 sps:$4 sm:$0xff]  }
 0x17b   :  { %5361 = vmatpush2.bf16.msra.mxu0 %v7866_v16  ;;  %v7965_v16 = vld [vmem:[%s11334_s1 + $0x14c] ss:$16 sps:$4 sm:$0xff]  }
 0x17c   :  { %5404 = vmatpush2.bf16.msra.mxu1 %v7869_v17  ;;  %5362 = vmatprep.subr.bf16.mxu0 %v7874_v18  ;;  %v7968_v17 = vld [vmem:[%s11334_s1 + $0x3cc] ss:$16 sps:$4 sm:$0xff]   ;;  %v7963_v18 = vld [vmem:[%s11334_s1 + $0x148] ss:$16 sps:$4 sm:$0xff]  }
 0x17d   :  { %5405 = vmatprep.subr.bf16.mxu1 %v7877_v19  ;;  %v7966_v19 = vld [vmem:[%s11334_s1 + $0x3c8] ss:$16 sps:$4 sm:$0xff]  }
 0x17f   :  { %5363 = vmatpush2.bf16.msra.mxu0 %v7872_v20  ;;  %v7971_v20 = vld [vmem:[%s11334_s1 + $0x12c] ss:$16 sps:$4 sm:$0xff]  }
 0x180   :  { %5406 = vmatpush2.bf16.msra.mxu1 %v7875_v21  ;;  %5426 = vmatprep.subr.bf16.mxu0 %v7886_v24  ;;  %v7974_v21 = vld [vmem:[%s11334_s1 + $0x3ac] ss:$16 sps:$4 sm:$0xff]  }
 0x181   :  { %5461 = vmatprep.subr.bf16.mxu1 %v7889_v25  ;;  %v7977_v24 = vld [vmem:[%s11334_s1 + $0x10c] ss:$16 sps:$4 sm:$0xff]  }
 0x182   :  { %5365 = vmatmul.mubr.bf16.vlgmr.msra.gmra.mxu0 %v7878_v22  ;;  %v7969_v22 = vld [vmem:[%s11334_s1 + $0x128] ss:$16 sps:$4 sm:$0xff]   ;;  %v7980_v25 = vld [vmem:[%s11334_s1 + $0x38c] ss:$16 sps:$4 sm:$0xff]  }
 0x183   :  { %5408 = vmatmul.mubr.bf16.vlgmr.msra.gmra.mxu1 %v7881_v23  ;;  %5427 = vmatpush1.bf16.msra.mxu0 %v7884_v26  ;;  %v7972_v23 = vld [vmem:[%s11334_s1 + $0x3a8] ss:$16 sps:$4 sm:$0xff]  }
 0x184   :  { %5462 = vmatpush1.bf16.msra.mxu1 %v7887_v27  ;;  %5428 = vmatprep.subr.bf16.mxu0 %v7892_v28  ;;  %v7975_v26 = vld [vmem:[%s11334_s1 + $0x108] ss:$16 sps:$4 sm:$0xff]   ;;  %v7983_v28 = vld [vmem:[%s11334_s1 + $0x36c] ss:$16 sps:$4 sm:$0xff]  }
 0x185   :  { %5463 = vmatprep.subr.bf16.mxu1 %v7895_v29  ;;  %5450 = vmatprep.mubr.bf16.mxu0 %v8542_v36  ;;  %v7978_v27 = vld [vmem:[%s11334_s1 + $0x388] ss:$16 sps:$4 sm:$0xff]   ;;  %v7986_v29 = vld [vmem:[%s11334_s1 + $0x4ec] ss:$16 sps:$4 sm:$0xff]  }
 0x186   :  { %5493 = vmatprep.mubr.bf16.mxu1 %v8517_v37  ;;  %v8519_v37 = vld [vmem:[%s11335_s0] ss:$100 sps:$4 sm:$0xff]  }
 0x187   :  { %5429 = vmatpush1.bf16.msra.mxu0 %v7890_v30  ;;  %v7981_v30 = vld [vmem:[%s11334_s1 + $0x368] ss:$16 sps:$4 sm:$0xff]  }
 0x188   :  { %5464 = vmatpush1.bf16.msra.mxu1 %v7893_v31  ;;  %5430 = vmatprep.subr.bf16.mxu0 %v7898_v32  ;;  %v7984_v31 = vld [vmem:[%s11334_s1 + $0x4e8] ss:$16 sps:$4 sm:$0xff]   ;;  %v7989_v32 = vld [vmem:[%s11334_s1 + $0x34c] ss:$16 sps:$4 sm:$0xff]  }
 0x189   :  { %5465 = vmatprep.subr.bf16.mxu1 %v7901_v33  ;;  %v7992_v33 = vld [vmem:[%s11334_s1 + $0x4cc] ss:$16 sps:$4 sm:$0xff]  }
 0x18b   :  { %5431 = vmatpush1.bf16.msra.mxu0 %v7896_v34  ;;  %v7987_v34 = vld [vmem:[%s11334_s1 + $0x348] ss:$16 sps:$4 sm:$0xff]  }
 0x18c   :  { %5466 = vmatpush1.bf16.msra.mxu1 %v7899_v35  ;;  %5432 = vmatprep.subr.bf16.mxu0 %v7904_v38  ;;  %v7990_v35 = vld [vmem:[%s11334_s1 + $0x4c8] ss:$16 sps:$4 sm:$0xff]   ;;  %v7995_v38 = vld [vmem:[%s11334_s1 + $0x32c] ss:$16 sps:$4 sm:$0xff]  }
 0x18d   :  { %5467 = vmatprep.subr.bf16.mxu1 %v7907_v39  ;;  %v7998_v39 = vld [vmem:[%s11334_s1 + $0x4ac] ss:$16 sps:$4 sm:$0xff]  }
 0x18f   :  { %5433 = vmatpush1.bf16.msra.mxu0 %v7902_v40  ;;  %v7993_v40 = vld [vmem:[%s11334_s1 + $0x328] ss:$16 sps:$4 sm:$0xff]  }
 0x190   :  { %5468 = vmatpush1.bf16.msra.mxu1 %v7905_v41  ;;  %5504 = vmatprep.subr.bf16.mxu0 %v7914_v44  ;;  %v7996_v41 = vld [vmem:[%s11334_s1 + $0x4a8] ss:$16 sps:$4 sm:$0xff]   ;;  %v8004_v44 = vld [vmem:[%s11334_s1 + $0x48c] ss:$16 sps:$4 sm:$0xff]  }
 0x191   :  { %5469 = vmatprep.subr.bf16.mxu1 %v7911_v43  ;;  %v8001_v43 = vld [vmem:[%s11334_s1 + $0x30c] ss:$16 sps:$4 sm:$0xff]  }
 0x192   :  { %7192 = vmatmul.mubr.msk.bf16.vlgmr.msra.gmra.mxu0 %vm4898_vm0, %v7908_v42  ;;  %v8520_v42 = vld [vmem:[%s11335_s0 + $0x14] ss:$100 sps:$4 sm:$0xff]  }
 0x193   :  { %5505 = vmatpush1.bf16.msra.mxu0 %v7912_v46  ;;  %5536 = vmatprep.mubr.bf16.mxu0 %v8518_v53  ;;  %v8002_v46 = vld [vmem:[%s11334_s1 + $0x488] ss:$16 sps:$4 sm:$0xff]  }
 0x194   :  { %5470 = vmatpush1.bf16.msra.mxu1 %v7909_v45  ;;  %5506 = vmatprep.subr.bf16.mxu0 %v7920_v48  ;;  %v7999_v45 = vld [vmem:[%s11334_s1 + $0x308] ss:$16 sps:$4 sm:$0xff]   ;;  %v8010_v48 = vld [vmem:[%s11334_s1 + $0x6ec] ss:$16 sps:$4 sm:$0xff]  }
 0x195   :  { %5471 = vmatprep.subr.bf16.mxu1 %v7917_v47  ;;  %v8007_v47 = vld [vmem:[%s11334_s1 + $0x46c] ss:$16 sps:$4 sm:$0xff]   ;;  %v8011_v53 = vld [vmem:[%s11334_s1 + $0x448] ss:$16 sps:$4 sm:$0xff]  }
 0x197   :  { %5507 = vmatpush1.bf16.msra.mxu0 %v7918_v50  ;;  %v8008_v50 = vld [vmem:[%s11334_s1 + $0x6e8] ss:$16 sps:$4 sm:$0xff]  }
 0x198   :  { %5472 = vmatpush1.bf16.msra.mxu1 %v7915_v49  ;;  %5508 = vmatprep.subr.bf16.mxu0 %v7926_v52  ;;  %v8005_v49 = vld [vmem:[%s11334_s1 + $0x468] ss:$16 sps:$4 sm:$0xff]   ;;  %v8016_v52 = vld [vmem:[%s11334_s1 + $0x6cc] ss:$16 sps:$4 sm:$0xff]  }
 0x199   :  { %5473 = vmatprep.subr.bf16.mxu1 %v7923_v51  ;;  %v8013_v51 = vld [vmem:[%s11334_s1 + $0x44c] ss:$16 sps:$4 sm:$0xff]  }
 0x19b   :  { %5509 = vmatpush1.bf16.msra.mxu0 %v7924_v55  ;;  %v8521_v55 = vld [vmem:[%s11335_s0 + $0x8] ss:$100 sps:$4 sm:$0xff]  }
 0x19c   :  { %5474 = vmatpush1.bf16.msra.mxu1 %v7921_v54  ;;  %5510 = vmatprep.subr.bf16.mxu0 %v7932_v57  ;;  %v8014_v54 = vld [vmem:[%s11334_s1 + $0x6c8] ss:$16 sps:$4 sm:$0xff]   ;;  %v8022_v57 = vld [vmem:[%s11334_s1 + $0x6ac] ss:$16 sps:$4 sm:$0xff]  }
 0x19d   :  { %5475 = vmatprep.subr.bf16.mxu1 %v7929_v56  ;;  %v8019_v56 = vld [vmem:[%s11334_s1 + $0x42c] ss:$16 sps:$4 sm:$0xff]  }
 0x19f   :  { %5511 = vmatpush1.bf16.msra.mxu0 %v7930_v59  ;;  %v8020_v59 = vld [vmem:[%s11334_s1 + $0x6a8] ss:$16 sps:$4 sm:$0xff]  }
 0x1a0   :  { %5476 = vmatpush1.bf16.msra.mxu1 %v7927_v58  ;;  %5512 = vmatprep.subr.bf16.mxu0 %v7938_v61  ;;  %v8017_v58 = vld [vmem:[%s11334_s1 + $0x428] ss:$16 sps:$4 sm:$0xff]   ;;  %v8025_v61 = vld [vmem:[%s11334_s1 + $0x40c] ss:$16 sps:$4 sm:$0xff]  }
 0x1a1   :  { %5477 = vmatprep.subr.bf16.mxu1 %v7935_v60  ;;  %v8522_v60 = vld [vmem:[%s11335_s0 + $0x1c] ss:$100 sps:$4 sm:$0xff]  }
 0x1a3   :  { %5513 = vmatpush1.bf16.msra.mxu0 %v7936_v63  ;;  %v8023_v63 = vld [vmem:[%s11334_s1 + $0x408] ss:$16 sps:$4 sm:$0xff]  }
 0x1a4   :  { %5478 = vmatpush2.bf16.msra.mxu1 %v7933_v62  ;;  %5514 = vmatprep.subr.bf16.mxu0 %v7944_v1  ;;  %v8028_v62 = vld [vmem:[%s11334_s1 + $0x68c] ss:$16 sps:$4 sm:$0xff]  }
 0x1a5   :  { %5479 = vmatprep.subr.bf16.mxu1 %v7941_v0  ;;  %v8026_v0 = vld [vmem:[%s11334_s1 + $0x688] ss:$16 sps:$4 sm:$0xff]   ;;  %v8031_v1 = vld [vmem:[%s11334_s1 + $0x5ec] ss:$16 sps:$4 sm:$0xff]  }
 0x1a7   :  { %5515 = vmatpush1.bf16.msra.mxu0 %v7942_v3  ;;  %v8029_v3 = vld [vmem:[%s11334_s1 + $0x5e8] ss:$16 sps:$4 sm:$0xff]  }
 0x1a8   :  { %5480 = vmatpush2.bf16.msra.mxu1 %v7939_v2  ;;  %5516 = vmatprep.subr.bf16.mxu0 %v7950_v5  ;;  %v8034_v2 = vld [vmem:[%s11334_s1 + $0x66c] ss:$16 sps:$4 sm:$0xff]  }
 0x1a9   :  { %5481 = vmatprep.subr.bf16.mxu1 %v7947_v4  ;;  %v8032_v4 = vld [vmem:[%s11334_s1 + $0x668] ss:$16 sps:$4 sm:$0xff]   ;;  %v8037_v5 = vld [vmem:[%s11334_s1 + $0x5cc] ss:$16 sps:$4 sm:$0xff]  }
 0x1ab   :  { %5517 = vmatpush1.bf16.msra.mxu0 %v7948_v7  ;;  %v8035_v7 = vld [vmem:[%s11334_s1 + $0x5c8] ss:$16 sps:$4 sm:$0xff]  }
 0x1ac   :  { %5482 = vmatpush2.bf16.msra.mxu1 %v7945_v6  ;;  %5518 = vmatprep.subr.bf16.mxu0 %v7956_v9  ;;  %v8040_v6 = vld [vmem:[%s11334_s1 + $0x64c] ss:$16 sps:$4 sm:$0xff]  }
 0x1ad   :  { %5483 = vmatprep.subr.bf16.mxu1 %v7953_v8  ;;  %v8038_v8 = vld [vmem:[%s11334_s1 + $0x648] ss:$16 sps:$4 sm:$0xff]   ;;  %v8043_v9 = vld [vmem:[%s11334_s1 + $0x5ac] ss:$16 sps:$4 sm:$0xff]  }
 0x1af   :  { %5519 = vmatpush1.bf16.msra.mxu0 %v7954_v11  ;;  %v8041_v11 = vld [vmem:[%s11334_s1 + $0x5a8] ss:$16 sps:$4 sm:$0xff]  }
 0x1b0   :  { %5484 = vmatpush2.bf16.msra.mxu1 %v7951_v10  ;;  %5520 = vmatprep.subr.bf16.mxu0 %v7962_v13  ;;  %v8046_v10 = vld [vmem:[%s11334_s1 + $0x62c] ss:$16 sps:$4 sm:$0xff]  }
 0x1b1   :  { %5485 = vmatprep.subr.bf16.mxu1 %v7959_v12  ;;  %v8044_v12 = vld [vmem:[%s11334_s1 + $0x628] ss:$16 sps:$4 sm:$0xff]   ;;  %v8049_v13 = vld [vmem:[%s11334_s1 + $0x58c] ss:$16 sps:$4 sm:$0xff]  }
 0x1b3   :  { %5521 = vmatpush2.bf16.msra.mxu0 %v7960_v15  ;;  %v8047_v15 = vld [vmem:[%s11334_s1 + $0x588] ss:$16 sps:$4 sm:$0xff]  }
 0x1b4   :  { %5486 = vmatpush2.bf16.msra.mxu1 %v7957_v14  ;;  %5522 = vmatprep.subr.bf16.mxu0 %v7968_v17  ;;  %v8052_v14 = vld [vmem:[%s11334_s1 + $0x60c] ss:$16 sps:$4 sm:$0xff]  }
 0x1b5   :  { %5487 = vmatprep.subr.bf16.mxu1 %v7965_v16  ;;  %v8050_v16 = vld [vmem:[%s11334_s1 + $0x608] ss:$16 sps:$4 sm:$0xff]   ;;  %v8055_v17 = vld [vmem:[%s11334_s1 + $0x56c] ss:$16 sps:$4 sm:$0xff]  }
 0x1b7   :  { %5523 = vmatpush2.bf16.msra.mxu0 %v7966_v19  ;;  %v8053_v19 = vld [vmem:[%s11334_s1 + $0x568] ss:$16 sps:$4 sm:$0xff]  }
 0x1b8   :  { %5488 = vmatpush2.bf16.msra.mxu1 %v7963_v18  ;;  %5524 = vmatprep.subr.bf16.mxu0 %v7974_v21  ;;  %v8058_v18 = vld [vmem:[%s11334_s1 + $0x7ec] ss:$16 sps:$4 sm:$0xff]  }
 0x1b9   :  { %5489 = vmatprep.subr.bf16.mxu1 %v7971_v20  ;;  %v8056_v20 = vld [vmem:[%s11334_s1 + $0x7e8] ss:$16 sps:$4 sm:$0xff]   ;;  %v8061_v21 = vld [vmem:[%s11334_s1 + $0x54c] ss:$16 sps:$4 sm:$0xff]  }
 0x1bb   :  { %5525 = vmatpush2.bf16.msra.mxu0 %v7972_v23  ;;  %v8059_v23 = vld [vmem:[%s11334_s1 + $0x548] ss:$16 sps:$4 sm:$0xff]  }
 0x1bc   :  { %5490 = vmatpush2.bf16.msra.mxu1 %v7969_v22  ;;  %5526 = vmatprep.subr.bf16.mxu0 %v7980_v25  ;;  %v8064_v22 = vld [vmem:[%s11334_s1 + $0x7cc] ss:$16 sps:$4 sm:$0xff]  }
 0x1bd   :  { %5491 = vmatprep.subr.bf16.mxu1 %v7977_v24  ;;  %v8062_v24 = vld [vmem:[%s11334_s1 + $0x7c8] ss:$16 sps:$4 sm:$0xff]   ;;  %v8067_v25 = vld [vmem:[%s11334_s1 + $0x52c] ss:$16 sps:$4 sm:$0xff]  }
 0x1bf   :  { %5527 = vmatpush2.bf16.msra.mxu0 %v7978_v27  ;;  %v8065_v27 = vld [vmem:[%s11334_s1 + $0x528] ss:$16 sps:$4 sm:$0xff]  }
 0x1c0   :  { %5492 = vmatpush2.bf16.msra.mxu1 %v7975_v26  ;;  %5528 = vmatprep.subr.bf16.mxu0 %v7983_v28  ;;  %v8070_v26 = vld [vmem:[%s11334_s1 + $0x7ac] ss:$16 sps:$4 sm:$0xff]   ;;  %v8068_v28 = vld [vmem:[%s11334_s1 + $0x7a8] ss:$16 sps:$4 sm:$0xff]  }
 0x1c1   :  { %5547 = vmatprep.subr.bf16.mxu1 %v7986_v29  ;;  %v8073_v29 = vld [vmem:[%s11334_s1 + $0x50c] ss:$16 sps:$4 sm:$0xff]  }
 0x1c3   :  { %5494 = vmatmul.mubr.bf16.vlgmr.msra.gmra.mxu1 %v8519_v37  ;;  %5529 = vmatpush2.bf16.msra.mxu0 %v7981_v30  ;;  %v8076_v30 = vld [vmem:[%s11334_s1 + $0x78c] ss:$16 sps:$4 sm:$0xff]   ;;  %v8080_v37 = vld [vmem:[%s11334_s1 + $0x8e8] ss:$16 sps:$4 sm:$0xff]  }
 0x1c4   :  { %5548 = vmatpush1.bf16.msra.mxu1 %v7984_v31  ;;  %5530 = vmatprep.subr.bf16.mxu0 %v7989_v32  ;;  %v8071_v31 = vld [vmem:[%s11334_s1 + $0x508] ss:$16 sps:$4 sm:$0xff]  }
 0x1c5   :  { %5549 = vmatprep.subr.bf16.mxu1 %v7992_v33  ;;  %5579 = vmatprep.mubr.bf16.mxu1 %v8520_v42  ;;  %v8074_v32 = vld [vmem:[%s11334_s1 + $0x788] ss:$16 sps:$4 sm:$0xff]   ;;  %v8079_v33 = vld [vmem:[%s11334_s1 + $0x76c] ss:$16 sps:$4 sm:$0xff]  }
 0x1c6   :  { %v8086_v42 = vld [vmem:[%s11334_s1 + $0x8c8] ss:$16 sps:$4 sm:$0xff]  }
 0x1c7   :  { %5531 = vmatpush2.bf16.msra.mxu0 %v7987_v34  ;;  %v8082_v34 = vld [vmem:[%s11334_s1 + $0x8ec] ss:$16 sps:$4 sm:$0xff]  }
 0x1c8   :  { %5550 = vmatpush1.bf16.msra.mxu1 %v7990_v35  ;;  %5532 = vmatprep.subr.bf16.mxu0 %v7995_v38  ;;  %v8077_v35 = vld [vmem:[%s11334_s1 + $0x768] ss:$16 sps:$4 sm:$0xff]   ;;  %v8085_v38 = vld [vmem:[%s11334_s1 + $0x74c] ss:$16 sps:$4 sm:$0xff]  }
 0x1c9   :  { %5551 = vmatprep.subr.bf16.mxu1 %v7998_v39  ;;  %v8088_v39 = vld [vmem:[%s11334_s1 + $0x8cc] ss:$16 sps:$4 sm:$0xff]  }
 0x1cb   :  { %5533 = vmatpush2.bf16.msra.mxu0 %v7993_v40  ;;  %v8523_v40 = vld [vmem:[%s11335_s0 + $0x10] ss:$100 sps:$4 sm:$0xff]  }
 0x1cc   :  { %5552 = vmatpush1.bf16.msra.mxu1 %v7996_v41  ;;  %5534 = vmatprep.subr.bf16.mxu0 %v8001_v43  ;;  %v8083_v41 = vld [vmem:[%s11334_s1 + $0x748] ss:$16 sps:$4 sm:$0xff]   ;;  %v8091_v43 = vld [vmem:[%s11334_s1 + $0x72c] ss:$16 sps:$4 sm:$0xff]  }
 0x1cd   :  { %5553 = vmatprep.subr.bf16.mxu1 %v8004_v44  ;;  %v8094_v44 = vld [vmem:[%s11334_s1 + $0x8ac] ss:$16 sps:$4 sm:$0xff]  }
 0x1cf   :  { %5535 = vmatpush2.bf16.msra.mxu0 %v7999_v45  ;;  %v8524_v45 = vld [vmem:[%s11335_s0 + $0x24] ss:$100 sps:$4 sm:$0xff]  }
 0x1d0   :  { %5554 = vmatpush1.bf16.msra.mxu1 %v8002_v46  ;;  %5590 = vmatprep.subr.bf16.mxu0 %v8010_v48  ;;  %v8089_v46 = vld [vmem:[%s11334_s1 + $0x728] ss:$16 sps:$4 sm:$0xff]   ;;  %v8097_v48 = vld [vmem:[%s11334_s1 + $0x70c] ss:$16 sps:$4 sm:$0xff]  }
 0x1d1   :  { %5555 = vmatprep.subr.bf16.mxu1 %v8007_v47  ;;  %v8092_v47 = vld [vmem:[%s11334_s1 + $0x8a8] ss:$16 sps:$4 sm:$0xff]  }
 0x1d2   :  { %5537 = vmatmul.mubr.bf16.vlgmr.msra.gmra.mxu0 %v8521_v55  ;;  %v8104_v55 = vld [vmem:[%s11334_s1 + $0xae8] ss:$16 sps:$4 sm:$0xff]  }
 0x1d3   :  { %5591 = vmatpush1.bf16.msra.mxu0 %v8008_v50  ;;  %5622 = vmatprep.mubr.bf16.mxu0 %v8522_v60  ;;  %v8095_v50 = vld [vmem:[%s11334_s1 + $0x708] ss:$16 sps:$4 sm:$0xff]  }
 0x1d4   :  { %5556 = vmatpush1.bf16.msra.mxu1 %v8005_v49  ;;  %5592 = vmatprep.subr.bf16.mxu0 %v8016_v52  ;;  %v8100_v49 = vld [vmem:[%s11334_s1 + $0x88c] ss:$16 sps:$4 sm:$0xff]   ;;  %v8110_v60 = vld [vmem:[%s11334_s1 + $0xac8] ss:$16 sps:$4 sm:$0xff]  }
 0x1d5   :  { %5557 = vmatprep.subr.bf16.mxu1 %v8013_v51  ;;  %v8098_v51 = vld [vmem:[%s11334_s1 + $0x888] ss:$16 sps:$4 sm:$0xff]   ;;  %v8103_v52 = vld [vmem:[%s11334_s1 + $0x86c] ss:$16 sps:$4 sm:$0xff]  }
 0x1d7   :  { %5593 = vmatpush1.bf16.msra.mxu0 %v8014_v54  ;;  %v8101_v54 = vld [vmem:[%s11334_s1 + $0x868] ss:$16 sps:$4 sm:$0xff]  }
 0x1d8   :  { %5558 = vmatpush1.bf16.msra.mxu1 %v8011_v53  ;;  %5594 = vmatprep.subr.bf16.mxu0 %v8022_v57  ;;  %v8106_v53 = vld [vmem:[%s11334_s1 + $0xaec] ss:$16 sps:$4 sm:$0xff]  }
 0x1d9   :  { %5559 = vmatprep.subr.bf16.mxu1 %v8019_v56  ;;  %v8109_v56 = vld [vmem:[%s11334_s1 + $0x84c] ss:$16 sps:$4 sm:$0xff]  }
 0x1da   :  { %v8112_v57 = vld [vmem:[%s11334_s1 + $0xacc] ss:$16 sps:$4 sm:$0xff]  }
 0x1db   :  { %5595 = vmatpush1.bf16.msra.mxu0 %v8020_v59  ;;  %v8107_v59 = vld [vmem:[%s11334_s1 + $0x848] ss:$16 sps:$4 sm:$0xff]  }
 0x1dc   :  { %5560 = vmatpush1.bf16.msra.mxu1 %v8017_v58  ;;  %5596 = vmatprep.subr.bf16.mxu0 %v8028_v62  ;;  %v8525_v58 = vld [vmem:[%s11335_s0 + $0x18] ss:$100 sps:$4 sm:$0xff]  }
 0x1dd   :  { %5561 = vmatprep.subr.bf16.mxu1 %v8025_v61  ;;  %v8115_v61 = vld [vmem:[%s11334_s1 + $0x82c] ss:$16 sps:$4 sm:$0xff]  }
 0x1de   :  { %v8118_v62 = vld [vmem:[%s11334_s1 + $0xaac] ss:$16 sps:$4 sm:$0xff]  }
 0x1df   :  { %5597 = vmatpush1.bf16.msra.mxu0 %v8026_v0  ;;  %v8113_v0 = vld [vmem:[%s11334_s1 + $0x828] ss:$16 sps:$4 sm:$0xff]  }
 0x1e0   :  { %5562 = vmatpush1.bf16.msra.mxu1 %v8023_v63  ;;  %5598 = vmatprep.subr.bf16.mxu0 %v8034_v2  ;;  %v8526_v63 = vld [vmem:[%s11335_s0 + $0x2c] ss:$100 sps:$4 sm:$0xff]  }
 0x1e1   :  { %5563 = vmatprep.subr.bf16.mxu1 %v8031_v1  ;;  %v8116_v1 = vld [vmem:[%s11334_s1 + $0xaa8] ss:$16 sps:$4 sm:$0xff]   ;;  %v8121_v2 = vld [vmem:[%s11334_s1 + $0x80c] ss:$16 sps:$4 sm:$0xff]  }
 0x1e3   :  { %5599 = vmatpush1.bf16.msra.mxu0 %v8032_v4  ;;  %v8119_v4 = vld [vmem:[%s11334_s1 + $0x808] ss:$16 sps:$4 sm:$0xff]  }
 0x1e4   :  { %5564 = vmatpush2.bf16.msra.mxu1 %v8029_v3  ;;  %5600 = vmatprep.subr.bf16.mxu0 %v8040_v6  ;;  %v8124_v3 = vld [vmem:[%s11334_s1 + $0xa8c] ss:$16 sps:$4 sm:$0xff]  }
 0x1e5   :  { %5565 = vmatprep.subr.bf16.mxu1 %v8037_v5  ;;  %v8122_v5 = vld [vmem:[%s11334_s1 + $0xa88] ss:$16 sps:$4 sm:$0xff]   ;;  %v8127_v6 = vld [vmem:[%s11334_s1 + $0x9ec] ss:$16 sps:$4 sm:$0xff]  }
 0x1e7   :  { %5601 = vmatpush1.bf16.msra.mxu0 %v8038_v8  ;;  %v8125_v8 = vld [vmem:[%s11334_s1 + $0x9e8] ss:$16 sps:$4 sm:$0xff]  }
 0x1e8   :  { %5566 = vmatpush2.bf16.msra.mxu1 %v8035_v7  ;;  %5602 = vmatprep.subr.bf16.mxu0 %v8046_v10  ;;  %v8130_v7 = vld [vmem:[%s11334_s1 + $0xa6c] ss:$16 sps:$4 sm:$0xff]  }
 0x1e9   :  { %5567 = vmatprep.subr.bf16.mxu1 %v8043_v9  ;;  %v8128_v9 = vld [vmem:[%s11334_s1 + $0xa68] ss:$16 sps:$4 sm:$0xff]   ;;  %v8133_v10 = vld [vmem:[%s11334_s1 + $0x9cc] ss:$16 sps:$4 sm:$0xff]  }
 0x1eb   :  { %5603 = vmatpush1.bf16.msra.mxu0 %v8044_v12  ;;  %v8131_v12 = vld [vmem:[%s11334_s1 + $0x9c8] ss:$16 sps:$4 sm:$0xff]  }
 0x1ec   :  { %5568 = vmatpush2.bf16.msra.mxu1 %v8041_v11  ;;  %5604 = vmatprep.subr.bf16.mxu0 %v8052_v14  ;;  %v8136_v11 = vld [vmem:[%s11334_s1 + $0xa4c] ss:$16 sps:$4 sm:$0xff]  }
 0x1ed   :  { %5569 = vmatprep.subr.bf16.mxu1 %v8049_v13  ;;  %v8134_v13 = vld [vmem:[%s11334_s1 + $0xa48] ss:$16 sps:$4 sm:$0xff]   ;;  %v8139_v14 = vld [vmem:[%s11334_s1 + $0x9ac] ss:$16 sps:$4 sm:$0xff]  }
 0x1ef   :  { %5605 = vmatpush1.bf16.msra.mxu0 %v8050_v16  ;;  %v8137_v16 = vld [vmem:[%s11334_s1 + $0x9a8] ss:$16 sps:$4 sm:$0xff]  }
 0x1f0   :  { %5570 = vmatpush2.bf16.msra.mxu1 %v8047_v15  ;;  %5606 = vmatprep.subr.bf16.mxu0 %v8058_v18  ;;  %v8142_v15 = vld [vmem:[%s11334_s1 + $0xa2c] ss:$16 sps:$4 sm:$0xff]  }
 0x1f1   :  { %5571 = vmatprep.subr.bf16.mxu1 %v8055_v17  ;;  %v8140_v17 = vld [vmem:[%s11334_s1 + $0xa28] ss:$16 sps:$4 sm:$0xff]   ;;  %v8145_v18 = vld [vmem:[%s11334_s1 + $0x98c] ss:$16 sps:$4 sm:$0xff]  }
 0x1f3   :  { %5607 = vmatpush2.bf16.msra.mxu0 %v8056_v20  ;;  %v8143_v20 = vld [vmem:[%s11334_s1 + $0x988] ss:$16 sps:$4 sm:$0xff]  }
 0x1f4   :  { %5572 = vmatpush2.bf16.msra.mxu1 %v8053_v19  ;;  %5608 = vmatprep.subr.bf16.mxu0 %v8064_v22  ;;  %v8148_v19 = vld [vmem:[%s11334_s1 + $0xa0c] ss:$16 sps:$4 sm:$0xff]  }
 0x1f5   :  { %5573 = vmatprep.subr.bf16.mxu1 %v8061_v21  ;;  %v8146_v21 = vld [vmem:[%s11334_s1 + $0xa08] ss:$16 sps:$4 sm:$0xff]   ;;  %v8151_v22 = vld [vmem:[%s11334_s1 + $0x96c] ss:$16 sps:$4 sm:$0xff]  }
 0x1f7   :  { %5609 = vmatpush2.bf16.msra.mxu0 %v8062_v24  ;;  %v8149_v24 = vld [vmem:[%s11334_s1 + $0x968] ss:$16 sps:$4 sm:$0xff]  }
 0x1f8   :  { %5574 = vmatpush2.bf16.msra.mxu1 %v8059_v23  ;;  %5610 = vmatprep.subr.bf16.mxu0 %v8070_v26  ;;  %v8154_v23 = vld [vmem:[%s11334_s1 + $0xbec] ss:$16 sps:$4 sm:$0xff]  }
 0x1f9   :  { %5575 = vmatprep.subr.bf16.mxu1 %v8067_v25  ;;  %v8152_v25 = vld [vmem:[%s11334_s1 + $0xbe8] ss:$16 sps:$4 sm:$0xff]   ;;  %v8157_v26 = vld [vmem:[%s11334_s1 + $0x94c] ss:$16 sps:$4 sm:$0xff]  }
 0x1fb   :  { %5611 = vmatpush2.bf16.msra.mxu0 %v8068_v28  ;;  %v8155_v28 = vld [vmem:[%s11334_s1 + $0x948] ss:$16 sps:$4 sm:$0xff]  }
 0x1fc   :  { %5576 = vmatpush2.bf16.msra.mxu1 %v8065_v27  ;;  %5612 = vmatprep.subr.bf16.mxu0 %v8076_v30  ;;  %v8160_v27 = vld [vmem:[%s11334_s1 + $0xbcc] ss:$16 sps:$4 sm:$0xff]  }
 0x1fd   :  { %5577 = vmatprep.subr.bf16.mxu1 %v8073_v29  ;;  %v8158_v29 = vld [vmem:[%s11334_s1 + $0xbc8] ss:$16 sps:$4 sm:$0xff]   ;;  %v8163_v30 = vld [vmem:[%s11334_s1 + $0x92c] ss:$16 sps:$4 sm:$0xff]  }
 0x1ff   :  { %5613 = vmatpush2.bf16.msra.mxu0 %v8074_v32  ;;  %v8161_v32 = vld [vmem:[%s11334_s1 + $0x928] ss:$16 sps:$4 sm:$0xff]  }
 0x200   :  { %5578 = vmatpush2.bf16.msra.mxu1 %v8071_v31  ;;  %5614 = vmatprep.subr.bf16.mxu0 %v8079_v33  ;;  %v8166_v31 = vld [vmem:[%s11334_s1 + $0xbac] ss:$16 sps:$4 sm:$0xff]   ;;  %v8164_v33 = vld [vmem:[%s11334_s1 + $0xba8] ss:$16 sps:$4 sm:$0xff]  }
 0x201   :  { %5633 = vmatprep.subr.bf16.mxu1 %v8082_v34  ;;  %v8169_v34 = vld [vmem:[%s11334_s1 + $0x90c] ss:$16 sps:$4 sm:$0xff]  }
 0x203   :  { %5580 = vmatmul.mubr.bf16.vlgmr.msra.gmra.mxu1 %v8523_v40  ;;  %5615 = vmatpush2.bf16.msra.mxu0 %v8077_v35  ;;  %v8172_v35 = vld [vmem:[%s11334_s1 + $0xb8c] ss:$16 sps:$4 sm:$0xff]  }
 0x204   :  { %5634 = vmatpush1.bf16.msra.mxu1 %v8080_v37  ;;  %5616 = vmatprep.subr.bf16.mxu0 %v8085_v38  ;;  %v8167_v37 = vld [vmem:[%s11334_s1 + $0x908] ss:$16 sps:$4 sm:$0xff]   ;;  %v8178_v40 = vld [vmem:[%s11334_s1 + $0xcec] ss:$16 sps:$4 sm:$0xff]  }
 0x205   :  { %5635 = vmatprep.subr.bf16.mxu1 %v8088_v39  ;;  %5665 = vmatprep.mubr.bf16.mxu1 %v8524_v45  ;;  %v8170_v38 = vld [vmem:[%s11334_s1 + $0xb88] ss:$16 sps:$4 sm:$0xff]   ;;  %v8175_v39 = vld [vmem:[%s11334_s1 + $0xb6c] ss:$16 sps:$4 sm:$0xff]   ;;  %v8527_v45 = vld [vmem:[%s11335_s0 + $0x20] ss:$100 sps:$4 sm:$0xff]  }
 0x207   :  { %5617 = vmatpush2.bf16.msra.mxu0 %v8083_v41  ;;  %v8173_v41 = vld [vmem:[%s11334_s1 + $0xb68] ss:$16 sps:$4 sm:$0xff]  }
 0x208   :  { %5636 = vmatpush1.bf16.msra.mxu1 %v8086_v42  ;;  %5618 = vmatprep.subr.bf16.mxu0 %v8091_v43  ;;  %v8176_v42 = vld [vmem:[%s11334_s1 + $0xce8] ss:$16 sps:$4 sm:$0xff]   ;;  %v8181_v43 = vld [vmem:[%s11334_s1 + $0xb4c] ss:$16 sps:$4 sm:$0xff]  }
 0x209   :  { %5637 = vmatprep.subr.bf16.mxu1 %v8094_v44  ;;  %v8184_v44 = vld [vmem:[%s11334_s1 + $0xccc] ss:$16 sps:$4 sm:$0xff]  }
 0x20b   :  { %5619 = vmatpush2.bf16.msra.mxu0 %v8089_v46  ;;  %v8179_v46 = vld [vmem:[%s11334_s1 + $0xb48] ss:$16 sps:$4 sm:$0xff]  }
 0x20c   :  { %5638 = vmatpush1.bf16.msra.mxu1 %v8092_v47  ;;  %5620 = vmatprep.subr.bf16.mxu0 %v8097_v48  ;;  %v8182_v47 = vld [vmem:[%s11334_s1 + $0xcc8] ss:$16 sps:$4 sm:$0xff]   ;;  %v8187_v48 = vld [vmem:[%s11334_s1 + $0xb2c] ss:$16 sps:$4 sm:$0xff]  }
 0x20d   :  { %5639 = vmatprep.subr.bf16.mxu1 %v8100_v49  ;;  %v8190_v49 = vld [vmem:[%s11334_s1 + $0xcac] ss:$16 sps:$4 sm:$0xff]  }
 0x20f   :  { %5621 = vmatpush2.bf16.msra.mxu0 %v8095_v50  ;;  %v8528_v50 = vld [vmem:[%s11335_s0 + $0x34] ss:$100 sps:$4 sm:$0xff]  }
 0x210   :  { %5640 = vmatpush1.bf16.msra.mxu1 %v8098_v51  ;;  %5676 = vmatprep.subr.bf16.mxu0 %v8106_v53  ;;  %v8185_v51 = vld [vmem:[%s11334_s1 + $0xb28] ss:$16 sps:$4 sm:$0xff]   ;;  %v8193_v53 = vld [vmem:[%s11334_s1 + $0xb0c] ss:$16 sps:$4 sm:$0xff]  }
 0x211   :  { %5641 = vmatprep.subr.bf16.mxu1 %v8103_v52  ;;  %v8188_v52 = vld [vmem:[%s11334_s1 + $0xca8] ss:$16 sps:$4 sm:$0xff]  }
 0x212   :  { %5623 = vmatmul.mubr.bf16.vlgmr.msra.gmra.mxu0 %v8525_v58  ;;  %v8202_v58 = vld [vmem:[%s11334_s1 + $0xeec] ss:$16 sps:$4 sm:$0xff]  }
 0x213   :  { %5677 = vmatpush1.bf16.msra.mxu0 %v8104_v55  ;;  %5708 = vmatprep.mubr.bf16.mxu0 %v8526_v63  ;;  %v8191_v55 = vld [vmem:[%s11334_s1 + $0xb08] ss:$16 sps:$4 sm:$0xff]  }
 0x214   :  { %5642 = vmatpush1.bf16.msra.mxu1 %v8101_v54  ;;  %5678 = vmatprep.subr.bf16.mxu0 %v8112_v57  ;;  %v8196_v54 = vld [vmem:[%s11334_s1 + $0xc8c] ss:$16 sps:$4 sm:$0xff]  }
 0x215   :  { %5643 = vmatprep.subr.bf16.mxu1 %v8109_v56  ;;  %v8194_v56 = vld [vmem:[%s11334_s1 + $0xc88] ss:$16 sps:$4 sm:$0xff]   ;;  %v8199_v57 = vld [vmem:[%s11334_s1 + $0xc6c] ss:$16 sps:$4 sm:$0xff]  }
 0x216   :  { %v8529_v63 = vld [vmem:[%s11335_s0 + $0x28] ss:$100 sps:$4 sm:$0xff]  }
 0x217   :  { %5679 = vmatpush1.bf16.msra.mxu0 %v8110_v60  ;;  %v8200_v60 = vld [vmem:[%s11334_s1 + $0xee8] ss:$16 sps:$4 sm:$0xff]  }
 0x218   :  { %5644 = vmatpush1.bf16.msra.mxu1 %v8107_v59  ;;  %5680 = vmatprep.subr.bf16.mxu0 %v8118_v62  ;;  %v8197_v59 = vld [vmem:[%s11334_s1 + $0xc68] ss:$16 sps:$4 sm:$0xff]   ;;  %v8208_v62 = vld [vmem:[%s11334_s1 + $0xecc] ss:$16 sps:$4 sm:$0xff]  }
 0x219   :  { %5645 = vmatprep.subr.bf16.mxu1 %v8115_v61  ;;  %v8205_v61 = vld [vmem:[%s11334_s1 + $0xc4c] ss:$16 sps:$4 sm:$0xff]  }
 0x21b   :  { %5681 = vmatpush1.bf16.msra.mxu0 %v8116_v1  ;;  %v8206_v1 = vld [vmem:[%s11334_s1 + $0xec8] ss:$16 sps:$4 sm:$0xff]  }
 0x21c   :  { %5646 = vmatpush1.bf16.msra.mxu1 %v8113_v0  ;;  %5682 = vmatprep.subr.bf16.mxu0 %v8124_v3  ;;  %v8203_v0 = vld [vmem:[%s11334_s1 + $0xc48] ss:$16 sps:$4 sm:$0xff]   ;;  %v8214_v3 = vld [vmem:[%s11334_s1 + $0xeac] ss:$16 sps:$4 sm:$0xff]  }
 0x21d   :  { %5647 = vmatprep.subr.bf16.mxu1 %v8121_v2  ;;  %v8211_v2 = vld [vmem:[%s11334_s1 + $0xc2c] ss:$16 sps:$4 sm:$0xff]  }
 0x21f   :  { %5683 = vmatpush1.bf16.msra.mxu0 %v8122_v5  ;;  %v8209_v5 = vld [vmem:[%s11334_s1 + $0xc28] ss:$16 sps:$4 sm:$0xff]  }
 0x220   :  { %5648 = vmatpush1.bf16.msra.mxu1 %v8119_v4  ;;  %5684 = vmatprep.subr.bf16.mxu0 %v8130_v7  ;;  %v8530_v4 = vld [vmem:[%s11335_s0 + $0x3c] ss:$100 sps:$4 sm:$0xff]  }
 0x221   :  { %5649 = vmatprep.subr.bf16.mxu1 %v8127_v6  ;;  %v8212_v6 = vld [vmem:[%s11334_s1 + $0xea8] ss:$16 sps:$4 sm:$0xff]   ;;  %v8217_v7 = vld [vmem:[%s11334_s1 + $0xc0c] ss:$16 sps:$4 sm:$0xff]  }
 0x223   :  { %5685 = vmatpush1.bf16.msra.mxu0 %v8128_v9  ;;  %v8215_v9 = vld [vmem:[%s11334_s1 + $0xc08] ss:$16 sps:$4 sm:$0xff]  }
 0x224   :  { %5650 = vmatpush2.bf16.msra.mxu1 %v8125_v8  ;;  %5686 = vmatprep.subr.bf16.mxu0 %v8136_v11  ;;  %v8220_v8 = vld [vmem:[%s11334_s1 + $0xe8c] ss:$16 sps:$4 sm:$0xff]  }
 0x225   :  { %5651 = vmatprep.subr.bf16.mxu1 %v8133_v10  ;;  %v8218_v10 = vld [vmem:[%s11334_s1 + $0xe88] ss:$16 sps:$4 sm:$0xff]   ;;  %v8223_v11 = vld [vmem:[%s11334_s1 + $0xdec] ss:$16 sps:$4 sm:$0xff]  }
 0x227   :  { %5687 = vmatpush1.bf16.msra.mxu0 %v8134_v13  ;;  %v8221_v13 = vld [vmem:[%s11334_s1 + $0xde8] ss:$16 sps:$4 sm:$0xff]  }
 0x228   :  { %5652 = vmatpush2.bf16.msra.mxu1 %v8131_v12  ;;  %5688 = vmatprep.subr.bf16.mxu0 %v8142_v15  ;;  %v8226_v12 = vld [vmem:[%s11334_s1 + $0xe6c] ss:$16 sps:$4 sm:$0xff]  }
 0x229   :  { %5653 = vmatprep.subr.bf16.mxu1 %v8139_v14  ;;  %v8224_v14 = vld [vmem:[%s11334_s1 + $0xe68] ss:$16 sps:$4 sm:$0xff]   ;;  %v8229_v15 = vld [vmem:[%s11334_s1 + $0xdcc] ss:$16 sps:$4 sm:$0xff]  }
 0x22b   :  { %5689 = vmatpush1.bf16.msra.mxu0 %v8140_v17  ;;  %v8227_v17 = vld [vmem:[%s11334_s1 + $0xdc8] ss:$16 sps:$4 sm:$0xff]  }
 0x22c   :  { %5654 = vmatpush2.bf16.msra.mxu1 %v8137_v16  ;;  %5690 = vmatprep.subr.bf16.mxu0 %v8148_v19  ;;  %v8232_v16 = vld [vmem:[%s11334_s1 + $0xe4c] ss:$16 sps:$4 sm:$0xff]  }
 0x22d   :  { %5655 = vmatprep.subr.bf16.mxu1 %v8145_v18  ;;  %v8230_v18 = vld [vmem:[%s11334_s1 + $0xe48] ss:$16 sps:$4 sm:$0xff]   ;;  %v8235_v19 = vld [vmem:[%s11334_s1 + $0xdac] ss:$16 sps:$4 sm:$0xff]  }
 0x22f   :  { %5691 = vmatpush1.bf16.msra.mxu0 %v8146_v21  ;;  %v8233_v21 = vld [vmem:[%s11334_s1 + $0xda8] ss:$16 sps:$4 sm:$0xff]  }
 0x230   :  { %5656 = vmatpush2.bf16.msra.mxu1 %v8143_v20  ;;  %5692 = vmatprep.subr.bf16.mxu0 %v8154_v23  ;;  %v8238_v20 = vld [vmem:[%s11334_s1 + $0xe2c] ss:$16 sps:$4 sm:$0xff]  }
 0x231   :  { %5657 = vmatprep.subr.bf16.mxu1 %v8151_v22  ;;  %v8236_v22 = vld [vmem:[%s11334_s1 + $0xe28] ss:$16 sps:$4 sm:$0xff]   ;;  %v8241_v23 = vld [vmem:[%s11334_s1 + $0xd8c] ss:$16 sps:$4 sm:$0xff]  }
 0x233   :  { %5693 = vmatpush2.bf16.msra.mxu0 %v8152_v25  ;;  %v8239_v25 = vld [vmem:[%s11334_s1 + $0xd88] ss:$16 sps:$4 sm:$0xff]  }
 0x234   :  { %5658 = vmatpush2.bf16.msra.mxu1 %v8149_v24  ;;  %5694 = vmatprep.subr.bf16.mxu0 %v8160_v27  ;;  %v8244_v24 = vld [vmem:[%s11334_s1 + $0xe0c] ss:$16 sps:$4 sm:$0xff]  }
 0x235   :  { %5659 = vmatprep.subr.bf16.mxu1 %v8157_v26  ;;  %v8242_v26 = vld [vmem:[%s11334_s1 + $0xe08] ss:$16 sps:$4 sm:$0xff]   ;;  %v8247_v27 = vld [vmem:[%s11334_s1 + $0xd6c] ss:$16 sps:$4 sm:$0xff]  }
 0x237   :  { %5695 = vmatpush2.bf16.msra.mxu0 %v8158_v29  ;;  %v8245_v29 = vld [vmem:[%s11334_s1 + $0xd68] ss:$16 sps:$4 sm:$0xff]  }
 0x238   :  { %5660 = vmatpush2.bf16.msra.mxu1 %v8155_v28  ;;  %5696 = vmatprep.subr.bf16.mxu0 %v8166_v31  ;;  %v8250_v28 = vld [vmem:[%s11334_s1 + $0xfec] ss:$16 sps:$4 sm:$0xff]  }
 0x239   :  { %5661 = vmatprep.subr.bf16.mxu1 %v8163_v30  ;;  %v8248_v30 = vld [vmem:[%s11334_s1 + $0xfe8] ss:$16 sps:$4 sm:$0xff]   ;;  %v8253_v31 = vld [vmem:[%s11334_s1 + $0xd4c] ss:$16 sps:$4 sm:$0xff]  }
 0x23b   :  { %5697 = vmatpush2.bf16.msra.mxu0 %v8164_v33  ;;  %v8251_v33 = vld [vmem:[%s11334_s1 + $0xd48] ss:$16 sps:$4 sm:$0xff]  }
 0x23c   :  { %5662 = vmatpush2.bf16.msra.mxu1 %v8161_v32  ;;  %5698 = vmatprep.subr.bf16.mxu0 %v8172_v35  ;;  %v8256_v32 = vld [vmem:[%s11334_s1 + $0xfcc] ss:$16 sps:$4 sm:$0xff]  }
 0x23d   :  { %5663 = vmatprep.subr.bf16.mxu1 %v8169_v34  ;;  %v8254_v34 = vld [vmem:[%s11334_s1 + $0xfc8] ss:$16 sps:$4 sm:$0xff]   ;;  %v8259_v35 = vld [vmem:[%s11334_s1 + $0xd2c] ss:$16 sps:$4 sm:$0xff]  }
 0x23f   :  { %5699 = vmatpush2.bf16.msra.mxu0 %v8170_v38  ;;  %v8257_v38 = vld [vmem:[%s11334_s1 + $0xd28] ss:$16 sps:$4 sm:$0xff]  }
 0x240   :  { %5664 = vmatpush2.bf16.msra.mxu1 %v8167_v37  ;;  %5700 = vmatprep.subr.bf16.mxu0 %v8175_v39  ;;  %v8262_v37 = vld [vmem:[%s11334_s1 + $0xfac] ss:$16 sps:$4 sm:$0xff]   ;;  %v8260_v39 = vld [vmem:[%s11334_s1 + $0xfa8] ss:$16 sps:$4 sm:$0xff]  }
 0x241   :  { %5719 = vmatprep.subr.bf16.mxu1 %v8178_v40  ;;  %v8265_v40 = vld [vmem:[%s11334_s1 + $0xd0c] ss:$16 sps:$4 sm:$0xff]  }
 0x243   :  { %5666 = vmatmul.mubr.bf16.vlgmr.msra.gmra.mxu1 %v8527_v45  ;;  %5701 = vmatpush2.bf16.msra.mxu0 %v8173_v41  ;;  %v8268_v41 = vld [vmem:[%s11334_s1 + $0xf8c] ss:$16 sps:$4 sm:$0xff]  }
 0x244   :  { %5720 = vmatpush1.bf16.msra.mxu1 %v8176_v42  ;;  %5702 = vmatprep.subr.bf16.mxu0 %v8181_v43  ;;  %v8263_v42 = vld [vmem:[%s11334_s1 + $0xd08] ss:$16 sps:$4 sm:$0xff]   ;;  %v8274_v45 = vld [vmem:[%s11334_s1 + $0x10ec] ss:$16 sps:$4 sm:$0xff]  }
 0x245   :  { %5721 = vmatprep.subr.bf16.mxu1 %v8184_v44  ;;  %5751 = vmatprep.mubr.bf16.mxu1 %v8528_v50  ;;  %v8266_v43 = vld [vmem:[%s11334_s1 + $0xf88] ss:$16 sps:$4 sm:$0xff]   ;;  %v8271_v44 = vld [vmem:[%s11334_s1 + $0xf6c] ss:$16 sps:$4 sm:$0xff]   ;;  %v8531_v50 = vld [vmem:[%s11335_s0 + $0x30] ss:$100 sps:$4 sm:$0xff]  }
 0x247   :  { %5703 = vmatpush2.bf16.msra.mxu0 %v8179_v46  ;;  %v8269_v46 = vld [vmem:[%s11334_s1 + $0xf68] ss:$16 sps:$4 sm:$0xff]  }
 0x248   :  { %5722 = vmatpush1.bf16.msra.mxu1 %v8182_v47  ;;  %5704 = vmatprep.subr.bf16.mxu0 %v8187_v48  ;;  %v8272_v47 = vld [vmem:[%s11334_s1 + $0x10e8] ss:$16 sps:$4 sm:$0xff]   ;;  %v8277_v48 = vld [vmem:[%s11334_s1 + $0xf4c] ss:$16 sps:$4 sm:$0xff]  }
 0x249   :  { %5723 = vmatprep.subr.bf16.mxu1 %v8190_v49  ;;  %v8280_v49 = vld [vmem:[%s11334_s1 + $0x10cc] ss:$16 sps:$4 sm:$0xff]  }
 0x24b   :  { %5705 = vmatpush2.bf16.msra.mxu0 %v8185_v51  ;;  %v8275_v51 = vld [vmem:[%s11334_s1 + $0xf48] ss:$16 sps:$4 sm:$0xff]  }
 0x24c   :  { %5724 = vmatpush1.bf16.msra.mxu1 %v8188_v52  ;;  %5706 = vmatprep.subr.bf16.mxu0 %v8193_v53  ;;  %v8278_v52 = vld [vmem:[%s11334_s1 + $0x10c8] ss:$16 sps:$4 sm:$0xff]   ;;  %v8283_v53 = vld [vmem:[%s11334_s1 + $0xf2c] ss:$16 sps:$4 sm:$0xff]  }
 0x24d   :  { %5725 = vmatprep.subr.bf16.mxu1 %v8196_v54  ;;  %v8286_v54 = vld [vmem:[%s11334_s1 + $0x10ac] ss:$16 sps:$4 sm:$0xff]  }
 0x24f   :  { %5707 = vmatpush2.bf16.msra.mxu0 %v8191_v55  ;;  %v8532_v55 = vld [vmem:[%s11335_s0 + $0x44] ss:$100 sps:$4 sm:$0xff]  }
 0x250   :  { %5726 = vmatpush1.bf16.msra.mxu1 %v8194_v56  ;;  %5762 = vmatprep.subr.bf16.mxu0 %v8202_v58  ;;  %v8281_v56 = vld [vmem:[%s11334_s1 + $0xf28] ss:$16 sps:$4 sm:$0xff]   ;;  %v8289_v58 = vld [vmem:[%s11334_s1 + $0xf0c] ss:$16 sps:$4 sm:$0xff]  }
 0x251   :  { %5727 = vmatprep.subr.bf16.mxu1 %v8199_v57  ;;  %v8284_v57 = vld [vmem:[%s11334_s1 + $0x10a8] ss:$16 sps:$4 sm:$0xff]  }
 0x252   :  { %5709 = vmatmul.mubr.bf16.vlgmr.msra.gmra.mxu0 %v8529_v63  ;;  %v8298_v63 = vld [vmem:[%s11334_s1 + $0x12ec] ss:$16 sps:$4 sm:$0xff]  }
 0x253   :  { %5763 = vmatpush1.bf16.msra.mxu0 %v8200_v60  ;;  %5794 = vmatprep.mubr.bf16.mxu0 %v8530_v4  ;;  %v8287_v60 = vld [vmem:[%s11334_s1 + $0xf08] ss:$16 sps:$4 sm:$0xff]  }
 0x254   :  { %5728 = vmatpush1.bf16.msra.mxu1 %v8197_v59  ;;  %5764 = vmatprep.subr.bf16.mxu0 %v8208_v62  ;;  %v8292_v59 = vld [vmem:[%s11334_s1 + $0x108c] ss:$16 sps:$4 sm:$0xff]   ;;  %v8299_v4 = vld [vmem:[%s11334_s1 + $0x1048] ss:$16 sps:$4 sm:$0xff]  }
 0x255   :  { %5729 = vmatprep.subr.bf16.mxu1 %v8205_v61  ;;  %v8290_v61 = vld [vmem:[%s11334_s1 + $0x1088] ss:$16 sps:$4 sm:$0xff]   ;;  %v8295_v62 = vld [vmem:[%s11334_s1 + $0x106c] ss:$16 sps:$4 sm:$0xff]  }
 0x257   :  { %5765 = vmatpush1.bf16.msra.mxu0 %v8206_v1  ;;  %v8296_v1 = vld [vmem:[%s11334_s1 + $0x12e8] ss:$16 sps:$4 sm:$0xff]  }
 0x258   :  { %5730 = vmatpush1.bf16.msra.mxu1 %v8203_v0  ;;  %5766 = vmatprep.subr.bf16.mxu0 %v8214_v3  ;;  %v8293_v0 = vld [vmem:[%s11334_s1 + $0x1068] ss:$16 sps:$4 sm:$0xff]   ;;  %v8304_v3 = vld [vmem:[%s11334_s1 + $0x12cc] ss:$16 sps:$4 sm:$0xff]  }
 0x259   :  { %5731 = vmatprep.subr.bf16.mxu1 %v8211_v2  ;;  %v8301_v2 = vld [vmem:[%s11334_s1 + $0x104c] ss:$16 sps:$4 sm:$0xff]  }
 0x25b   :  { %5767 = vmatpush1.bf16.msra.mxu0 %v8212_v6  ;;  %v8533_v6 = vld [vmem:[%s11335_s0 + $0x38] ss:$100 sps:$4 sm:$0xff]  }
 0x25c   :  { %5732 = vmatpush1.bf16.msra.mxu1 %v8209_v5  ;;  %5768 = vmatprep.subr.bf16.mxu0 %v8220_v8  ;;  %v8302_v5 = vld [vmem:[%s11334_s1 + $0x12c8] ss:$16 sps:$4 sm:$0xff]   ;;  %v8310_v8 = vld [vmem:[%s11334_s1 + $0x12ac] ss:$16 sps:$4 sm:$0xff]  }
 0x25d   :  { %5733 = vmatprep.subr.bf16.mxu1 %v8217_v7  ;;  %v8307_v7 = vld [vmem:[%s11334_s1 + $0x102c] ss:$16 sps:$4 sm:$0xff]  }
 0x25f   :  { %5769 = vmatpush1.bf16.msra.mxu0 %v8218_v10  ;;  %v8308_v10 = vld [vmem:[%s11334_s1 + $0x12a8] ss:$16 sps:$4 sm:$0xff]  }
 0x260   :  { %5734 = vmatpush1.bf16.msra.mxu1 %v8215_v9  ;;  %5770 = vmatprep.subr.bf16.mxu0 %v8226_v12  ;;  %v8305_v9 = vld [vmem:[%s11334_s1 + $0x1028] ss:$16 sps:$4 sm:$0xff]   ;;  %v8313_v12 = vld [vmem:[%s11334_s1 + $0x100c] ss:$16 sps:$4 sm:$0xff]  }
 0x261   :  { %5735 = vmatprep.subr.bf16.mxu1 %v8223_v11  ;;  %v8534_v11 = vld [vmem:[%s11335_s0 + $0x4c] ss:$100 sps:$4 sm:$0xff]  }
 0x263   :  { %5771 = vmatpush1.bf16.msra.mxu0 %v8224_v14  ;;  %v8311_v14 = vld [vmem:[%s11334_s1 + $0x1008] ss:$16 sps:$4 sm:$0xff]  }
 0x264   :  { %5736 = vmatpush2.bf16.msra.mxu1 %v8221_v13  ;;  %5772 = vmatprep.subr.bf16.mxu0 %v8232_v16  ;;  %v8316_v13 = vld [vmem:[%s11334_s1 + $0x128c] ss:$16 sps:$4 sm:$0xff]  }
 0x265   :  { %5737 = vmatprep.subr.bf16.mxu1 %v8229_v15  ;;  %v8314_v15 = vld [vmem:[%s11334_s1 + $0x1288] ss:$16 sps:$4 sm:$0xff]   ;;  %v8319_v16 = vld [vmem:[%s11334_s1 + $0x11ec] ss:$16 sps:$4 sm:$0xff]  }
 0x267   :  { %5773 = vmatpush1.bf16.msra.mxu0 %v8230_v18  ;;  %v8317_v18 = vld [vmem:[%s11334_s1 + $0x11e8] ss:$16 sps:$4 sm:$0xff]  }
 0x268   :  { %5738 = vmatpush2.bf16.msra.mxu1 %v8227_v17  ;;  %5774 = vmatprep.subr.bf16.mxu0 %v8238_v20  ;;  %v8322_v17 = vld [vmem:[%s11334_s1 + $0x126c] ss:$16 sps:$4 sm:$0xff]  }
 0x269   :  { %5739 = vmatprep.subr.bf16.mxu1 %v8235_v19  ;;  %v8320_v19 = vld [vmem:[%s11334_s1 + $0x1268] ss:$16 sps:$4 sm:$0xff]   ;;  %v8325_v20 = vld [vmem:[%s11334_s1 + $0x11cc] ss:$16 sps:$4 sm:$0xff]  }
 0x26b   :  { %5775 = vmatpush1.bf16.msra.mxu0 %v8236_v22  ;;  %v8323_v22 = vld [vmem:[%s11334_s1 + $0x11c8] ss:$16 sps:$4 sm:$0xff]  }
 0x26c   :  { %5740 = vmatpush2.bf16.msra.mxu1 %v8233_v21  ;;  %5776 = vmatprep.subr.bf16.mxu0 %v8244_v24  ;;  %v8328_v21 = vld [vmem:[%s11334_s1 + $0x124c] ss:$16 sps:$4 sm:$0xff]  }
 0x26d   :  { %5741 = vmatprep.subr.bf16.mxu1 %v8241_v23  ;;  %v8326_v23 = vld [vmem:[%s11334_s1 + $0x1248] ss:$16 sps:$4 sm:$0xff]   ;;  %v8331_v24 = vld [vmem:[%s11334_s1 + $0x11ac] ss:$16 sps:$4 sm:$0xff]  }
 0x26f   :  { %5777 = vmatpush1.bf16.msra.mxu0 %v8242_v26  ;;  %v8329_v26 = vld [vmem:[%s11334_s1 + $0x11a8] ss:$16 sps:$4 sm:$0xff]  }
 0x270   :  { %5742 = vmatpush2.bf16.msra.mxu1 %v8239_v25  ;;  %5778 = vmatprep.subr.bf16.mxu0 %v8250_v28  ;;  %v8334_v25 = vld [vmem:[%s11334_s1 + $0x122c] ss:$16 sps:$4 sm:$0xff]   ;;  %v10756_v28 = vpop.f32.mrf.mxu0 }
 0x271   :  { %5743 = vmatprep.subr.bf16.mxu1 %v8247_v27  ;;  %v8332_v27 = vld [vmem:[%s11334_s1 + $0x1228] ss:$16 sps:$4 sm:$0xff]  }
 0x273   :  { %5779 = vmatpush2.bf16.msra.mxu0 %v8248_v30  ;;  %v8340_v30 = vld [vmem:[%s11334_s1 + $0x120c] ss:$16 sps:$4 sm:$0xff]  }
 0x274   :  { %5744 = vmatpush2.bf16.msra.mxu1 %v8245_v29  ;;  %5780 = vmatprep.subr.bf16.mxu0 %v8256_v32  ;;  %v8337_v29 = vld [vmem:[%s11334_s1 + $0x118c] ss:$16 sps:$4 sm:$0xff]   ;;  %v8335_v32 = vld [vmem:[%s11334_s1 + $0x1188] ss:$16 sps:$4 sm:$0xff]  }
 0x275   :  { %5745 = vmatprep.subr.bf16.mxu1 %v8253_v31  ;;  %v10764_v31 = vpop.f32.mrf.mxu0 }
 0x277   :  { %5781 = vmatpush2.bf16.msra.mxu0 %v8254_v34  ;;  %v8343_v34 = vld [vmem:[%s11334_s1 + $0x116c] ss:$16 sps:$4 sm:$0xff]  }
 0x278   :  { %5746 = vmatpush2.bf16.msra.mxu1 %v8251_v33  ;;  %5782 = vmatprep.subr.bf16.mxu0 %v8262_v37  ;;  %v8338_v33 = vld [vmem:[%s11334_s1 + $0x1208] ss:$16 sps:$4 sm:$0xff]   ;;  %v10778_v37 = vpop.f32.mrf.mxu0 }
 0x279   :  { %5747 = vmatprep.subr.bf16.mxu1 %v8259_v35  ;;  %v8346_v35 = vld [vmem:[%s11334_s1 + $0x13ec] ss:$16 sps:$4 sm:$0xff]  }
 0x27b   :  { %5783 = vmatpush2.bf16.msra.mxu0 %v8260_v39  ;;  %v8344_v39 = vld [vmem:[%s11334_s1 + $0x13e8] ss:$16 sps:$4 sm:$0xff]  }
 0x27c   :  { %5748 = vmatpush2.bf16.msra.mxu1 %v8257_v38  ;;  %5784 = vmatprep.subr.bf16.mxu0 %v8268_v41  ;;  %v8341_v38 = vld [vmem:[%s11334_s1 + $0x1168] ss:$16 sps:$4 sm:$0xff]   ;;  %v8352_v41 = vld [vmem:[%s11334_s1 + $0x13cc] ss:$16 sps:$4 sm:$0xff]  }
 0x27d   :  { %5749 = vmatprep.subr.bf16.mxu1 %v8265_v40  ;;  %v8349_v40 = vld [vmem:[%s11334_s1 + $0x114c] ss:$16 sps:$4 sm:$0xff]  }
 0x27f   :  { %5785 = vmatpush2.bf16.msra.mxu0 %v8266_v43  ;;  %v8347_v43 = vld [vmem:[%s11334_s1 + $0x1148] ss:$16 sps:$4 sm:$0xff]  }
 0x280   :  { %5750 = vmatpush2.bf16.msra.mxu1 %v8263_v42  ;;  %5786 = vmatprep.subr.bf16.mxu0 %v8271_v44  ;;  %v10792_v42 = vpop.f32.mrf.mxu0  ;;  %v8350_v44 = vld [vmem:[%s11334_s1 + $0x13c8] ss:$16 sps:$4 sm:$0xff]  }
 0x281   :  { %5805 = vmatprep.subr.bf16.mxu1 %v8274_v45  ;;  %v10800_v45 = vpop.f32.mrf.mxu1 }
 0x283   :  { %5752 = vmatmul.mubr.bf16.vlgmr.msra.gmra.mxu1 %v8531_v50  ;;  %5787 = vmatpush2.bf16.msra.mxu0 %v8269_v46  ;;  %v10802_v46 = vpop.f32.mrf.mxu0  ;;  %v8356_v50 = vld [vmem:[%s11334_s1 + $0x13a8] ss:$16 sps:$4 sm:$0xff]  }
 0x284   :  { %5806 = vmatpush1.bf16.msra.mxu1 %v8272_v47  ;;  %5788 = vmatprep.subr.bf16.mxu0 %v8277_v48  ;;  %v8355_v47 = vld [vmem:[%s11334_s1 + $0x112c] ss:$16 sps:$4 sm:$0xff]  }
 0x285   :  { %5807 = vmatprep.subr.bf16.mxu1 %v8280_v49  ;;  %5837 = vmatprep.mubr.bf16.mxu1 %v8532_v55  ;;  %v8358_v48 = vld [vmem:[%s11334_s1 + $0x13ac] ss:$16 sps:$4 sm:$0xff]   ;;  %v8353_v49 = vld [vmem:[%s11334_s1 + $0x1128] ss:$16 sps:$4 sm:$0xff]  }
 0x286   :  { %v8359_v55 = vld [vmem:[%s11334_s1 + $0x1108] ss:$16 sps:$4 sm:$0xff]  }
 0x287   :  { %5789 = vmatpush2.bf16.msra.mxu0 %v8275_v51  ;;  %v10816_v51 = vpop.f32.mrf.mxu1 }
 0x288   :  { %5808 = vmatpush1.bf16.msra.mxu1 %v8278_v52  ;;  %5790 = vmatprep.subr.bf16.mxu0 %v8283_v53  ;;  %v10818_v52 = vpop.f32.mrf.mxu0  ;;  %v8361_v53 = vld [vmem:[%s11334_s1 + $0x110c] ss:$16 sps:$4 sm:$0xff]  }
 0x289   :  { %5809 = vmatprep.subr.bf16.mxu1 %v8286_v54  ;;  %v8364_v54 = vld [vmem:[%s11334_s1 + $0x138c] ss:$16 sps:$4 sm:$0xff]  }
 0x28b   :  { %5791 = vmatpush2.bf16.msra.mxu0 %v8281_v56  ;;  %v8362_v56 = vld [vmem:[%s11334_s1 + $0x1388] ss:$16 sps:$4 sm:$0xff]  }
 0x28c   :  { %5810 = vmatpush1.bf16.msra.mxu1 %v8284_v57  ;;  %5792 = vmatprep.subr.bf16.mxu0 %v8289_v58  ;;  %v10832_v57 = vpop.f32.mrf.mxu1  ;;  %v10834_v58 = vpop.f32.mrf.mxu0 }
 0x28d   :  { %5811 = vmatprep.subr.bf16.mxu1 %v8292_v59  ;;  %v8367_v59 = vld [vmem:[%s11334_s1 + $0x136c] ss:$16 sps:$4 sm:$0xff]  }
 0x28f   :  { %5793 = vmatpush2.bf16.msra.mxu0 %v8287_v60  ;;  %v8370_v60 = vld [vmem:[%s11334_s1 + $0x14ec] ss:$16 sps:$4 sm:$0xff]  }
 0x290   :  { %5812 = vmatpush1.bf16.msra.mxu1 %v8290_v61  ;;  %5848 = vmatprep.subr.bf16.mxu0 %v8298_v63  ;;  %v8365_v61 = vld [vmem:[%s11334_s1 + $0x1368] ss:$16 sps:$4 sm:$0xff]   ;;  %v10848_v63 = vpop.f32.mrf.mxu1 }
 0x291   :  { %5813 = vmatprep.subr.bf16.mxu1 %v8295_v62  ;;  %v8368_v62 = vld [vmem:[%s11334_s1 + $0x14e8] ss:$16 sps:$4 sm:$0xff]  }
 0x292   :  { %5795 = vmatmul.mubr.bf16.vlgmr.msra.gmra.mxu0 %v8533_v6  ;;  %v8371_v6 = vld [vmem:[%s11334_s1 + $0x1348] ss:$16 sps:$4 sm:$0xff]  }
 0x293   :  { %5849 = vmatpush1.bf16.msra.mxu0 %v8296_v1  ;;  %5880 = vmatprep.mubr.bf16.mxu0 %v8534_v11  ;;  %v8373_v1 = vld [vmem:[%s11334_s1 + $0x134c] ss:$16 sps:$4 sm:$0xff]  }
 0x294   :  { %5814 = vmatpush1.bf16.msra.mxu1 %v8293_v0  ;;  %5850 = vmatprep.subr.bf16.mxu0 %v8304_v3  ;;  %v10850_v0 = vpop.f32.mrf.mxu0  ;;  %v10858_v3 = vpop.f32.mrf.mxu1 }
 0x295   :  { %5815 = vmatprep.subr.bf16.mxu1 %v8301_v2  ;;  %v8376_v2 = vld [vmem:[%s11334_s1 + $0x14cc] ss:$16 sps:$4 sm:$0xff]  }
 0x296   :  { %v10880_v11 = vpop.f32.mrf.mxu1 }
 0x297   :  { %5851 = vmatpush1.bf16.msra.mxu0 %v8302_v5  ;;  %v8535_v5 = vld [vmem:[%s11335_s0 + $0x40] ss:$100 sps:$4 sm:$0xff]  }
 0x298   :  { %5816 = vmatpush1.bf16.msra.mxu1 %v8299_v4  ;;  %5852 = vmatprep.subr.bf16.mxu0 %v8310_v8  ;;  %v10860_v4 = vpop.f32.mrf.mxu0  ;;  %v8379_v8 = vld [vmem:[%s11334_s1 + $0x132c] ss:$16 sps:$4 sm:$0xff]  }
 0x299   :  { %5817 = vmatprep.subr.bf16.mxu1 %v8307_v7  ;;  %v8374_v7 = vld [vmem:[%s11334_s1 + $0x14c8] ss:$16 sps:$4 sm:$0xff]  }
 0x29b   :  { %5853 = vmatpush1.bf16.msra.mxu0 %v8308_v10  ;;  %v8536_v10 = vld [vmem:[%s11335_s0 + $0x54] ss:$100 sps:$4 sm:$0xff]  }
 0x29c   :  { %5818 = vmatpush1.bf16.msra.mxu1 %v8305_v9  ;;  %5854 = vmatprep.subr.bf16.mxu0 %v8316_v13  ;;  %v8382_v9 = vld [vmem:[%s11334_s1 + $0x14ac] ss:$16 sps:$4 sm:$0xff]   ;;  %v8377_v13 = vld [vmem:[%s11334_s1 + $0x1328] ss:$16 sps:$4 sm:$0xff]  }
 0x29d   :  { %5819 = vmatprep.subr.bf16.mxu1 %v8313_v12  ;;  %v10882_v12 = vpop.f32.mrf.mxu0 }
 0x29f   :  { %5855 = vmatpush1.bf16.msra.mxu0 %v8314_v15  ;;  %v8385_v15 = vld [vmem:[%s11334_s1 + $0x130c] ss:$16 sps:$4 sm:$0xff]  }
 0x2a0   :  { %5820 = vmatpush1.bf16.msra.mxu1 %v8311_v14  ;;  %5856 = vmatprep.subr.bf16.mxu0 %v8322_v17  ;;  %v8380_v14 = vld [vmem:[%s11334_s1 + $0x14a8] ss:$16 sps:$4 sm:$0xff]   ;;  %v10896_v17 = vpop.f32.mrf.mxu1 }
 0x2a1   :  { %5821 = vmatprep.subr.bf16.mxu1 %v8319_v16  ;;  %v8388_v16 = vld [vmem:[%s11334_s1 + $0x148c] ss:$16 sps:$4 sm:$0xff]  }
 0x2a3   :  { %5857 = vmatpush1.bf16.msra.mxu0 %v8320_v19  ;;  %v8383_v19 = vld [vmem:[%s11334_s1 + $0x1308] ss:$16 sps:$4 sm:$0xff]  }
 0x2a4   :  { %5822 = vmatpush2.bf16.msra.mxu1 %v8317_v18  ;;  %5858 = vmatprep.subr.bf16.mxu0 %v8328_v21  ;;  %v10898_v18 = vpop.f32.mrf.mxu0  ;;  %v8391_v21 = vld [vmem:[%s11334_s1 + $0x146c] ss:$16 sps:$4 sm:$0xff]  }
 0x2a5   :  { %5823 = vmatprep.subr.bf16.mxu1 %v8325_v20  ;;  %v8386_v20 = vld [vmem:[%s11334_s1 + $0x1488] ss:$16 sps:$4 sm:$0xff]  }
 0x2a7   :  { %5859 = vmatpush1.bf16.msra.mxu0 %v8326_v23  ;;  %v10912_v23 = vpop.f32.mrf.mxu1 }
 0x2a8   :  { %5824 = vmatpush2.bf16.msra.mxu1 %v8323_v22  ;;  %5860 = vmatprep.subr.bf16.mxu0 %v8334_v25  ;;  %v8394_v22 = vld [vmem:[%s11334_s1 + $0x16ec] ss:$16 sps:$4 sm:$0xff]   ;;  %v8389_v25 = vld [vmem:[%s11334_s1 + $0x1468] ss:$16 sps:$4 sm:$0xff]  }
 0x2a9   :  { %5825 = vmatprep.subr.bf16.mxu1 %v8331_v24  ;;  %v10914_v24 = vpop.f32.mrf.mxu0 }
 0x2ab   :  { %5861 = vmatpush1.bf16.msra.mxu0 %v8332_v27  ;;  %v10922_v27 = vpop.f32.mrf.mxu1 }
 0x2ac   :  { %5826 = vmatpush2.bf16.msra.mxu1 %v8329_v26  ;;  %5862 = vmatprep.subr.bf16.mxu0 %v8340_v30  ;;  %v8392_v26 = vld [vmem:[%s11334_s1 + $0x16e8] ss:$16 sps:$4 sm:$0xff]   ;;  %v8397_v30 = vld [vmem:[%s11334_s1 + $0x144c] ss:$16 sps:$4 sm:$0xff]  }
 0x2ad   :  { %5827 = vmatprep.subr.bf16.mxu1 %v8337_v29  ;;  %v10924_v29 = vpop.f32.mrf.mxu0 }
 0x2af   :  { %5863 = vmatpush1.bf16.msra.mxu0 %v8338_v33  ;;  %v8537_v33 = vld [vmem:[%s11335_s0 + $0x48] ss:$100 sps:$4 sm:$0xff]  }
 0x2b0   :  { %5828 = vmatpush2.bf16.msra.mxu1 %v8335_v32  ;;  %5864 = vmatprep.subr.bf16.mxu0 %v8346_v35  ;;  %v8400_v32 = vld [vmem:[%s11334_s1 + $0x16cc] ss:$16 sps:$4 sm:$0xff]   ;;  %v8398_v35 = vld [vmem:[%s11334_s1 + $0x16c8] ss:$16 sps:$4 sm:$0xff]  }
 0x2b1   :  { %5829 = vmatprep.subr.bf16.mxu1 %v8343_v34  ;;  %v8395_v34 = vld [vmem:[%s11334_s1 + $0x1448] ss:$16 sps:$4 sm:$0xff]  }
 0x2b3   :  { %5865 = vmatpush2.bf16.msra.mxu0 %v8344_v39  ;;  %v10943_v39 = vpop.f32.mrf.mxu0 }
 0x2b4   :  { %5830 = vmatpush2.bf16.msra.mxu1 %v8341_v38  ;;  %5866 = vmatprep.subr.bf16.mxu0 %v8352_v41  ;;  %v10941_v38 = vpop.f32.mrf.mxu1  ;;  %v8406_v41 = vld [vmem:[%s11334_s1 + $0x16ac] ss:$16 sps:$4 sm:$0xff]  }
 0x2b5   :  { %5831 = vmatprep.subr.bf16.mxu1 %v8349_v40  ;;  %v8403_v40 = vld [vmem:[%s11334_s1 + $0x142c] ss:$16 sps:$4 sm:$0xff]  }
 0x2b7   :  { %5867 = vmatpush2.bf16.msra.mxu0 %v8350_v44  ;;  %v833_v44 = vlaneseq }
 0x2b8   :  { %5832 = vmatpush2.bf16.msra.mxu1 %v8347_v43  ;;  %5868 = vmatprep.subr.bf16.mxu0 %v8358_v48  ;;  %v8538_v43 = vld [vmem:[%s11335_s0 + $0x5c] ss:$100 sps:$4 sm:$0xff]   ;;  %v8404_v48 = vld [vmem:[%s11334_s1 + $0x16a8] ss:$16 sps:$4 sm:$0xff]  }
 0x2b9   :  { %5833 = vmatprep.subr.bf16.mxu1 %v8355_v47  ;;  %v8401_v47 = vld [vmem:[%s11334_s1 + $0x1428] ss:$16 sps:$4 sm:$0xff]  }
 0x2bb   :  { %5869 = vmatpush2.bf16.msra.mxu0 %v8356_v50  ;;  %v10962_v50 = vpop.f32.mrf.mxu0 }
 0x2bc   :  { %5834 = vmatpush2.bf16.msra.mxu1 %v8353_v49  ;;  %5870 = vmatprep.subr.bf16.mxu0 %v8364_v54  ;;  %v10960_v49 = vpop.f32.mrf.mxu1  ;;  %v8412_v54 = vld [vmem:[%s11334_s1 + $0x168c] ss:$16 sps:$4 sm:$0xff]  }
 0x2bd   :  { %5835 = vmatprep.subr.bf16.mxu1 %v8361_v53  ;;  %v8409_v53 = vld [vmem:[%s11334_s1 + $0x140c] ss:$16 sps:$4 sm:$0xff]  }
 0x2bf   :  { %5871 = vmatpush2.bf16.msra.mxu0 %v8362_v56  ;;  %v8407_v56 = vld [vmem:[%s11334_s1 + $0x1408] ss:$16 sps:$4 sm:$0xff]  }
 0x2c0   :  { %5836 = vmatpush2.bf16.msra.mxu1 %v8359_v55  ;;  %5872 = vmatprep.subr.bf16.mxu0 %v8367_v59  ;;  %v10970_v55 = vshrl.u32 %v833_v44, 7  ;;  %v8410_v59 = vld [vmem:[%s11334_s1 + $0x1688] ss:$16 sps:$4 sm:$0xff]  }
 0x2c1   :  { %5891 = vmatprep.subr.bf16.mxu1 %v8370_v60  ;;  %v10978_v60 = vpop.f32.mrf.mxu1 }
 0x2c3   :  { %5838 = vmatmul.mubr.bf16.vlgmr.msra.gmra.mxu1 %v8535_v5  ;;  %5873 = vmatpush2.bf16.msra.mxu0 %v8365_v61  ;;  %v10980_v61 = vpop.f32.mrf.mxu0 }
 0x2c4   :  { %5892 = vmatpush1.bf16.msra.mxu1 %v8368_v62  ;;  %5874 = vmatprep.subr.bf16.mxu0 %v8373_v1  ;;  %v8415_v62 = vld [vmem:[%s11334_s1 + $0x15ec] ss:$16 sps:$4 sm:$0xff]  }
 0x2c5   :  { %5893 = vmatprep.subr.bf16.mxu1 %v8376_v2  ;;  %5923 = vmatprep.mubr.bf16.mxu1 %v8536_v10  ;;  %v8418_v1 = vld [vmem:[%s11334_s1 + $0x166c] ss:$16 sps:$4 sm:$0xff]   ;;  %v10988_v2 = vpop.f32.mrf.mxu1  ;;  %v10990_v5 = vpop.f32.mrf.mxu0 }
 0x2c6   :  { %v8421_v10 = vld [vmem:[%s11334_s1 + $0x15cc] ss:$16 sps:$4 sm:$0xff]  }
 0x2c7   :  { %5875 = vmatpush2.bf16.msra.mxu0 %v8371_v6  ;;  %v839_v6 = vsub.s32 1, %v10970_v55 }
 0x2c8   :  { %5894 = vmatpush1.bf16.msra.mxu1 %v8374_v7  ;;  %5876 = vmatprep.subr.bf16.mxu0 %v8379_v8  ;;  %v8413_v7 = vld [vmem:[%s11334_s1 + $0x15e8] ss:$16 sps:$4 sm:$0xff]  }
 0x2c9   :  { %5895 = vmatprep.subr.bf16.mxu1 %v8382_v9  ;;  %v8416_v8 = vld [vmem:[%s11334_s1 + $0x1668] ss:$16 sps:$4 sm:$0xff]   ;;  %v11002_v9 = vld [vmem:[%s11337_s2] sm:$0xf] }
 0x2cb   :  { %5877 = vmatpush2.bf16.msra.mxu0 %v8377_v13  ;;  %v8424_v13 = vld [vmem:[%s11334_s1 + $0x164c] ss:$16 sps:$4 sm:$0xff]  }
 0x2cc   :  { %5896 = vmatpush1.bf16.msra.mxu1 %v8380_v14  ;;  %5878 = vmatprep.subr.bf16.mxu0 %v8385_v15  ;;  %v11010_v14 = vpop.f32.mrf.mxu1  ;;  %v11012_v15 = vpop.f32.mrf.mxu0 }
 0x2cd   :  { %5897 = vmatprep.subr.bf16.mxu1 %v8388_v16  ;;  %v840_v16 = vrot.slane %v11002_v9, %v839_v6 }
 0x2cf   :  { %5879 = vmatpush2.bf16.msra.mxu0 %v8383_v19  ;;  %v8419_v19 = vld [vmem:[%s11334_s1 + $0x15c8] ss:$16 sps:$4 sm:$0xff]  }
 0x2d0   :  { %5898 = vmatpush1.bf16.msra.mxu1 %v8386_v20  ;;  %5934 = vmatprep.subr.bf16.mxu0 %v8394_v22  ;;  %v8422_v20 = vld [vmem:[%s11334_s1 + $0x1648] ss:$16 sps:$4 sm:$0xff]   ;;  %v8430_v22 = vld [vmem:[%s11334_s1 + $0x162c] ss:$16 sps:$4 sm:$0xff]  }
 0x2d1   :  { %5899 = vmatprep.subr.bf16.mxu1 %v8391_v21  ;;  %v8427_v21 = vld [vmem:[%s11334_s1 + $0x15ac] ss:$16 sps:$4 sm:$0xff]  }
 0x2d2   :  { %5881 = vmatmul.mubr.bf16.vlgmr.msra.gmra.mxu0 %v8537_v33  ;;  %v8425_v33 = vld [vmem:[%s11334_s1 + $0x15a8] ss:$16 sps:$4 sm:$0xff]  }
 0x2d3   :  { %5935 = vmatpush1.bf16.msra.mxu0 %v8392_v26  ;;  %5966 = vmatprep.mubr.bf16.mxu0 %v8538_v43  ;;  %v11028_v26 = vpop.f32.mrf.mxu1 }
 0x2d4   :  { %5900 = vmatpush1.bf16.msra.mxu1 %v8389_v25  ;;  %5936 = vmatprep.subr.bf16.mxu0 %v8400_v32  ;;  %v4943_v25 = vadd.f32 %v10792_v42, %v840_v16  ;;  %v4939_v32 = vadd.f32 %v10764_v31, %v840_v16  ;;  %v8433_v42 = vld [vmem:[%s11334_s1 + $0x158c] ss:$16 sps:$4 sm:$0xff]   ;;  %v8446_v16 = vld [vmem:[%s11334_s1 + $0x17c8] ss:$16 sps:$4 sm:$0xff]  }
 0x2d5   :  { %5901 = vmatprep.subr.bf16.mxu1 %v8397_v30  ;;  %v11030_v30 = vpop.f32.mrf.mxu0  ;;  %v8436_v31 = vld [vmem:[%s11334_s1 + $0x160c] ss:$16 sps:$4 sm:$0xff]  }
 0x2d6   :  { %v4982_v43 = vadd.f32 %v10816_v51, %v4939_v32  ;;  %v8439_v51 = vld [vmem:[%s11334_s1 + $0x156c] ss:$16 sps:$4 sm:$0xff]   ;;  %v8452_v32 = vld [vmem:[%s11334_s1 + $0x17a8] ss:$16 sps:$4 sm:$0xff]  }
 0x2d7   :  { %5937 = vmatpush1.bf16.msra.mxu0 %v8398_v35  ;;  %v4986_v35 = vadd.f32 %v10848_v63, %v4943_v25  ;;  %v8449_v25 = vld [vmem:[%s11334_s1 + $0x1528] ss:$16 sps:$4 sm:$0xff]  }
 0x2d8   :  { %5902 = vmatpush1.bf16.msra.mxu1 %v8395_v34  ;;  %5938 = vmatprep.subr.bf16.mxu0 %v8406_v41  ;;  %v8428_v34 = vld [vmem:[%s11334_s1 + $0x1628] ss:$16 sps:$4 sm:$0xff]   ;;  %v11046_v41 = vpop.f32.mrf.mxu0 }
 0x2d9   :  { %5903 = vmatprep.subr.bf16.mxu1 %v8403_v40  ;;  %v5243_v40 = vpop.f32.mrf.mxu1  ;;  %v5029_v44 = vadd.f32 %v10850_v0, %v4986_v35  ;;  %v8442_v0 = vld [vmem:[%s11334_s1 + $0x17ec] ss:$16 sps:$4 sm:$0xff]  }
 0x2da   :  { %v11058_v63 = vpop.f32.mrf.mxu0 }
 0x2db   :  { %5939 = vmatpush1.bf16.msra.mxu0 %v8404_v48  ;;  %v8434_v48 = vld [vmem:[%s11334_s1 + $0x1608] ss:$16 sps:$4 sm:$0xff]  }
 0x2dc   :  { %5904 = vmatpush1.bf16.msra.mxu1 %v8401_v47  ;;  %5940 = vmatprep.subr.bf16.mxu0 %v8412_v54  ;;  %v8431_v47 = vld [vmem:[%s11334_s1 + $0x1588] ss:$16 sps:$4 sm:$0xff]   ;;  %v5025_v54 = vadd.f32 %v10818_v52, %v4982_v43  ;;  %v11076_v6 = vpop.f32.mrf.mxu0  ;;  %v8445_v52 = vld [vmem:[%s11334_s1 + $0x154c] ss:$16 sps:$4 sm:$0xff]  }
 0x2dd   :  { %5905 = vmatprep.subr.bf16.mxu1 %v8409_v53  ;;  %v11056_v53 = vpop.f32.mrf.mxu1  ;;  %v8455_v43 = vld [vmem:[%s11334_s1 + $0x1508] ss:$16 sps:$4 sm:$0xff]  }
 0x2df   :  { %5941 = vmatpush1.bf16.msra.mxu0 %v8410_v59  ;;  %v8437_v59 = vld [vmem:[%s11334_s1 + $0x1568] ss:$16 sps:$4 sm:$0xff]  }
 0x2e0   :  { %5906 = vmatpush1.bf16.msra.mxu1 %v8407_v56  ;;  %5942 = vmatprep.subr.bf16.mxu0 %v8418_v1  ;;  %v5072_v56 = vadd.f32 %v10912_v23, %v5029_v44  ;;  %v11074_v1 = vpop.f32.mrf.mxu1  ;;  %v8448_v23 = vld [vmem:[%s11334_s1 + $0x17cc] ss:$16 sps:$4 sm:$0xff]   ;;  %v8458_v44 = vld [vmem:[%s11334_s1 + $0x1788] ss:$16 sps:$4 sm:$0xff]  }
 0x2e1   :  { %5907 = vmatprep.subr.bf16.mxu1 %v8415_v62  ;;  %v8440_v62 = vld [vmem:[%s11334_s1 + $0x17e8] ss:$16 sps:$4 sm:$0xff]  }
 0x2e3   :  { %5943 = vmatpush1.bf16.msra.mxu0 %v8416_v8  ;;  %v5115_v8 = vadd.f32 %v10914_v24, %v5072_v56 }
 0x2e4   :  { %5908 = vmatpush2.bf16.msra.mxu1 %v8413_v7  ;;  %5944 = vmatprep.subr.bf16.mxu0 %v8424_v13  ;;  %v5068_v7 = vadd.f32 %v10880_v11, %v5025_v54  ;;  %v8443_v13 = vld [vmem:[%s11334_s1 + $0x1548] ss:$16 sps:$4 sm:$0xff]   ;;  %v8451_v11 = vld [vmem:[%s11334_s1 + $0x152c] ss:$16 sps:$4 sm:$0xff]  }
 0x2e5   :  { %5909 = vmatprep.subr.bf16.mxu1 %v8421_v10  ;;  %v5158_v24 = vadd.f32 %v10978_v60, %v5115_v8  ;;  %v8460_v60 = vld [vmem:[%s11334_s1 + $0x178c] ss:$16 sps:$4 sm:$0xff]   ;;  %v8539_v8 = vld [vmem:[%s11335_s0 + $0x50] ss:$100 sps:$4 sm:$0xff]  }
 0x2e6   :  { %v5111_v10 = vadd.f32 %v10882_v12, %v5068_v7  ;;  %v8454_v12 = vld [vmem:[%s11334_s1 + $0x17ac] ss:$16 sps:$4 sm:$0xff]  }
 0x2e7   :  { %5945 = vmatpush1.bf16.msra.mxu0 %v8422_v20  ;;  %v11095_v20 = vpop.f32.mrf.mxu0 }
 0x2e8   :  { %5910 = vmatpush2.bf16.msra.mxu1 %v8419_v19  ;;  %5946 = vmatprep.subr.bf16.mxu0 %v8430_v22  ;;  %v11093_v19 = vpop.f32.mrf.mxu1  ;;  %v5201_v22 = vadd.f32 %v10980_v61, %v5158_v24  ;;  %v8475_v24 = vld [vmem:[%s11334_s1 + $0x172c] ss:$16 sps:$4 sm:$0xff]  }
 0x2e9   :  { %5911 = vmatprep.subr.bf16.mxu1 %v8427_v21  ;;  %v5154_v21 = vadd.f32 %v10941_v38, %v5111_v10  ;;  %v8457_v38 = vld [vmem:[%s11334_s1 + $0x150c] ss:$16 sps:$4 sm:$0xff]  }
 0x2ea   :  { %v5244_v35 = vadd.f32 %v5243_v40, %v5201_v22  ;;  %v8466_v40 = vld [vmem:[%s11334_s1 + $0x186c] ss:$16 sps:$4 sm:$0xff]  }
 0x2eb   :  { %5947 = vmatpush1.bf16.msra.mxu0 %v8428_v34  ;;  %v5372_v34 = vpop.f32.mrf.mxu0  ;;  %v5197_v61 = vadd.f32 %v10943_v39, %v5154_v21  ;;  %v8463_v39 = vld [vmem:[%s11334_s1 + $0x176c] ss:$16 sps:$4 sm:$0xff]  }
 0x2ec   :  { %5912 = vmatpush2.bf16.msra.mxu1 %v8425_v33  ;;  %5948 = vmatprep.subr.bf16.mxu0 %v8436_v31  ;;  %v5329_v33 = vpop.f32.mrf.mxu1 }
 0x2ed   :  { %5913 = vmatprep.subr.bf16.mxu1 %v8433_v42  ;;  %v11121_v31 = vpop.f32.mrf.mxu0 }
 0x2ee   :  { %v11119_v42 = vpop.f32.mrf.mxu1 }
 0x2ef   :  { %5949 = vmatpush1.bf16.msra.mxu0 %v8434_v48  ;;  %v5287_v48 = vadd.f32 %v11046_v41, %v5244_v35  ;;  %v5454_v54 = vpop.f32.mrf.mxu0 }
 0x2f0   :  { %5914 = vmatpush2.bf16.msra.mxu1 %v8431_v47  ;;  %5950 = vmatprep.subr.bf16.mxu0 %v8442_v0  ;;  %v5240_v47 = vadd.f32 %v11010_v14, %v5197_v61  ;;  %v5411_v0 = vpop.f32.mrf.mxu1  ;;  %v8469_v14 = vld [vmem:[%s11334_s1 + $0x174c] ss:$16 sps:$4 sm:$0xff]  }
 0x2f1   :  { %5915 = vmatprep.subr.bf16.mxu1 %v8439_v51  ;;  %v835_v51 = vsub.s32 0, %v10970_v55  ;;  %v5330_v41 = vadd.f32 %v5329_v33, %v5287_v48  ;;  %v11154_v7 = vpop.f32.mrf.mxu0  ;;  %v8486_v48 = vld [vmem:[%s11336_s3 + $0x38] sm:$0xff]  }
 0x2f2   :  { %v5283_v56 = vadd.f32 %v11012_v15, %v5240_v47  ;;  %v8472_v15 = vld [vmem:[%s11334_s1 + $0x184c] ss:$16 sps:$4 sm:$0xff]  }
 0x2f3   :  { %5951 = vmatpush2.bf16.msra.mxu0 %v8440_v62  ;;  %v8464_v62 = vld [vmem:[%s11334_s1 + $0x1868] ss:$16 sps:$4 sm:$0xff]  }
 0x2f4   :  { %5916 = vmatpush2.bf16.msra.mxu1 %v8437_v59  ;;  %5952 = vmatprep.subr.bf16.mxu0 %v8448_v23  ;;  %v8461_v59 = vld [vmem:[%s11334_s1 + $0x1768] ss:$16 sps:$4 sm:$0xff]   ;;  %v11152_v23 = vpop.f32.mrf.mxu1  ;;  %v5326_v10 = vadd.f32 %v11074_v1, %v5283_v56  ;;  %v8478_v1 = vld [vmem:[%s11334_s1 + $0x182c] ss:$16 sps:$4 sm:$0xff]  }
 0x2f5   :  { %5917 = vmatprep.subr.bf16.mxu1 %v8445_v52  ;;  %v836_v52 = vrot.slane %v11002_v9, %v835_v51 }
 0x2f6   :  { %v5369_v21 = vadd.f32 %v11076_v6, %v5326_v10 }
 0x2f7   :  { %5953 = vmatpush2.bf16.msra.mxu0 %v8446_v16  ;;  %v8467_v16 = vld [vmem:[%s11334_s1 + $0x1748] ss:$16 sps:$4 sm:$0xff]   ;;  %v4937_v22 = vadd.f32 %v10756_v28, %v836_v52  ;;  %v8484_v28 = vld [vmem:[%s11334_s1 + $0x180c] ss:$16 sps:$4 sm:$0xff]  }
 0x2f8   :  { %5918 = vmatpush2.bf16.msra.mxu1 %v8443_v13  ;;  %5954 = vmatprep.subr.bf16.mxu0 %v8454_v12  ;;  %v5373_v13 = vadd.f32 %v5372_v34, %v5330_v41  ;;  %v4941_v12 = vadd.f32 %v10778_v37, %v836_v52  ;;  %v8473_v37 = vld [vmem:[%s11334_s1 + $0x1728] ss:$16 sps:$4 sm:$0xff]   ;;  %v5412_v6 = vadd.f32 %v5411_v0, %v5369_v21  ;;  %v8487_v0 = vld [vmem:[%s11336_s3 + $0x70] sm:$0xff]  }
 0x2f9   :  { %5919 = vmatprep.subr.bf16.mxu1 %v8451_v11  ;;  %v8470_v11 = vld [vmem:[%s11334_s1 + $0x1848] ss:$16 sps:$4 sm:$0xff]   ;;  %v4980_v61 = vadd.f32 %v10800_v45, %v4937_v22 }
 0x2fa   :  { %v8476_v34 = vld [vmem:[%s11334_s1 + $0x1828] ss:$16 sps:$4 sm:$0xff]  }
 0x2fb   :  { %5955 = vmatpush2.bf16.msra.mxu0 %v8452_v32  ;;  %v5458_v32 = vpop.f32.mrf.mxu0  ;;  %v8485_v45 = vld [vmem:[%s11336_s3 + $0x78] sm:$0xff]  }
 0x2fc   :  { %5920 = vmatpush2.bf16.msra.mxu1 %v8449_v25  ;;  %5956 = vmatprep.subr.bf16.mxu0 %v8460_v60  ;;  %v5415_v25 = vpop.f32.mrf.mxu1 }
 0x2fd   :  { %5921 = vmatprep.subr.bf16.mxu1 %v8457_v38  ;;  %v5416_v33 = vadd.f32 %v5415_v25, %v5373_v13  ;;  %v4984_v38 = vadd.f32 %v10832_v57, %v4941_v12  ;;  %v8479_v57 = vld [vmem:[%s11334_s1 + $0x1708] ss:$16 sps:$4 sm:$0xff]  }
 0x2ff   :  { %5957 = vmatpush2.bf16.msra.mxu0 %v8458_v44  ;;  %v5459_v60 = vadd.f32 %v5458_v32, %v5416_v33  ;;  %v5027_v35 = vadd.f32 %v10834_v58, %v4984_v38  ;;  %v8482_v44 = vld [vmem:[%s11334_s1 + $0x1808] ss:$16 sps:$4 sm:$0xff]   ;;  %v8504_v32 = vld [vmem:[%s11336_s3 + $0xb0] sm:$0xff]   ;;  %v8508_v38 = vld [vmem:[%s11336_s3 + $0xa0] sm:$0xff]  }
 0x300   :  { %5922 = vmatpush2.bf16.msra.mxu1 %v8455_v43  ;;  %5958 = vmatprep.subr.bf16.mxu0 %v8463_v39  ;;  %v5455_v43 = vadd.f32 %v5454_v54, %v5412_v6  ;;  %v5023_v39 = vadd.f32 %v10802_v46, %v4980_v61  ;;  %v8505_v33 = vld [vmem:[%s11336_s3 + $0xe8] sm:$0xff]   ;;  %v8511_v6 = vld [vmem:[%s11336_s3 + $0xd0] sm:$0xff]  }
 0x301   :  { %5985 = vmatprep.subr.bf16.mxu1 %v8466_v40  ;;  %v6025_v58 = vmax.f32 %v5459_v60, 0.0  ;;  %v5070_v40 = vadd.f32 %v10896_v17, %v5027_v35  ;;  %v8540_v17 = vld [vmem:[%s11335_s0 + $0x58] ss:$100 sps:$4 sm:$0xff]   ;;  %v8512_v60 = vld [vmem:[%s11336_s3 + $0x90] sm:$0xff]   ;;  %v8513_v61 = vld [vmem:[%s11336_s3 + $0xc8] sm:$0xff]  }
 0x302   :  { %v6021_v47 = vmax.f32 %v5455_v43, 0.0  ;;  %v5066_v51 = vadd.f32 %v10858_v3, %v5023_v39  ;;  %v8488_v3 = vld [vmem:[%s11336_s3 + $0x30] sm:$0xff]   ;;  %v8514_v35 = vld [vmem:[%s11336_s3 + $0x88] sm:$0xff]   ;;  %v8515_v43 = vld [vmem:[%s11336_s3 + $0xc0] sm:$0xff]  }
 0x303   :  { %5924 = vmatmul.mubr.bf16.vlgmr.msra.gmra.mxu1 %v8539_v8  ;;  %5959 = vmatpush2.bf16.msra.mxu0 %v8461_v59  ;;  %v5113_v46 = vadd.f32 %v10898_v18, %v5070_v40  ;;  %v8541_v59 = vld [vmem:[%s11335_s0 + $0x60] ss:$100 sps:$4 sm:$0xff]   ;;  %v5538_v40 = vpop.f32.mrf.mxu0 }
 0x304   :  { %5986 = vmatpush1.bf16.msra.mxu1 %v8464_v62  ;;  %5960 = vmatprep.subr.bf16.mxu0 %v8469_v14  ;;  %v6029_v54 = vpack.c.bf16 %v6025_v58, %v6021_v47  ;;  %v5109_v56 = vadd.f32 %v10860_v4, %v5066_v51  ;;  %v8489_v4 = vld [vmem:[%s11336_s3 + $0x68] sm:$0xff]  }
 0x305   :  { %5987 = vmatprep.subr.bf16.mxu1 %v8472_v15  ;;  %6009 = vmatprep.mubr.bf16.mxu1 %v8542_v36  ;;  %v8481_v36 = vld [vmem:[%s11334_s1 + $0x170c] ss:$16 sps:$4 sm:$0xff]   ;;  %v5156_v18 = vadd.f32 %v10960_v49, %v5113_v46  ;;  %v8491_v49 = vld [vmem:[%s11336_s3 + $0x60] sm:$0xff]  }
 0x306   :  { %v5152_v62 = vadd.f32 %v10922_v27, %v5109_v56  ;;  %v8490_v15 = vld [vmem:[%s11336_s3 + $0x28] sm:$0xff]   ;;  %v8492_v27 = vld [vmem:[%s11336_s3 + $0x20] sm:$0xff]  }
 0x307   :  { %5961 = vmatpush2.bf16.msra.mxu0 %v8467_v16  ;;  %v5199_v14 = vadd.f32 %v10962_v50, %v5156_v18 }
 0x308   :  { %5988 = vmatpush1.bf16.msra.mxu1 %v8470_v11  ;;  %5962 = vmatprep.subr.bf16.mxu0 %v8475_v24  ;;  %v5195_v41 = vadd.f32 %v10924_v29, %v5152_v62  ;;  %v8493_v29 = vld [vmem:[%s11336_s3 + $0x58] sm:$0xff]  }
 0x309   :  { %5989 = vmatprep.subr.bf16.mxu1 %v8478_v1  ;;  %v5242_v52 = vadd.f32 %v11028_v26, %v5199_v14  ;;  %v8494_v26 = vld [vmem:[%s11336_s3 + $0x18] sm:$0xff]  }
 0x30a   :  { %v5238_v50 = vadd.f32 %v10988_v2, %v5195_v41  ;;  %v8495_v2 = vld [vmem:[%s11336_s3 + $0x50] sm:$0xff]  }
 0x30b   :  { %5963 = vmatpush2.bf16.msra.mxu0 %v8473_v37  ;;  %v5285_v8 = vadd.f32 %v11030_v30, %v5242_v52  ;;  %v8506_v37 = vld [vmem:[%s11336_s3 + $0xa8] sm:$0xff]  }
 0x30c   :  { %5990 = vmatpush1.bf16.msra.mxu1 %v8476_v34  ;;  %5964 = vmatprep.subr.bf16.mxu0 %v8481_v36  ;;  %v5281_v10 = vadd.f32 %v10990_v5, %v5238_v50  ;;  %v8496_v5 = vld [vmem:[%s11336_s3 + $0x10] sm:$0xff]   ;;  %v8507_v34 = vld [vmem:[%s11336_s3 + $0xe0] sm:$0xff]   ;;  %v8509_v36 = vld [vmem:[%s11336_s3 + $0xd8] sm:$0xff]  }
 0x30d   :  { %5991 = vmatprep.subr.bf16.mxu1 %v8484_v28  ;;  %v5328_v13 = vadd.f32 %v11093_v19, %v5285_v8  ;;  %v8497_v19 = vld [vmem:[%s11336_s3 + $0x48] sm:$0xff]   ;;  %v8510_v28 = vld [vmem:[%s11336_s3 + $0x98] sm:$0xff]  }
 0x30e   :  { %v5324_v30 = vadd.f32 %v11056_v53, %v5281_v10  ;;  %v8498_v53 = vld [vmem:[%s11336_s3 + $0x8] sm:$0xff]  }
 0x30f   :  { %5965 = vmatpush2.bf16.msra.mxu0 %v8479_v57  ;;  %v5371_v16 = vadd.f32 %v11095_v20, %v5328_v13  ;;  %v8516_v57 = vld [vmem:[%s11336_s3 + $0x80] sm:$0xff]  }
 0x310   :  { %5992 = vmatpush1.bf16.msra.mxu1 %v8482_v44  ;;  %7227 = vmatprep.subr.bf16.mxu0 %v8485_v45  ;;  %v5367_v11 = vadd.f32 %v11058_v63, %v5324_v30  ;;  %v8499_v63 = vld [vmem:[%s11336_s3 + $0x40] sm:$0xff]   ;;  %v5495_v44 = vpop.f32.mrf.mxu1  ;;  %v843_v30 = vsub.s32 2, %v10970_v55 }
 0x311   :  { %v5414_v12 = vadd.f32 %v11152_v23, %v5371_v16  ;;  %v8500_v23 = vld [vmem:[%s11336_s3] sm:$0xff]  }
 0x312   :  { %5967 = vmatmul.mubr.bf16.vlgmr.msra.gmra.mxu0 %v8540_v17  ;;  %v5410_v20 = vadd.f32 %v11119_v42, %v5367_v11  ;;  %v8501_v42 = vld [vmem:[%s11336_s3 + $0xf8] sm:$0xff]   ;;  %v5497_v39 = vpop.f32.mrf.mxu1 }
 0x313   :  { %7193 = vmatmul.mubr.msk.bf16.vlgmr.msra.gmra.mxu1 %vm4898_vm0, %v8541_v59  ;;  %7228 = vmatpush3.bf16.msra.mxu0 %v8486_v48  ;;  %v5457_v24 = vadd.f32 %v11154_v7, %v5414_v12  ;;  %v8502_v7 = vld [vmem:[%s11336_s3 + $0xb8] sm:$0xff]   ;;  %v5540_v48 = vpop.f32.mrf.mxu0 }
 0x314   :  { %6327 = vmatprep.mubr.bf16.mxu0 %v6029_v54  ;;  %7229 = vmatprep.subr.bf16.mxu0 %v8487_v0  ;;  %v5453_v1 = vadd.f32 %v11121_v31, %v5410_v20  ;;  %v8503_v31 = vld [vmem:[%s11336_s3 + $0xf0] sm:$0xff]   ;;  %v5499_v45 = vpop.f32.mrf.mxu1 }
 0x315   :  { %v6024_v21 = vmax.f32 %v5457_v24, 0.0  ;;  %7249 = vmatprep.subr.bf16.mxu1 %v8501_v42  ;;  %v5542_v46 = vpop.f32.mrf.mxu0 }
 0x316   :  { %v6020_v22 = vmax.f32 %v5453_v1, 0.0  ;;  %7250 = vmatpush3.bf16.msra.mxu1 %v8502_v7  ;;  %v5501_v58 = vpop.f32.mrf.mxu1 }
 0x317   :  { %7230 = vmatpush3.bf16.msra.mxu0 %v8488_v3  ;;  %7251 = vmatprep.subr.bf16.mxu1 %v8503_v31  ;;  %v5544_v54 = vpop.f32.mrf.mxu0 }
 0x318   :  { %7231 = vmatprep.subr.bf16.mxu0 %v8489_v4  ;;  %v6028_v25 = vpack.c.bf16 %v6024_v21, %v6020_v22  ;;  %v5581_v47 = vpop.f32.mrf.mxu1 }
 0x319   :  { %v5624_v17 = vpop.f32.mrf.mxu0 }
 0x31a   :  { %7252 = vmatpush3.bf16.msra.mxu1 %v8504_v32  ;;  %v5583_v51 = vpop.f32.mrf.mxu1 }
 0x31b   :  { %7232 = vmatpush3.bf16.msra.mxu0 %v8490_v15  ;;  %7253 = vmatprep.subr.bf16.mxu1 %v8505_v33  ;;  %v5626_v3 = vpop.f32.mrf.mxu0 }
 0x31c   :  { %7233 = vmatprep.subr.bf16.mxu0 %v8491_v49  ;;  %v5585_v0 = vpop.f32.mrf.mxu1 }
 0x31d   :  { %v5628_v4 = vpop.f32.mrf.mxu0 }
 0x31e   :  { %7254 = vmatpush3.bf16.msra.mxu1 %v8506_v37  ;;  %v5587_v56 = vpop.f32.mrf.mxu1 }
 0x31f   :  { %7234 = vmatpush3.bf16.msra.mxu0 %v8492_v27  ;;  %7255 = vmatprep.subr.bf16.mxu1 %v8507_v34  ;;  %v5630_v14 = vpop.f32.mrf.mxu0 }
 0x320   :  { %7235 = vmatprep.subr.bf16.mxu0 %v8493_v29  ;;  %v5667_v59 = vpop.f32.mrf.mxu1 }
 0x321   :  { %v5710_v41 = vpop.f32.mrf.mxu0 }
 0x322   :  { %7256 = vmatpush3.bf16.msra.mxu1 %v8508_v38  ;;  %v5669_v18 = vpop.f32.mrf.mxu1 }
 0x323   :  { %7236 = vmatpush3.bf16.msra.mxu0 %v8494_v26  ;;  %7257 = vmatprep.subr.bf16.mxu1 %v8509_v36  ;;  %v5712_v52 = vpop.f32.mrf.mxu0 }
 0x324   :  { %7237 = vmatprep.subr.bf16.mxu0 %v8495_v2  ;;  %v5671_v62 = vpop.f32.mrf.mxu1  ;;  %v847_v2 = vsub.s32 3, %v10970_v55 }
 0x325   :  { %v5714_v50 = vpop.f32.mrf.mxu0 }
 0x326   :  { %7258 = vmatpush3.bf16.msra.mxu1 %v8510_v28  ;;  %v5673_v15 = vpop.f32.mrf.mxu1  ;;  %v848_v11 = vrot.slane %v11002_v9, %v847_v2 }
 0x327   :  { %7238 = vmatpush3.bf16.msra.mxu0 %v8496_v5  ;;  %7259 = vmatprep.subr.bf16.mxu1 %v8511_v6  ;;  %v5716_v29 = vpop.f32.mrf.mxu0 }
 0x328   :  { %7239 = vmatprep.subr.bf16.mxu0 %v8497_v19  ;;  %v844_v19 = vrot.slane %v11002_v9, %v843_v30  ;;  %v5498_v20 = vadd.f32 %v5497_v39, %v848_v11 }
 0x32a   :  { %7260 = vmatpush3.bf16.msra.mxu1 %v8512_v60  ;;  %v5496_v24 = vadd.f32 %v5495_v44, %v844_v19  ;;  %v5541_v1 = vadd.f32 %v5540_v48, %v5498_v20 }
 0x32b   :  { %7240 = vmatpush3.bf16.msra.mxu0 %v8498_v53  ;;  %7261 = vmatprep.subr.bf16.mxu1 %v8513_v61 }
 0x32c   :  { %7241 = vmatprep.subr.bf16.mxu0 %v8499_v63  ;;  %v5500_v63 = vadd.f32 %v5499_v45, %v844_v19  ;;  %v5584_v7 = vadd.f32 %v5583_v51, %v5541_v1 }
 0x32e   :  { %7262 = vmatpush3.bf16.msra.mxu1 %v8514_v35  ;;  %v5543_v42 = vadd.f32 %v5542_v46, %v5500_v63  ;;  %v5627_v34 = vadd.f32 %v5626_v3, %v5584_v7 }
 0x32f   :  { %7242 = vmatpush3.bf16.msra.mxu0 %v8500_v23  ;;  %7263 = vmatprep.subr.bf16.mxu1 %v8515_v43  ;;  %v5539_v23 = vadd.f32 %v5538_v40, %v5496_v24 }
 0x330   :  { %v5586_v37 = vadd.f32 %v5585_v0, %v5543_v42  ;;  %v5670_v28 = vadd.f32 %v5669_v18, %v5627_v34 }
 0x331   :  { %v5582_v31 = vadd.f32 %v5581_v47, %v5539_v23 }
 0x332   :  { %6328 = vmatmul.mubr.bf16.vlgmr.msra.gmra.mxu0 %v6028_v25  ;;  %7264 = vmatpush3.bf16.msra.mxu1 %v8516_v57  ;;  %v5502_v25 = vadd.f32 %v5501_v58, %v848_v11  ;;  %v5629_v36 = vadd.f32 %v5628_v4, %v5586_v37  ;;  %v5713_v57 = vadd.f32 %v5712_v52, %v5670_v28 }
 0x333   :  { %v5625_v38 = vadd.f32 %v5624_v17, %v5582_v31 }
 0x334   :  { %v5545_v33 = vadd.f32 %v5544_v54, %v5502_v25  ;;  %v5672_v43 = vadd.f32 %v5671_v62, %v5629_v36 }
 0x335   :  { %v5668_v6 = vadd.f32 %v5667_v59, %v5625_v38  ;;  %v7194_v38 = vld [vmem:[%s11338_s4] ss:$0 sm:$0xff] }
 0x336   :  { %v5588_v9 = vadd.f32 %v5587_v56, %v5545_v33  ;;  %v5715_v45 = vadd.f32 %v5714_v50, %v5672_v43 }
 0x337   :  { %v5711_v44 = vadd.f32 %v5710_v41, %v5668_v6 }
 0x338   :  { %v5631_v35 = vadd.f32 %v5630_v14, %v5588_v9 }
 0x33a   :  { %v5674_v39 = vadd.f32 %v5673_v15, %v5631_v35 }
 0x33c   :  { %v5717_v51 = vadd.f32 %v5716_v29, %v5674_v39 }
 0x343   :  { %v5753_v49 = vpop.f32.mrf.mxu1 }
 0x344   :  { %v5754_v40 = vadd.f32 %v5753_v49, %v5711_v44 }
 0x345   :  { %v5755_v27 = vpop.f32.mrf.mxu1 }
 0x346   :  { %v5756_v58 = vadd.f32 %v5755_v27, %v5713_v57 }
 0x347   :  { %v5757_v8 = vpop.f32.mrf.mxu1 }
 0x348   :  { %v5758_v46 = vadd.f32 %v5757_v8, %v5715_v45 }
 0x349   :  { %v5759_v10 = vpop.f32.mrf.mxu1 }
 0x34a   :  { %v5760_v56 = vadd.f32 %v5759_v10, %v5717_v51 }
 0x352   :  { %v5796_v26 = vpop.f32.mrf.mxu0 }
 0x353   :  { %v5797_v54 = vadd.f32 %v5796_v26, %v5754_v40 }
 0x354   :  { %v5798_v16 = vpop.f32.mrf.mxu0 }
 0x355   :  { %v5799_v0 = vadd.f32 %v5798_v16, %v5756_v58 }
 0x356   :  { %v5800_v12 = vpop.f32.mrf.mxu0 }
 0x357   :  { %v5801_v17 = vadd.f32 %v5800_v12, %v5758_v46 }
 0x358   :  { %v5802_v21 = vpop.f32.mrf.mxu0 }
 0x359   :  { %v5803_v14 = vadd.f32 %v5802_v21, %v5760_v56 }
 0x383   :  { %v5839_v13 = vpop.f32.mrf.mxu1 }
 0x384   :  { %v5840_v59 = vadd.f32 %v5839_v13, %v5797_v54 }
 0x385   :  { %v5841_v5 = vpop.f32.mrf.mxu1 }
 0x386   :  { %v5842_v3 = vadd.f32 %v5841_v5, %v5799_v0 }
 0x387   :  { %v5843_v53 = vpop.f32.mrf.mxu1 }
 0x388   :  { %v5844_v62 = vadd.f32 %v5843_v53, %v5801_v17 }
 0x389   :  { %v5845_v22 = vpop.f32.mrf.mxu1 }
 0x38a   :  { %v5846_v27 = vadd.f32 %v5845_v22, %v5803_v14 }
 0x392   :  { %v5882_v55 = vpop.f32.mrf.mxu0 }
 0x393   :  { %v5883_v41 = vadd.f32 %v5882_v55, %v5840_v59 }
 0x394   :  { %v5884_v60 = vpop.f32.mrf.mxu0 }
 0x395   :  { %v5885_v52 = vadd.f32 %v5884_v60, %v5842_v3 }
 0x396   :  { %v5886_v47 = vpop.f32.mrf.mxu0 }
 0x397   :  { %v5887_v49 = vadd.f32 %v5886_v47, %v5844_v62 }
 0x398   :  { %v5888_v18 = vpop.f32.mrf.mxu0 }
 0x399   :  { %v5889_v16 = vadd.f32 %v5888_v18, %v5846_v27 }
 0x3c3   :  { %v5925_v32 = vpop.f32.mrf.mxu1 }
 0x3c4   :  { %v5926_v30 = vadd.f32 %v5925_v32, %v5883_v41 }
 0x3c5   :  { %v5927_v61 = vpop.f32.mrf.mxu1 }
 0x3c6   :  { %v5928_v2 = vadd.f32 %v5927_v61, %v5885_v52 }
 0x3c7   :  { %v5929_v48 = vpop.f32.mrf.mxu1 }
 0x3c8   :  { %v5930_v26 = vadd.f32 %v5929_v48, %v5887_v49 }
 0x3c9   :  { %v5931_v4 = vpop.f32.mrf.mxu1 }
 0x3ca   :  { %v5932_v19 = vadd.f32 %v5931_v4, %v5889_v16 }
 0x3d2   :  { %v5968_v15 = vpop.f32.mrf.mxu0 }
 0x3d3   :  { %v6011_v50 = vpop.f32.mrf.mxu1  ;;  %v5969_v11 = vadd.f32 %v5968_v15, %v5926_v30 }
 0x3d4   :  { %v5970_v29 = vpop.f32.mrf.mxu0 }
 0x3d5   :  { %v6013_v8 = vpop.f32.mrf.mxu1  ;;  %v5971_v10 = vadd.f32 %v5970_v29, %v5928_v2  ;;  %v6012_v1 = vadd.f32 %v6011_v50, %v5969_v11 }
 0x3d6   :  { %v5972_v5 = vpop.f32.mrf.mxu0 }
 0x3d7   :  { %v6015_v13 = vpop.f32.mrf.mxu1  ;;  %v5973_v12 = vadd.f32 %v5972_v5, %v5930_v26  ;;  %v6014_v53 = vadd.f32 %v6013_v8, %v5971_v10  ;;  %v6022_v7 = vmax.f32 %v6012_v1, 0.0 }
 0x3d8   :  { %v5974_v20 = vpop.f32.mrf.mxu0 }
 0x3d9   :  { %v6016_v24 = vadd.f32 %v6015_v13, %v5973_v12  ;;  %v5975_v63 = vadd.f32 %v5974_v20, %v5932_v19  ;;  %v6017_v23 = vpop.f32.mrf.mxu1  ;;  %v6023_v25 = vmax.f32 %v6014_v53, 0.0 }
 0x3db   :  { %v6018_v21 = vadd.f32 %v6017_v23, %v5975_v63  ;;  %v6026_v22 = vmax.f32 %v6016_v24, 0.0 }
 0x3dd   :  { %v6027_v42 = vmax.f32 %v6018_v21, 0.0  ;;  %v6030_v55 = vpack.c.bf16 %v6026_v22, %v6022_v7 }
 0x3df   :  { %v6031_v31 = vpack.c.bf16 %v6027_v42, %v6023_v25 }
 0x3e1   :  { %6368 = vmatprep.mubr.bf16.mxu1 %v6031_v31 }
 0x3e2   :  { %6369 = vmatmul.mubr.bf16.vlgmr.msra.gmra.mxu1 %v6030_v55 }
 0x3f2   :  { %v7243_v32 = vpop.f32.mrf.mxu0 }
 0x3f4   :  { %v7244_v33 = vpop.f32.mrf.mxu0 }
 0x3f5   :  { %v7245_v34 = vadd.f32 %v7244_v33, %v7243_v32 }
 0x3f6   :  { %v7246_v37 = vpop.f32.mrf.mxu0 }
 0x3f7   :  { %v6330_v6 = vadd.f32 %v7245_v34, %v7194_v38 }
 0x3f8   :  { %v7247_v9 = vpop.f32.mrf.mxu0 }
 0x3f9   :  { %v7248_v60 = vadd.f32 %v7247_v9, %v7246_v37 }
 0x3fb   :  { %v6333_v44 = vadd.f32 %v7248_v60, %v7194_v38 }
 0x4a2   :  { %v7265_v36 = vpop.f32.mrf.mxu1 }
 0x4a4   :  { %v7266_v28 = vpop.f32.mrf.mxu1 }
 0x4a5   :  { %v7267_v61 = vadd.f32 %v7266_v28, %v7265_v36 }
 0x4a6   :  { %v7268_v35 = vpop.f32.mrf.mxu1 }
 0x4a7   :  { %v6371_v43 = vadd.f32 %v7267_v61, %v6330_v6 }
 0x4a8   :  { %v7269_v57 = vpop.f32.mrf.mxu1 }
 0x4a9   :  { %6377 = vst [vmem:[%s11339_s5] sm:$0xff] %v6371_v43  ;;  %v7270_v39 = vadd.f32 %v7269_v57, %v7268_v35 }
 0x4ab   :  { %v6374_v45 = vadd.f32 %v7270_v39, %v6333_v44 }
 0x4ad   :  { %6378 = vst [vmem:[%s11339_s5 + $0x8] sm:$0xff] %v6374_v45 }

</bundles_post_ra>
